<compile_context>
chip_gen: v6e
topology: v6e:2x2x1
jax: 0.10.0
libtpu: 0.0.40
codegen_flags: <defaults>
</compile_context>

<pallas_src>
import jax
import jax.numpy as jnp
from jax.experimental import pallas as pl
from jax.experimental.pallas import tpu as pltpu


def _moe_kernel(act_idx_ref, act_cnt_ref,          # scalar prefetch (SMEM, int32)
                x_ref, w13_ref, w2_ref, rw_ref,    # inputs (VMEM tiles)
                o_ref,                             # output (VMEM tile)
                acc_ref):                          # scratch (VMEM, f32)
    """grid = (token_tile, expert_slot, intermediate_tile)."""
    tt = pl.program_id(0)
    e = pl.program_id(1)
    ti = pl.program_id(2)
    n_e = pl.num_programs(1)
    n_i = pl.num_programs(2)
    TI = w2_ref.shape[1]

    # Zero the f32 output accumulator at the first reduction step of each token tile.
    @pl.when(jnp.logical_and(e == 0, ti == 0))
    def _():
        acc_ref[...] = jnp.zeros_like(acc_ref)

    # Compute only for expert slots active in this token tile.  Inactive slots
    # also re-use the resident weight blocks (their index_map freezes the block
    # index), so they issue no weight DMA at all.
    @pl.when(e < act_cnt_ref[tt])
    def _():
        h = x_ref[...]                                                    # (TT, H)
        # Single wide MXU matmul over the packed [W1_tile | W3_tile] slab.
        ab = jnp.dot(h, w13_ref[0], preferred_element_type=jnp.float32)   # (TT, 2*TI)
        a = ab[:, :TI]                                                    # x @ W1 tile
        b = ab[:, TI:]                                                    # x @ W3 tile
        g = a * jax.nn.sigmoid(a)                                         # fused SiLU
        # Fold the f32 routing weight into the intermediate *before* the cast to
        # the MXU input dtype, then accumulate the down-projection directly into
        # the output accumulator (no per-expert (TT,H) scratch pass).
        inter = (rw_ref[0] * g * b).astype(w2_ref.dtype)                  # (TT, TI)
        acc_ref[...] += jnp.dot(inter, w2_ref[0],
                                preferred_element_type=jnp.float32)       # (TT, H)

    # Cast & write the output block once per token tile.
    @pl.when(jnp.logical_and(e == n_e - 1, ti == n_i - 1))
    def _():
        o_ref[...] = acc_ref[...].astype(o_ref.dtype)


def moe_pallas(x, gate_w, w1, w3, w2, num_experts_per_tok, *,
               tt_tile=256, ti_tile=256):
    """x: (T, H) flattened tokens. Returns (T, H)."""
    T, H = x.shape
    E, _, I = w1.shape
    orig_dtype = x.dtype

    # --- tile selection ---
    TT = int(min(tt_tile, -(-T // 8) * 8))
    TT = max(8, (TT // 8) * 8)
    TI = int(min(ti_tile, I))
    assert H % 128 == 0, "hidden size must be a multiple of 128"
    assert TI % 128 == 0 and I % TI == 0, "intermediate tile must divide I, %128"
    assert TT % 8 == 0, "token tile must be a multiple of 8"

    # --- gating (tiny glue relative to the expert MLPs; plain JAX) ---
    scores = x @ gate_w                                                   # (T, E)
    scores_prob = jax.nn.softmax(scores.astype(jnp.float32), axis=-1)
    expert_weights, expert_indices = jax.lax.top_k(scores_prob, num_experts_per_tok)
    expert_weights = expert_weights / expert_weights.sum(axis=-1, keepdims=True)
    # match the PyTorch module's cast to input dtype, then keep f32 for accumulation
    expert_weights = expert_weights.astype(orig_dtype).astype(jnp.float32)

    one_hot = jax.nn.one_hot(expert_indices, E, dtype=jnp.float32)        # (T, K, E)
    rw = jnp.einsum('tke,tk->et', one_hot, expert_weights)                # (E, T) f32
    tok_mask = one_hot.sum(axis=1)                                        # (T, E) 0/1

    # --- token-tile padding ---
    num_tt = -(-T // TT)
    T_pad = num_tt * TT
    if T_pad != T:
        x_p = jnp.pad(x, ((0, T_pad - T), (0, 0)))
        rw = jnp.pad(rw, ((0, 0), (0, T_pad - T)))
        tok_mask = jnp.pad(tok_mask, ((0, T_pad - T), (0, 0)))
    else:
        x_p = x
    rw = rw[..., None]                                                    # (E, T_pad, 1)

    # --- compacted per-tile active-expert table (1-D int32, scalar-prefetched) ---
    tile_active = tok_mask.reshape(num_tt, TT, E).sum(axis=1) > 0         # (num_tt, E)
    act_cnt = tile_active.sum(axis=1).astype(jnp.int32)                   # (num_tt,)
    order = jnp.argsort(jnp.where(tile_active, 0, 1), axis=1).astype(jnp.int32)
    last_active = order[jnp.arange(num_tt), jnp.maximum(act_cnt - 1, 0)]  # (num_tt,)
    slot = jnp.arange(E, dtype=jnp.int32)[None, :]
    # slots >= count are filled with the last active expert so their block index
    # is identical to the previous grid step (=> Pallas issues no new weight DMA).
    act_idx = jnp.where(slot < act_cnt[:, None], order,
                        last_active[:, None]).astype(jnp.int32).reshape(-1)

    # --- pack W1/W3 per intermediate tile: columns [W1 tile | W3 tile] ---
    nI = I // TI
    w13 = jnp.concatenate(
        [w1.reshape(E, H, nI, TI), w3.reshape(E, H, nI, TI)], axis=-1
    ).reshape(E, H, 2 * I)                                                # (E, H, 2I)

    # --- index maps (scalar-prefetch refs are trailing args) ---
    def _weight_idx(tt, e, ti, aidx, acnt):
        active = e < acnt[tt]
        eidx = aidx[tt * E + e]
        tidx = jnp.where(active, ti, nI - 1)      # freeze block index if inactive
        return eidx, tidx

    def w13_map(tt, e, ti, aidx, acnt):
        eidx, tidx = _weight_idx(tt, e, ti, aidx, acnt)
        return (eidx, 0, tidx)

    def w2_map(tt, e, ti, aidx, acnt):
        eidx, tidx = _weight_idx(tt, e, ti, aidx, acnt)
        return (eidx, tidx, 0)

    def rw_map(tt, e, ti, aidx, acnt):
        return (aidx[tt * E + e], tt, 0)

    def x_map(tt, e, ti, aidx, acnt):
        return (tt, 0)

    # --- explicit VMEM budget, clamped to the physical VMEM of this chip ---
    abytes = jnp.dtype(orig_dtype).itemsize
    wbytes = jnp.dtype(w1.dtype).itemsize
    vmem_bytes = (
        2 * TT * H * abytes           # x tile (double-buffered)
        + 2 * H * (2 * TI) * wbytes   # packed W1|W3 tile
        + 2 * TI * H * wbytes         # W2 tile
        + 2 * TT * 4                  # routing weights (f32)
        + 2 * TT * H * abytes         # output tile
        + TT * H * 4                  # f32 output accumulator (scratch)
    )
    try:
        phys_vmem = int(pltpu.get_tpu_info().vmem_capacity_bytes)
    except Exception:
        phys_vmem = 64 * 1024 * 1024  # smallest per-core VMEM across generations (v7x)
    vmem_limit = max(32 * 1024 * 1024, int(1.3 * vmem_bytes))
    vmem_limit = int(min(vmem_limit, max(phys_vmem - 4 * 1024 * 1024, 16 * 1024 * 1024)))

    out = pl.pallas_call(
        _moe_kernel,
        out_shape=jax.ShapeDtypeStruct((T_pad, H), orig_dtype),
        grid_spec=pltpu.PrefetchScalarGridSpec(
            num_scalar_prefetch=2,
            grid=(num_tt, E, nI),
            in_specs=[
                pl.BlockSpec((TT, H), x_map),               # x
                pl.BlockSpec((1, H, 2 * TI), w13_map),      # packed W1|W3 tile
                pl.BlockSpec((1, TI, H), w2_map),           # W2 tile
                pl.BlockSpec((1, TT, 1), rw_map),           # routing weights
            ],
            out_specs=pl.BlockSpec((TT, H), x_map),
            scratch_shapes=[
                pltpu.VMEM((TT, H), jnp.float32),           # f32 output accumulator
            ],
        ),
        compiler_params=pltpu.CompilerParams(
            dimension_semantics=("parallel", "arbitrary", "arbitrary"),
            vmem_limit_bytes=vmem_limit,
        ),
    )(act_idx, act_cnt, x_p, w13, w2, rw)
    return out[:T]


def ss_minicpm_moe_forward(hidden_states, params, num_experts_per_tok,
                           tt_tile=256, ti_tile=256):
    orig_shape = hidden_states.shape
    x = hidden_states.reshape(-1, orig_shape[-1])
    y = moe_pallas(x, params["gate_w"], params["w1"], params["w3"], params["w2"],
                   num_experts_per_tok, tt_tile=tt_tile, ti_tile=ti_tile)
    return y.reshape(orig_shape)


def moe_reference(hidden_states, params, num_experts_per_tok):
    """Pure-JAX reference of the same math (dense over experts, f32 accumulation)."""
    orig_shape = hidden_states.shape
    x = hidden_states.reshape(-1, orig_shape[-1])
    orig_dtype = x.dtype
    gate_w, w1, w3, w2 = params["gate_w"], params["w1"], params["w3"], params["w2"]
    E = w1.shape[0]

    scores = x @ gate_w
    scores_prob = jax.nn.softmax(scores.astype(jnp.float32), axis=-1)
    ew, ei = jax.lax.top_k(scores_prob, num_experts_per_tok)
    ew = ew / ew.sum(axis=-1, keepdims=True)
    ew = ew.astype(orig_dtype).astype(jnp.float32)
    one_hot = jax.nn.one_hot(ei, E, dtype=jnp.float32)
    rw = jnp.einsum('tke,tk->et', one_hot, ew)                            # (E, T) f32

    a = jnp.einsum('th,ehi->eti', x, w1, preferred_element_type=jnp.float32)
    b = jnp.einsum('th,ehi->eti', x, w3, preferred_element_type=jnp.float32)
    g = a * jax.nn.sigmoid(a)
    inter = (rw[:, :, None] * g * b).astype(w2.dtype)
    y = jnp.einsum('eti,eih->th', inter, w2, preferred_element_type=jnp.float32)
    return y.astype(orig_dtype).reshape(orig_shape)


def _make_case(key, batch, seq, hidden, inter, n_exp, dtype):
    k_x, k_g, k_w1, k_w3, k_w2 = jax.random.split(key, 5)
    hidden_states = jax.random.normal(k_x, (batch, seq, hidden), dtype=dtype)
    params = {
        # gate: torch nn.Linear(hidden, E).weight is (E, H); stored here as (H, E)
        "gate_w": (0.05 * jax.random.normal(k_g, (hidden, n_exp))).astype(dtype),
        # per-expert weights, pre-transposed for x @ W
        "w1": (0.05 * jax.random.normal(k_w1, (n_exp, hidden, inter))).astype(dtype),
        "w3": (0.05 * jax.random.normal(k_w3, (n_exp, hidden, inter))).astype(dtype),
        "w2": (0.05 * jax.random.normal(k_w2, (n_exp, inter, hidden))).astype(dtype),
    }
    return hidden_states, params


if __name__ == "__main__":
    key = jax.random.PRNGKey(0)
    k1, k2 = jax.random.split(key, 2)

    # Case 1: default (large) tiles, bf16 MXU path.  T=512 tokens -> 2 token tiles
    # of 256, 2 intermediate tiles of 256, 8 experts, top-2.
    hs1, p1 = _make_case(k1, batch=2, seq=256, hidden=256, inter=512, n_exp=8,
                         dtype=jnp.bfloat16)
    y1 = jax.block_until_ready(ss_minicpm_moe_forward(hs1, p1, num_experts_per_tok=2))
    y1_ref = jax.block_until_ready(moe_reference(hs1, p1, num_experts_per_tok=2))
    assert y1.shape == hs1.shape and y1.dtype == hs1.dtype
    assert jnp.allclose(y1.astype(jnp.float32), y1_ref.astype(jnp.float32),
                        rtol=3e-2, atol=3e-2), "case 1 mismatch vs reference"

    # Case 2: small tiles, f32, many experts with top-2 so the DMA-level expert
    # skip and the token-padding paths are exercised (T=60 -> pad to 64).
    hs2, p2 = _make_case(k2, batch=2, seq=30, hidden=256, inter=512, n_exp=16,
                         dtype=jnp.float32)
    y2 = jax.block_until_ready(ss_minicpm_moe_forward(hs2, p2, num_experts_per_tok=2,
                                                      tt_tile=32, ti_tile=128))
    y2_ref = jax.block_until_ready(moe_reference(hs2, p2, num_experts_per_tok=2))
    assert y2.shape == hs2.shape and y2.dtype == hs2.dtype
    assert jnp.allclose(y2, y2_ref, rtol=2e-2, atol=2e-2), "case 2 mismatch vs reference"

    print("KERNEL_OK")
</pallas_src>

<mosaic_0001>
module attributes {stable_mosaic.version = 11 : i64} {
  func.func @_moe_kernel(%arg0: i32, %arg1: i32, %arg2: i32, %arg3: memref<16xi32, #tpu.memory_space<smem>>, %arg4: memref<2xi32, #tpu.memory_space<smem>>, %arg5: memref<256x256xbf16, #tpu.memory_space<vmem>>, %arg6: memref<1x256x512xbf16, #tpu.memory_space<vmem>>, %arg7: memref<1x256x256xbf16, #tpu.memory_space<vmem>>, %arg8: memref<1x256x1xf32, #tpu.memory_space<vmem>>, %arg9: memref<256x256xbf16, #tpu.memory_space<vmem>>, %arg10: memref<256x256xf32, #tpu.memory_space<vmem>>) attributes {dimension_semantics = [#tpu.dimension_semantics<parallel>, #tpu.dimension_semantics<arbitrary>, #tpu.dimension_semantics<arbitrary>], iteration_bounds = array<i64: 2, 8, 2>, scalar_prefetch = 2 : i64, scratch_operands = 1 : i64, tpu.core_type = #tpu.core_type<tc>, window_params = [{transform_indices = @transform_0, window_bounds = array<i64: 256, 256>}, {transform_indices = @transform_1, window_bounds = array<i64: 1, 256, 512>}, {transform_indices = @transform_2, window_bounds = array<i64: 1, 256, 256>}, {transform_indices = @transform_3, window_bounds = array<i64: 1, 256, 1>}, {transform_indices = @transform_4, window_bounds = array<i64: 256, 256>}]} {
    %c0_i32 = arith.constant 0 : i32
    %0 = arith.cmpi eq, %arg1, %c0_i32 : i32
    %c0_i32_0 = arith.constant 0 : i32
    %1 = arith.cmpi eq, %arg2, %c0_i32_0 : i32
    %2 = arith.andi %0, %1 : i1
    %3 = arith.extui %2 : i1 to i32
    %c0_i32_1 = arith.constant 0 : i32
    %4 = arith.cmpi ne, %3, %c0_i32_1 : i32
    scf.if %4 {
      %cst = arith.constant 0.000000e+00 : f32
      %15 = vector.broadcast %cst : f32 to vector<256x256xf32>
      %c0 = arith.constant 0 : index
      %c0_4 = arith.constant 0 : index
      %16 = vector.load %arg10[%c0, %c0_4] : memref<256x256xf32, #tpu.memory_space<vmem>>, vector<256x256xf32>
      tpu.vector_store %arg10[%c0, %c0_4], %15 {strides = array<i32>} : memref<256x256xf32, #tpu.memory_space<vmem>>, vector<256x256xf32>,
    } else {
    }
    %5 = arith.index_cast %arg0 : i32 to index
    %6 = memref.load %arg4[%5] : memref<2xi32, #tpu.memory_space<smem>>
    %7 = arith.cmpi slt, %arg1, %6 : i32
    %8 = arith.extui %7 : i1 to i32
    %c0_i32_2 = arith.constant 0 : i32
    %9 = arith.cmpi ne, %8, %c0_i32_2 : i32
    scf.if %9 {
      %c0 = arith.constant 0 : index
      %c0_4 = arith.constant 0 : index
      %15 = vector.load %arg5[%c0, %c0_4] : memref<256x256xbf16, #tpu.memory_space<vmem>>, vector<256x256xbf16>
      %c0_5 = arith.constant 0 : index
      %c0_6 = arith.constant 0 : index
      %c0_7 = arith.constant 0 : index
      %16 = vector.load %arg6[%c0_5, %c0_6, %c0_7] : memref<1x256x512xbf16, #tpu.memory_space<vmem>>, vector<1x256x512xbf16>
      %17 = vector.shape_cast %16 : vector<1x256x512xbf16> to vector<256x512xbf16>
      %cst = arith.constant dense<0.000000e+00> : vector<256x512xf32>
      %18 = tpu.matmul %15, %17, %cst {dimension_numbers = #tpu.dot_dimension_numbers<[1], [0], [0], [1], [0, 0, 1, 1], [], []>} : vector<256x256xbf16>, vector<256x512xbf16>, vector<256x512xf32> -> vector<256x512xf32>
      %19 = vector.extract_strided_slice %18 {offsets = [0, 0], sizes = [256, 256], strides = [1, 1]} : vector<256x512xf32> to vector<256x256xf32>
      %20 = vector.extract_strided_slice %18 {offsets = [0, 256], sizes = [256, 256], strides = [1, 1]} : vector<256x512xf32> to vector<256x256xf32>
      %21 = arith.negf %19 : vector<256x256xf32>
      %22 = math.exp %21 : vector<256x256xf32>
      %cst_8 = arith.constant 1.000000e+00 : f32
      %23 = vector.broadcast %cst_8 : f32 to vector<256x256xf32>
      %24 = arith.addf %23, %22 : vector<256x256xf32>
      %25 = arith.divf %23, %24 : vector<256x256xf32>
      %26 = arith.mulf %19, %25 : vector<256x256xf32>
      %c0_9 = arith.constant 0 : index
      %c0_10 = arith.constant 0 : index
      %c0_11 = arith.constant 0 : index
      %27 = vector.load %arg8[%c0_9, %c0_10, %c0_11] : memref<1x256x1xf32, #tpu.memory_space<vmem>>, vector<1x256x1xf32>
      %28 = vector.shape_cast %27 : vector<1x256x1xf32> to vector<256x1xf32>
      %29 = vector.broadcast %28 : vector<256x1xf32> to vector<256x256xf32>
      %30 = arith.mulf %29, %26 : vector<256x256xf32>
      %31 = arith.mulf %30, %20 : vector<256x256xf32>
      %32 = arith.truncf %31 : vector<256x256xf32> to vector<256x256xbf16>
      %c0_12 = arith.constant 0 : index
      %c0_13 = arith.constant 0 : index
      %33 = vector.load %arg10[%c0_12, %c0_13] : memref<256x256xf32, #tpu.memory_space<vmem>>, vector<256x256xf32>
      %c0_14 = arith.constant 0 : index
      %c0_15 = arith.constant 0 : index
      %c0_16 = arith.constant 0 : index
      %34 = vector.load %arg7[%c0_14, %c0_15, %c0_16] : memref<1x256x256xbf16, #tpu.memory_space<vmem>>, vector<1x256x256xbf16>
      %35 = vector.shape_cast %34 : vector<1x256x256xbf16> to vector<256x256xbf16>
      %cst_17 = arith.constant dense<0.000000e+00> : vector<256x256xf32>
      %36 = tpu.matmul %32, %35, %cst_17 {dimension_numbers = #tpu.dot_dimension_numbers<[1], [0], [0], [1], [0, 0, 1, 1], [], []>} : vector<256x256xbf16>, vector<256x256xbf16>, vector<256x256xf32> -> vector<256x256xf32>
      %37 = arith.addf %33, %36 : vector<256x256xf32>
      %c0_18 = arith.constant 0 : index
      %c0_19 = arith.constant 0 : index
      %38 = vector.load %arg10[%c0_18, %c0_19] : memref<256x256xf32, #tpu.memory_space<vmem>>, vector<256x256xf32>
      tpu.vector_store %arg10[%c0_18, %c0_19], %37 {strides = array<i32>} : memref<256x256xf32, #tpu.memory_space<vmem>>, vector<256x256xf32>,
    } else {
    }
    %c7_i32 = arith.constant 7 : i32
    %10 = arith.cmpi eq, %arg1, %c7_i32 : i32
    %c1_i32 = arith.constant 1 : i32
    %11 = arith.cmpi eq, %arg2, %c1_i32 : i32
    %12 = arith.andi %10, %11 : i1
    %13 = arith.extui %12 : i1 to i32
    %c0_i32_3 = arith.constant 0 : i32
    %14 = arith.cmpi ne, %13, %c0_i32_3 : i32
    scf.if %14 {
      %c0 = arith.constant 0 : index
      %c0_4 = arith.constant 0 : index
      %15 = vector.load %arg10[%c0, %c0_4] : memref<256x256xf32, #tpu.memory_space<vmem>>, vector<256x256xf32>
      %16 = arith.truncf %15 : vector<256x256xf32> to vector<256x256xbf16>
      %c0_5 = arith.constant 0 : index
      %c0_6 = arith.constant 0 : index
      %17 = vector.load %arg9[%c0_5, %c0_6] : memref<256x256xbf16, #tpu.memory_space<vmem>>, vector<256x256xbf16>
      tpu.vector_store %arg9[%c0_5, %c0_6], %16 {strides = array<i32>} : memref<256x256xbf16, #tpu.memory_space<vmem>>, vector<256x256xbf16>,
    } else {
    }
    return
  }
  func.func @transform_0(%arg0: i32, %arg1: i32, %arg2: i32, %arg3: memref<16xi32, #tpu.memory_space<smem>>, %arg4: memref<2xi32, #tpu.memory_space<smem>>) -> (i32, i32) {
    %c0_i32 = arith.constant 0 : i32
    %c0_i32_0 = arith.constant 0 : i32
    return %arg0, %c0_i32 : i32, i32
  }
  func.func @transform_1(%arg0: i32, %arg1: i32, %arg2: i32, %arg3: memref<16xi32, #tpu.memory_space<smem>>, %arg4: memref<2xi32, #tpu.memory_space<smem>>) -> (i32, i32, i32) {
    %0 = arith.index_cast %arg0 : i32 to index
    %1 = memref.load %arg4[%0] : memref<2xi32, #tpu.memory_space<smem>>
    %2 = arith.cmpi slt, %arg1, %1 : i32
    %c8_i32 = arith.constant 8 : i32
    %3 = arith.muli %arg0, %c8_i32 : i32
    %4 = arith.addi %3, %arg1 : i32
    %5 = arith.index_cast %4 : i32 to index
    %6 = memref.load %arg3[%5] : memref<16xi32, #tpu.memory_space<smem>>
    %c1_i32 = arith.constant 1 : i32
    %7 = arith.select %2, %arg2, %c1_i32 : i32
    %c0_i32 = arith.constant 0 : i32
    %c0_i32_0 = arith.constant 0 : i32
    return %6, %c0_i32, %7 : i32, i32, i32
  }
  func.func @transform_2(%arg0: i32, %arg1: i32, %arg2: i32, %arg3: memref<16xi32, #tpu.memory_space<smem>>, %arg4: memref<2xi32, #tpu.memory_space<smem>>) -> (i32, i32, i32) {
    %0 = arith.index_cast %arg0 : i32 to index
    %1 = memref.load %arg4[%0] : memref<2xi32, #tpu.memory_space<smem>>
    %2 = arith.cmpi slt, %arg1, %1 : i32
    %c8_i32 = arith.constant 8 : i32
    %3 = arith.muli %arg0, %c8_i32 : i32
    %4 = arith.addi %3, %arg1 : i32
    %5 = arith.index_cast %4 : i32 to index
    %6 = memref.load %arg3[%5] : memref<16xi32, #tpu.memory_space<smem>>
    %c1_i32 = arith.constant 1 : i32
    %7 = arith.select %2, %arg2, %c1_i32 : i32
    %c0_i32 = arith.constant 0 : i32
    %c0_i32_0 = arith.constant 0 : i32
    return %6, %7, %c0_i32 : i32, i32, i32
  }
  func.func @transform_3(%arg0: i32, %arg1: i32, %arg2: i32, %arg3: memref<16xi32, #tpu.memory_space<smem>>, %arg4: memref<2xi32, #tpu.memory_space<smem>>) -> (i32, i32, i32) {
    %c8_i32 = arith.constant 8 : i32
    %0 = arith.muli %arg0, %c8_i32 : i32
    %1 = arith.addi %0, %arg1 : i32
    %2 = arith.index_cast %1 : i32 to index
    %3 = memref.load %arg3[%2] : memref<16xi32, #tpu.memory_space<smem>>
    %c0_i32 = arith.constant 0 : i32
    %c0_i32_0 = arith.constant 0 : i32
    return %3, %arg0, %c0_i32 : i32, i32, i32
  }
  func.func @transform_4(%arg0: i32, %arg1: i32, %arg2: i32, %arg3: memref<16xi32, #tpu.memory_space<smem>>, %arg4: memref<2xi32, #tpu.memory_space<smem>>) -> (i32, i32) {
    %c0_i32 = arith.constant 0 : i32
    %c0_i32_0 = arith.constant 0 : i32
    return %arg0, %c0_i32 : i32, i32
  }
}

</mosaic_0001>

<bundles_post_ra>
// kernel: tpu_custom_call.1
= control target key start
LH: loop header
LB: loop body
LE: loop exit
PB: predicated region body
PF: predicated region fallthrough
CT: control target
= control target key end

     0   :  { %s5708_s0 = inlined_call_operand.vmem [shape: s32[16], index: 0, kind: input, shape index: {}]   ;;  %s5709_s2 = inlined_call_operand.hbm [shape: bf16[512,256], index: 2, kind: input, shape index: {}]   ;;  %s5710_s3 = inlined_call_operand.hbm [shape: bf16[8,256,1024], index: 3, kind: input, shape index: {}]   ;;  %s5711_s4 = inlined_call_operand.vmem [shape: bf16[8,512,256], index: 4, kind: input, shape index: {}]   ;;  %s5712_s5 = inlined_call_operand.vmem [shape: f32[8,512,1], index: 5, kind: input, shape index: {}]   ;;  %s5713_s6 = inlined_call_operand.hbm [shape: bf16[512,256], index: 6, kind: output, shape index: {}]   ;;  %s5714_s1 = inlined_call_operand.vmem [shape: s32[2], index: 1, kind: input, shape index: {}]  }
   0x1   :  { %5761 = sst [smem:[#allocation57_spill]] %s5709_s2  ;;  %s11_s23 = sshll.u32 %s5708_s0, 4  ;;  %s12_s23 = int_to_ptr.vmem [resolvable:$true] %s11_s23 }
   0x2   :  { %5762 = sst [smem:[#allocation58_spill]] %s5710_s3  ;;  %s15_s26 = sshll.u32 %s5714_s1, 4  ;;  %s16_s26 = int_to_ptr.vmem [resolvable:$true] %s15_s26 }
   0x3   :  { %5763 = sst [smem:[#allocation59_spill]] %s5711_s4  ;;  %s4258_s27 = scalar_lea.vmem %s12_s23, 16 }
   0x4   :  { %5764 = sst [smem:[#allocation60_spill]] %s5712_s5  ;;  %p4259_p0 = scmp.ne.s32.totalorder %s12_s23, %s4258_s27 }
   0x5   :  { %5765 = sst [smem:[#allocation61_spill]] %s5713_s6  ;;  %p4263_p1 = scmp.lt.s32.totalorder %s12_s23, %s12_s23 }
   0x6   :  { %p4264_p2 = scmp.lt.s32.totalorder %s4258_s27, %s4258_s27 }
   0x8   :  { %p4265_p3 = por %p4264_p2, %p4263_p1 }
   0xa   :  { %p4266_p4 = pnand %p4265_p3, %p4259_p0 }
   0xc   :  { %4269 = shalt.err (!%p4266_p4)  }
   0xd   :  { %s4482_s28 = smov [#allocation4]   ;;  %s4270_s29 = scalar_lea.vmem %s16_s26, 16 }
   0xe   :  { %14 = dma.vmem_to_smem %s12_s23, 16, %s4482_s28, [#allocation3] }
   0xf   :  { %p4271_p5 = scmp.ne.s32.totalorder %s16_s26, %s4270_s29  ;;  %p4275_p6 = scmp.lt.s32.totalorder %s16_s26, %s16_s26 }
  0x10   :  { %p4276_p7 = scmp.lt.s32.totalorder %s4270_s29, %s4270_s29 }
  0x12   :  { %p4277_p8 = por %p4276_p7, %p4275_p6 }
  0x14   :  { %p4278_p9 = pnand %p4277_p8, %p4271_p5 }
  0x16   :  { %4281 = shalt.err (!%p4278_p9)  }
  0x17   :  { %s4483_s0 = smov [#allocation5]  }
  0x18   :  { %18 = dma.vmem_to_smem %s16_s26, 16, %s4483_s0, [#allocation3] }
  0x19   :  { %4416 = dma.done.wait [#allocation3], 32 }
  0x1a   :  { %4417 = vsyncadd [#allocation3], 4294967264 }
  0x1b   :  { %20 = sfence }
  0x1c   :  { %21 = vsyncpa [#allocation7], 0 }
  0x1d   :  { %23 = vsyncpa [#allocation7 + $0x1], 0 }
  0x1e   :  { %24 = vsyncpa [#allocation10], 0 }
  0x1f   :  { %26 = vsyncpa [#allocation10 + $0x1], 0 }
  0x20   :  { %27 = vsyncpa [#allocation8], 0 }
  0x21   :  { %29 = vsyncpa [#allocation8 + $0x1], 0  ;;  %s4537_s1 = smov 0   ;;  %s4539_s30 = smov 0  }
  0x22   :  { %s4541_s7 = smov 0   ;;  %s4543_s8 = smov 0  }
  0x23   :  { %s4545_s9 = smov 0   ;;  %s4547_s10 = smov 0  }
  0x24   :  { %s4549_s11 = smov 0   ;;  %s4551_s12 = smov 0  }
  0x25   :  { %s4553_s13 = smov 0   ;;  %s4555_s14 = smov 0  }
  0x26   :  { %s4557_s15 = smov 0   ;;  %s4559_s16 = smov 0  }
  0x27   :  { %s4561_s17 = smov 0  }
  0x28 LB: > { %5766 = sst [smem:[#allocation20_spill]] %s4444_s8  ;;  %s3335_s18 = sadd.s32 4294967295, %s4480_s17   ;;  %s4480_s17 = sphi %s4561_s17, %s35_s17   ;;  %s4476_s16 = sphi %s4559_s16, %s5872_s16   ;;  %s4472_s15 = sphi %s4557_s15, %s5871_s15   ;;  %s4468_s14 = sphi %s4555_s14, %s5870_s14   ;;  %s4464_s13 = sphi %s4553_s13, %s5869_s13   ;;  %s4460_s12 = sphi %s4551_s12, %s5868_s12   ;;  %s4456_s11 = sphi %s4549_s11, %s5867_s11   ;;  %s4452_s10 = sphi %s4547_s10, %s5878_s10   ;;  %s4448_s9 = sphi %s4545_s9, %s5877_s9   ;;  %s4444_s8 = sphi %s4543_s8, %s5876_s8   ;;  %s4440_s7 = sphi %s4541_s7, %s5875_s7   ;;  %s4436_s30 = sphi %s4539_s30, %s5874_s30   ;;  %s4432_s1 = sphi %s4537_s1, %s5873_s1  }
  0x29   : > { %5767 = sst [smem:[#allocation21_spill]] %s4456_s11  ;;  %s3336_s19 = sadd.s32 4294967294, %s4480_s17  }
  0x2a   : > { %5768 = sst [smem:[#allocation22_spill]] %s4460_s12  ;;  %p68_p10 = scmp.ne.s32.totalorder %s4452_s10, %s4448_s9 }
  0x2b   : > { %5769 = sst [smem:[#allocation23_spill]] %s4464_s13  ;;  %p5718_p11 = scmp.eq.s32.totalorder %s4480_s17, 0 }
  0x2c   : > { %5770 = sst [smem:[#allocation24_spill]] %s4468_s14  ;;  %p74_p12 = scmp.ne.s32.totalorder %s4448_s9, %s4444_s8 }
  0x2d   : > { %5771 = sst [smem:[#allocation25_spill]] %s4472_s15  ;;  %p4609_p13 = scmp.eq.s32.totalorder %s3335_s18, 0 }
  0x2e   : > { %5772 = sst [smem:[#allocation26_spill]] %s4476_s16  ;;  %p212_p0 = scmp.eq.s32.totalorder %s3335_s18, 31 }
  0x2f   : > { %p4615_p1 = por %p5718_p11, %p68_p10  ;;  %p218_p2 = scmp.eq.s32.totalorder %s3336_s19, 31 }
  0x30   : > { %p4621_p3 = por %p4609_p13, %p74_p12  ;;  %p4625_p4 = por %p212_p0, %p68_p10 }
  0x31   : > { %p4629_p5 = por %p218_p2, %p74_p12  ;;  %p3691_p6 = scmp.lt.s32.totalorder %s4480_s17, 32 }
  0x32   : > { %s5775_s22 = scalar_select %p4621_p3, 1, 0 }
  0x33   : > { %s5776_s23 = scalar_select %p4625_p4, 1, 0 }
  0x34   : > { %s5778_s24 = scalar_select %p4629_p5, 1, 0 }
  0x35   : > { %5777 = sst [smem:[#allocation27_spill]] %s5776_s23  ;;  %s238_s25 = sand.u32 1, %s4452_s10  }
  0x36   : > { %5779 = sst [smem:[#allocation28_spill]] %s5778_s24  ;;  %s3345_s26 = sshll.u32 %s238_s25, 8 }
  0x37   : > { %s3599_s27 = sshll.u32 %s4476_s16, 12  ;;  %s5780_s2 = sld [smem:[#allocation57_spill]] }
  0x38   : > { %s242_s18 = scalar_lea.vmem [#allocation6], %s3345_s26  ;;  %p4643_p7 = pnand %p3691_p6, %p4615_p1 }
  0x39   : > { %s250_s19 = sshll.u32 %s242_s18, 4  ;;  %p3354_p8 = scmp.ge.s32.totalorder %s4480_s17, 1  ;;  %s251_s19 = int_to_ptr.vmem [resolvable:$true] %s250_s19 }
  0x3a   : > { %s239_s24 = scalar_lea.sflag [#allocation7], %s238_s25  ;;  %p4284_p9 = pneg %p4643_p7 }
  0x3b   : > { %s4295_s6 = scalar_lea.vmem %s251_s19, 4096  ;;  %s4484_s28 = smov [#allocation6]  }
  0x3c   : > { %p4296_p10 = scmp.ne.s32.totalorder %s251_s19, %s4295_s6 }
  0x3d   : > { %s249_s0 = scalar_lea.hbm %s5780_s2, %s3599_s27  ;;  %s4300_s27 = sshll.u32 %s4484_s28, 4  ;;  %s4301_s27 = int_to_ptr.vmem [resolvable:$false] %s4300_s27 }
  0x3e   : > { %p4298_p12 = pnand %p4296_p10, %p4284_p9  ;;  %s4302_s26 = scalar_lea.vmem %s4301_s27, 8192 }
  0x3f   : > { %p4303_p2 = scmp.lt.s32.totalorder %s251_s19, %s4301_s27  ;;  %p4304_p11 = scmp.lt.s32.totalorder %s4302_s26, %s4295_s6 }
  0x40   : > { %p4299_p0 = pneg %p4298_p12 }
  0x41   : > { %p4305_p5 = por %p4304_p11, %p4303_p2 }
  0x43   : > { %p4306_p1 = pnand %p4305_p5, %p4299_p0 }
  0x45   : > { %4309 = shalt.err (!%p4306_p1)
}
  0x46   : > { %s4485_s21 = smov 128   ;;  %s4486_s25 = smov 8  }
  0x47   : > { %3679 = dma.hbm_to_vmem [thread:$0]  (!%p4643_p7), %s249_s0, 4096, %s251_s19, %s239_s24, %s4485_s21, %s4485_s21, %s4486_s25  }
  0x48   : > { %p332_p11 = scmp.lt.s32.totalorder %s4480_s17, 33  ;;  %s61_s29 = sadd.s32 1, %s4452_s10 }
  0x49   : > { %s47_s18 = sadd.s32 1, %s4468_s14  ;;  %s50_s28 = sadd.s32 1, %s4472_s15 }
  0x4a   : > { %p4655_p5 = pnand %p3354_p8, %p332_p11  ;;  %p48_p9 = scmp.ge.s32.totalorder %s47_s18, 2 }
  0x4b   : > { %s84_s27 = sld [smem:[#allocation5 + %s4476_s16]]  ;;  %s54_s26 = sadd.s32 1, %s4476_s16 }
  0x4c   : > { %s5782_s6 = scalar_select %p4655_p5, 1, 0 }
  0x4d   : > { %s5880_s28 = smov (!%p48_p9, %s50_s28), %s4472_s15  ;;  %s5882_s18 = smov (%p48_p9, %s47_s18), 0 }
  0x4e   : > { %5783 = sst [smem:[#allocation29_spill]] %s5882_s18  ;;  %p52_p7 = scmp.ge.s32.totalorder %s5880_s28, 8 }
  0x4f   : > { %s3337_s8 = sshll.u32 %s4476_s16, 3  ;;  %p108_p8 = scmp.ne.s32.totalorder %s4440_s7, %s4436_s30 }
  0x50   : > { %p114_p10 = scmp.ne.s32.totalorder %s4436_s30, %s4432_s1  ;;  %s5884_s28 = smov (%p52_p7, %s5880_s28), 0 }
  0x51   : > { %5784 = sst [smem:[#allocation30_spill]] %s5884_s28  ;;  %s5886_s26 = smov (!%p52_p7, %s54_s26), %s4476_s16 }
  0x52   : > { %p85_p12 = scmp.lt.s32.totalorder %s4472_s15, %s84_s27  ;;  %p5785_p0 = scmp.eq.s32.totalorder %s4480_s17, 0 }
  0x53   : > { %p56_p1 = scmp.ge.s32.totalorder %s5886_s26, 2  ;;  %p4684_p11 = por %p114_p10, %p4609_p13 }
  0x54   : > { %p4678_p2 = por %p108_p8, %p5785_p0  ;;  %s87_s19 = sadd.s32 %s4472_s15, %s3337_s8 }
  0x55   : > { %s5787_s0 = scalar_select %p4684_p11, 1, 0 }
  0x56   : > { %s89_s1 = scalar_select %p85_p12, %s4468_s14, 1 }
  0x57   : > { %5788 = sst [smem:[#allocation31_spill]] %s5787_s0  ;;  %s5888_s26 = smov (%p56_p1, %s5886_s26), 0 }
  0x58   : > { %5789 = sst [smem:[#allocation32_spill]] %s5888_s26  ;;  %p4696_p9 = pnand %p3691_p6, %p4678_p2 }
  0x59   : > { %s58_s20 = ssub.s32 %s4476_s16, %s5888_s26  ;;  %s90_s25 = sld [smem:[#allocation5 + %s5888_s26]] }
  0x5a   : > { %p59_p13 = scmp.eq.s32.totalorder %s58_s20, 0  ;;  %s3338_s27 = sshll.u32 %s5888_s26, 3 }
  0x5b   : > { %s88_s2 = sld [smem:[#allocation4 + %s87_s19]]  ;;  %s93_s23 = sadd.s32 %s3338_s27, %s5884_s28 }
  0x5c   : > { %s4706_s4 = scalar_select %p59_p13, %s4452_s10, %s61_s29  }
  0x5d   : > { %s94_s8 = sld [smem:[#allocation4 + %s93_s23]]  ;;  %s5728_s5 = sand.u32 1, %s4440_s7  }
  0x5e   : > { %s3667_s11 = scalar_select %p4678_p2, [#allocation5], [#allocation12] }
  0x5f   : > { %p91_p7 = scmp.lt.s32.totalorder %s5884_s28, %s90_s25  ;;  %s101_s27 = sadd.s32 1, %s4440_s7 }
  0x60   : > { %s3668_s20 = scalar_select %p4678_p2, %s4476_s16, 0 }
  0x61   : > { %s95_s12 = scalar_select %p91_p7, %s5882_s18, 1 }
  0x62   : > { %s3349_s29 = sshll.u32 %s5728_s5, 9  ;;  %s5890_s11 = smov (!%p3691_p6, %s3667_s11), [#allocation14] }
  0x63   : > { %s96_s26 = ssub.s32 %s88_s2, %s94_s8  ;;  %s97_s13 = ssub.s32 %s89_s1, %s95_s12 }
  0x64   : > { %s98_s0 = sor.u32 %s97_s13, %s96_s26  ;;  %s5892_s20 = smov (!%p3691_p6, %s3668_s20), 0 }
  0x65   : > { %p99_p8 = scmp.eq.s32.totalorder %s98_s0, 0  ;;  %s265_s28 = sld [smem:[%s5890_s11 + %s5892_s20]] }
  0x66   : > { %s3669_s25 = scalar_select %p4678_p2, [#allocation4], [#allocation13] }
  0x67   : > { %s4722_s23 = scalar_select %p99_p8, %s4440_s7, %s101_s27  }
  0x68   : > { %s5894_s19 = smov (!%p4678_p2, %s87_s19), 0  ;;  %s5896_s25 = smov (!%p3691_p6, %s3669_s25), [#allocation15] }
  0x69   : > { %s5898_s19 = smov (!%p3691_p6, %s5894_s19), 0  ;;  %s264_s12 = scalar_lea.vmem [#allocation9], %s3349_s29 }
  0x6a   : > { %s269_s2 = sld [smem:[%s5896_s25 + %s5898_s19]]  ;;  %s279_s13 = sshll.u32 %s264_s12, 4  ;;  %s4736_s13 = int_to_ptr.vmem [resolvable:$true] %s279_s13 }
  0x6b   : > { %p266_p10 = scmp.lt.s32.totalorder %s4472_s15, %s265_s28  ;;  %s5791_s3 = sld [smem:[#allocation58_spill]] }
  0x6c   : > { %s5792_s20 = sand.u32 1, %s4440_s7   ;;  %p4312_p12 = pneg %p4696_p9 }
  0x6d   : > { %s270_s26 = scalar_select %p266_p10, %s4468_s14, 1 }
  0x6e   : > { %s4745_s19 = scalar_lea.sflag [#allocation10], %s5792_s20 }
  0x6f   : > { %s3351_s0 = sshll.u32 %s270_s26, 2 }
  0x70   : > { %s3352_s1 = sshll.u32 %s269_s2, 8 }
  0x71   : > { %s276_s8 = sadd.s32 %s3352_s1, %s3351_s0  ;;  %s4315_s2 = scalar_lea.hbm %s5791_s3, 131072 }
  0x72   : > { %s3353_s27 = sshll.u32 %s276_s8, 6 }
  0x73   : > { %s4741_s24 = scalar_lea.hbm %s5791_s3, %s3353_s27 }
  0x74   : > { %s4310_s28 = scalar_lea.hbm %s4741_s24, 8192  ;;  %p4316_p1 = scmp.lt.s32.totalorder %s4741_s24, %s5791_s3 }
  0x75   : > { %p4311_p6 = scmp.ne.s32.totalorder %s4741_s24, %s4310_s28  ;;  %p4317_p13 = scmp.lt.s32.totalorder %s4315_s2, %s4310_s28 }
  0x77   : > { %p4313_p0 = pnand %p4312_p12, %p4311_p6  ;;  %p4318_p7 = por %p4317_p13, %p4316_p1 }
  0x79   : > { %p4314_p2 = pneg %p4313_p0 }
  0x7b   : > { %p4319_p8 = pnand %p4318_p7, %p4314_p2 }
  0x7d   : > { %4322 = shalt.err (!%p4319_p8)
}
  0x7e   : > { %s4323_s26 = scalar_lea.vmem %s4736_s13, 8192  ;;  %s4487_s0 = smov [#allocation9]  }
  0x7f   : > { %p4324_p10 = scmp.ne.s32.totalorder %s4736_s13, %s4323_s26  ;;  %s4328_s1 = sshll.u32 %s4487_s0, 4  ;;  %s4329_s1 = int_to_ptr.vmem [resolvable:$false] %s4328_s1 }
  0x80   : > { %s4330_s8 = scalar_lea.vmem %s4329_s1, 16384  ;;  %p4331_p0 = scmp.lt.s32.totalorder %s4736_s13, %s4329_s1 }
  0x81   : > { %p4326_p4 = pnand %p4324_p10, %p4312_p12  ;;  %p4332_p11 = scmp.lt.s32.totalorder %s4330_s8, %s4323_s26 }
  0x83   : > { %p4327_p6 = pneg %p4326_p4  ;;  %p4333_p3 = por %p4332_p11, %p4331_p0 }
  0x85   : > { %p4334_p5 = pnand %p4333_p3, %p4327_p6 }
  0x87   : > { %4337 = shalt.err (!%p4334_p5)
}
  0x88   : > { %s4488_s27 = smov 512   ;;  %s4489_s11 = smov 256  }
  0x89   : > { %s4490_s20 = smov 16   ;;  %p5793_p4 = scmp.ne.s32.totalorder %s5782_s6, 0 }
  0x8a   : > { %3686 = dma.hbm_to_vmem [thread:$0]  (!%p4696_p9), %s4741_s24, 8192, %s4736_s13, %s4745_s19, %s4488_s27, %s4489_s11, %s4490_s20  }
  0x8b   : > { %336 = sbr.rel (%p5793_p4) target bundleno = 977 (0x3d1), region = 36  ;;  %s4769_s28 = sand.u32 (!%p5793_p4), 1, %s4448_s9  }
  0x8c   : > { %s5732_s29 = sshll.u32 (!%p5793_p4), %s4769_s28, 8  ;;  %s339_s25 = scalar_lea.sflag (!%p5793_p4), [#allocation7], %s4769_s28 }
  0x8d   : > { %s4775_s2 = scalar_lea.vmem (!%p5793_p4), [#allocation6], %s5732_s29  ;;  %p5794_p3 = scmp.ne.s32.totalorder (!%p5793_p4), %s5775_s22, 0 }
  0x90   : > { %4419 = dma.done.wait (%p5794_p3), %s339_s25, 4096  }
  0x91   : > { %4421 = vsyncadd (%p5794_p3), %s339_s25, 4294963200  ;;  %s5795_s6 = sld [smem:[#allocation31_spill]]  ;;  %s347_s21 = sand.u32 1, %s4436_s30  }
  0x92   : > { %s3356_s13 = sshll.u32 %s347_s21, 9  ;;  %s348_s24 = scalar_lea.sflag [#allocation10], %s347_s21 }
  0x93   : > { %s4782_s19 = scalar_lea.vmem [#allocation9], %s3356_s13 }
  0x97   : > { %p5796_p5 = scmp.ne.s32.totalorder %s5795_s6, 0 }
  0x99   : > { %4423 = dma.done.wait (%p5796_p5), %s348_s24, 8192  }
  0x9a   : > { %4425 = vsyncadd (%p5796_p5), %s348_s24, 4294959104  ;;  %s5797_s12 = sld [smem:[#allocation23_spill]]  ;;  %s5803_s14 = sshll.u32 %s4769_s28, 8 }
  0x9b   : > { %s5798_s5 = sld [smem:[#allocation22_spill]] }
  0x9c   : > { %s5799_s26 = sld [smem:[#allocation21_spill]] }
  0x9d   : > { %s5801_s29 = sld [smem:[#allocation60_spill]] }
  0x9e   : > { %s5802_s15 = sld [smem:[#allocation59_spill]] }
  0xa0   : > { %s3358_s22 = sshll.u32 %s5797_s12, 3  ;;  %s3364_s0 = sshll.u32 %s5797_s12, 5 }
  0xa1   : > { %s417_s1 = sld [smem:[#allocation5 + %s5797_s12]]  ;;  %s420_s8 = sadd.s32 %s5798_s5, %s3358_s22 }
  0xa2   : > { %s421_s27 = sld [smem:[#allocation4 + %s420_s8]]  ;;  %p446_p11 = scmp.lt.s32.totalorder %s3364_s0, 63 }
  0xa3   : > { %s442_s11 = sld [smem:[#allocation4 + %s420_s8]]  ;;  %p457_p9 = scmp.eq.s32.totalorder %s5798_s5, 0 }
  0xa4   : > { %p458_p12 = scmp.eq.s32.totalorder %s5799_s26, 0  ;;  %s5900_s0 = smov (!%p446_p11, %s3364_s0), 63 }
  0xa6   : > { %p4795_p1 = pnand %p458_p12, %p457_p9 }
  0xa7   : > { %p418_p2 = scmp.lt.s32.totalorder %s5798_s5, %s417_s1 }
  0xa8   : > { %p424_p13 = scmp.lt.s32.totalorder %s421_s27, 7 }
  0xa9   : > { %s5902_s26 = smov (!%p418_p2, %s5799_s26), 1  ;;  %p444_p7 = scmp.lt.s32.totalorder %s442_s11, 7 }
  0xaa   : > { %s5904_s27 = smov (!%p424_p13, %s421_s27), 7  ;;  %s3359_s25 = sshll.u32 %s5902_s26, 5 }
  0xab   : > { %p426_p8 = scmp.lt.s32.totalorder %s3359_s25, 63  ;;  %s3361_s6 = sshll.u32 %s5904_s27, 7 }
  0xac   : > { %s5906_s11 = smov (!%p444_p7, %s442_s11), 7  ;;  %s4812_s27 = scalar_lea.vmem [#allocation11], %s5803_s14 }
  0xad   : > { %s5908_s25 = smov (!%p426_p8, %s3359_s25), 63  ;;  %s3365_s21 = sshll.u32 %s5906_s11, 6 }
  0xae   : > { %s3360_s13 = sshll.u32 %s5908_s25, 1  ;;  %s449_s24 = sadd.s32 %s3365_s21, %s5900_s0 }
  0xaf   : > { %s430_s12 = sadd.s32 %s3361_s6, %s3360_s13  ;;  %s3366_s22 = sshll.u32 %s449_s24, 3 }
  0xb0   : > { %s3362_s5 = sshll.u32 %s430_s12, 2  ;;  %s4803_s3 = scalar_lea.vmem %s5801_s29, %s3366_s22 }
  0xb1   : > { %s4808_s26 = scalar_lea.vmem %s5802_s15, %s3362_s5  ;;  %462 = sbr.rel (%p4795_p1) target bundleno = 215 (0xd7), region = 48 }
  0xb6   : > { %v4491_v0 = vmov 0.0  }
  0xb7   : > { %463 = vst [vmem:[#allocation2 + $0xb0] sm:$0xff] %v4491_v0  ;;  %464 = vst [vmem:[#allocation2 + $0x1b0] sm:$0xff] %v4491_v0 }
  0xb8   : > { %465 = vst [vmem:[#allocation2 + $0xd8] sm:$0xff] %v4491_v0  ;;  %466 = vst [vmem:[#allocation2 + $0x18] sm:$0xff] %v4491_v0 }
  0xb9   : > { %467 = vst [vmem:[#allocation2 + $0x50] sm:$0xff] %v4491_v0  ;;  %468 = vst [vmem:[#allocation2 + $0x168] sm:$0xff] %v4491_v0 }
  0xba   : > { %469 = vst [vmem:[#allocation2 + $0x130] sm:$0xff] %v4491_v0  ;;  %470 = vst [vmem:[#allocation2 + $0x48] sm:$0xff] %v4491_v0 }
  0xbb   : > { %471 = vst [vmem:[#allocation2 + $0x180] sm:$0xff] %v4491_v0  ;;  %472 = vst [vmem:[#allocation2 + $0x110] sm:$0xff] %v4491_v0 }
  0xbc   : > { %473 = vst [vmem:[#allocation2 + $0x118] sm:$0xff] %v4491_v0  ;;  %474 = vst [vmem:[#allocation2 + $0x98] sm:$0xff] %v4491_v0 }
  0xbd   : > { %475 = vst [vmem:[#allocation2 + $0x120] sm:$0xff] %v4491_v0  ;;  %476 = vst [vmem:[#allocation2 + $0x150] sm:$0xff] %v4491_v0 }
  0xbe   : > { %477 = vst [vmem:[#allocation2 + $0x108] sm:$0xff] %v4491_v0  ;;  %478 = vst [vmem:[#allocation2 + $0x60] sm:$0xff] %v4491_v0 }
  0xbf   : > { %479 = vst [vmem:[#allocation2 + $0xe0] sm:$0xff] %v4491_v0  ;;  %480 = vst [vmem:[#allocation2 + $0x188] sm:$0xff] %v4491_v0 }
  0xc0   : > { %481 = vst [vmem:[#allocation2 + $0x138] sm:$0xff] %v4491_v0  ;;  %482 = vst [vmem:[#allocation2 + $0x140] sm:$0xff] %v4491_v0 }
  0xc1   : > { %483 = vst [vmem:[#allocation2 + $0x80] sm:$0xff] %v4491_v0  ;;  %484 = vst [vmem:[#allocation2 + $0x1a8] sm:$0xff] %v4491_v0 }
  0xc2   : > { %485 = vst [vmem:[#allocation2 + $0x1b8] sm:$0xff] %v4491_v0  ;;  %486 = vst [vmem:[#allocation2 + $0x28] sm:$0xff] %v4491_v0 }
  0xc3   : > { %487 = vst [vmem:[#allocation2 + $0x1e8] sm:$0xff] %v4491_v0  ;;  %488 = vst [vmem:[#allocation2 + $0xf8] sm:$0xff] %v4491_v0 }
  0xc4   : > { %489 = vst [vmem:[#allocation2 + $0x160] sm:$0xff] %v4491_v0  ;;  %490 = vst [vmem:[#allocation2 + $0x30] sm:$0xff] %v4491_v0 }
  0xc5   : > { %491 = vst [vmem:[#allocation2 + $0x1e0] sm:$0xff] %v4491_v0  ;;  %492 = vst [vmem:[#allocation2] sm:$0xff] %v4491_v0 }
  0xc6   : > { %493 = vst [vmem:[#allocation2 + $0xf0] sm:$0xff] %v4491_v0  ;;  %494 = vst [vmem:[#allocation2 + $0x8] sm:$0xff] %v4491_v0 }
  0xc7   : > { %495 = vst [vmem:[#allocation2 + $0x148] sm:$0xff] %v4491_v0  ;;  %496 = vst [vmem:[#allocation2 + $0x1d0] sm:$0xff] %v4491_v0 }
  0xc8   : > { %497 = vst [vmem:[#allocation2 + $0x100] sm:$0xff] %v4491_v0  ;;  %498 = vst [vmem:[#allocation2 + $0xc8] sm:$0xff] %v4491_v0 }
  0xc9   : > { %499 = vst [vmem:[#allocation2 + $0x40] sm:$0xff] %v4491_v0  ;;  %500 = vst [vmem:[#allocation2 + $0x1f8] sm:$0xff] %v4491_v0 }
  0xca   : > { %501 = vst [vmem:[#allocation2 + $0x20] sm:$0xff] %v4491_v0  ;;  %502 = vst [vmem:[#allocation2 + $0x128] sm:$0xff] %v4491_v0 }
  0xcb   : > { %503 = vst [vmem:[#allocation2 + $0x1a0] sm:$0xff] %v4491_v0  ;;  %504 = vst [vmem:[#allocation2 + $0x1f0] sm:$0xff] %v4491_v0 }
  0xcc   : > { %505 = vst [vmem:[#allocation2 + $0xe8] sm:$0xff] %v4491_v0  ;;  %506 = vst [vmem:[#allocation2 + $0x78] sm:$0xff] %v4491_v0 }
  0xcd   : > { %507 = vst [vmem:[#allocation2 + $0x70] sm:$0xff] %v4491_v0  ;;  %508 = vst [vmem:[#allocation2 + $0x90] sm:$0xff] %v4491_v0 }
  0xce   : > { %509 = vst [vmem:[#allocation2 + $0x1d8] sm:$0xff] %v4491_v0  ;;  %510 = vst [vmem:[#allocation2 + $0xd0] sm:$0xff] %v4491_v0 }
  0xcf   : > { %511 = vst [vmem:[#allocation2 + $0xb8] sm:$0xff] %v4491_v0  ;;  %512 = vst [vmem:[#allocation2 + $0x88] sm:$0xff] %v4491_v0 }
  0xd0   : > { %513 = vst [vmem:[#allocation2 + $0xa8] sm:$0xff] %v4491_v0  ;;  %514 = vst [vmem:[#allocation2 + $0x1c8] sm:$0xff] %v4491_v0 }
  0xd1   : > { %515 = vst [vmem:[#allocation2 + $0x170] sm:$0xff] %v4491_v0  ;;  %516 = vst [vmem:[#allocation2 + $0x178] sm:$0xff] %v4491_v0 }
  0xd2   : > { %517 = vst [vmem:[#allocation2 + $0x68] sm:$0xff] %v4491_v0  ;;  %518 = vst [vmem:[#allocation2 + $0x190] sm:$0xff] %v4491_v0 }
  0xd3   : > { %519 = vst [vmem:[#allocation2 + $0x198] sm:$0xff] %v4491_v0  ;;  %520 = vst [vmem:[#allocation2 + $0x38] sm:$0xff] %v4491_v0 }
  0xd4   : > { %521 = vst [vmem:[#allocation2 + $0xc0] sm:$0xff] %v4491_v0  ;;  %522 = vst [vmem:[#allocation2 + $0x1c0] sm:$0xff] %v4491_v0 }
  0xd5   : > { %523 = vst [vmem:[#allocation2 + $0x158] sm:$0xff] %v4491_v0  ;;  %524 = vst [vmem:[#allocation2 + $0x10] sm:$0xff] %v4491_v0 }
  0xd6   : > { %525 = vst [vmem:[#allocation2 + $0x58] sm:$0xff] %v4491_v0  ;;  %526 = vst [vmem:[#allocation2 + $0xa0] sm:$0xff] %v4491_v0 }
  0xd7 PF: > { %s5804_s14 = sld [smem:[#allocation23_spill]] }
  0xd8   : > { %s5805_s16 = sld [smem:[#allocation22_spill]] }
  0xdd   : > { %s527_s15 = sld [smem:[#allocation5 + %s5804_s14]] }
  0xe3   : > { %p3367_p10 = scmp.ge.s32.totalorder %s5805_s16, %s527_s15 }
  0xe5   : > { %531 = sbr.rel (%p3367_p10) target bundleno = 906 (0x38a), region = 52 }
  0xea   : > { %v3810_v1 = vld [vmem:[%s4782_s19 + $0xe4] ss:$16 sps:$4 sm:$0xff]   ;;  %v3812_v2 = vld [vmem:[%s4782_s19 + $0xe0] ss:$16 sps:$4 sm:$0xff]   ;;  %v4492_v6 = vmov 0   ;;  %v1943_v45 = vld [vmem:[%s4803_s3 + $0x8] sm:$0xff] }
  0xeb   : > { %1108 = vmatprep.subr.bf16.mxu0 %v3810_v1  ;;  %3634 = vmatprep.subr.bf16.mxu1 %v3810_v1  ;;  %v3813_v3 = vld [vmem:[%s4782_s19 + $0xc4] ss:$16 sps:$4 sm:$0xff]   ;;  %v3815_v4 = vld [vmem:[%s4782_s19 + $0xc0] ss:$16 sps:$4 sm:$0xff]   ;;  %v3866_v36 = vld [vmem:[%s4782_s19 + $0xec] ss:$16 sps:$4 sm:$0xff]  }
  0xec   : > { %1109 = vmatpush1.bf16.msra.mxu0 %v3812_v2  ;;  %3650 = vmatpush1.bf16.msra.mxu1 %v3812_v2  ;;  %v3816_v5 = vld [vmem:[%s4782_s19 + $0xa4] ss:$16 sps:$4 sm:$0xff]   ;;  %v3818_v7 = vld [vmem:[%s4782_s19 + $0xa0] ss:$16 sps:$4 sm:$0xff]   ;;  %v3864_v39 = vld [vmem:[%s4782_s19 + $0xe8] ss:$16 sps:$4 sm:$0xff]  }
  0xed   : > { %1110 = vmatprep.subr.bf16.mxu0 %v3813_v3  ;;  %3635 = vmatprep.subr.bf16.mxu1 %v3813_v3  ;;  %v3819_v8 = vld [vmem:[%s4782_s19 + $0x84] ss:$16 sps:$4 sm:$0xff]   ;;  %v3821_v9 = vld [vmem:[%s4782_s19 + $0x80] ss:$16 sps:$4 sm:$0xff]   ;;  %v3869_v40 = vld [vmem:[%s4782_s19 + $0xcc] ss:$16 sps:$4 sm:$0xff]  }
  0xee   : > { %3808 = vset.pattern.permute.xlu0 %v4492_v6  ;;  %3809 = vset.pattern.permute.xlu1 %v4492_v6  ;;  %v3822_v10 = vld [vmem:[%s4782_s19 + $0x64] ss:$16 sps:$4 sm:$0xff]   ;;  %v3824_v11 = vld [vmem:[%s4782_s19 + $0x60] ss:$16 sps:$4 sm:$0xff]   ;;  %v1945_v46 = vld [vmem:[%s4803_s3 + $0x18] sm:$0xff] }
  0xef   : > { %v3825_v12 = vld [vmem:[%s4782_s19 + $0x44] ss:$16 sps:$4 sm:$0xff]   ;;  %v3827_v13 = vld [vmem:[%s4782_s19 + $0x40] ss:$16 sps:$4 sm:$0xff]   ;;  %v3867_v47 = vld [vmem:[%s4782_s19 + $0xc8] ss:$16 sps:$4 sm:$0xff]  }
  0xf0   : > { %1111 = vmatpush1.bf16.msra.mxu0 %v3815_v4  ;;  %3651 = vmatpush1.bf16.msra.mxu1 %v3815_v4  ;;  %v3828_v14 = vld [vmem:[%s4782_s19 + $0x24] ss:$16 sps:$4 sm:$0xff]   ;;  %v3830_v16 = vld [vmem:[%s4782_s19 + $0x20] ss:$16 sps:$4 sm:$0xff]   ;;  %v3878_v48 = vld [vmem:[%s4782_s19 + $0xac] ss:$16 sps:$4 sm:$0xff]  }
  0xf1   : > { %1112 = vmatprep.subr.bf16.mxu0 %v3816_v5  ;;  %3636 = vmatprep.subr.bf16.mxu1 %v3816_v5  ;;  %v4896_v15 = vld [vmem:[%s4775_s2 + $0x4] ss:$8 sps:$4 sm:$0xff]   ;;  %v3833_v19 = vld [vmem:[%s4782_s19] ss:$16 sps:$4 sm:$0xff]   ;;  %v4932_v41 = vld [vmem:[%s4775_s2 + $0x14] ss:$8 sps:$4 sm:$0xff]  }
  0xf2   : > { %v4900_v17 = vld [vmem:[%s4775_s2 + $0x84] ss:$8 sps:$4 sm:$0xff]   ;;  %1140 = vmatprep.mubr.bf16.mxu0 %v4896_v15  ;;  %v3836_v21 = vld [vmem:[%s4782_s19 + $0x1e0] ss:$16 sps:$4 sm:$0xff]   ;;  %v4935_v42 = vld [vmem:[%s4775_s2 + $0x94] ss:$8 sps:$4 sm:$0xff]  }
  0xf3   : > { %v3831_v18 = vld [vmem:[%s4782_s19 + $0x4] ss:$16 sps:$4 sm:$0xff]   ;;  %1220 = vmatprep.mubr.bf16.mxu1 %v4900_v17  ;;  %v3839_v23 = vld [vmem:[%s4782_s19 + $0x1c0] ss:$16 sps:$4 sm:$0xff]   ;;  %v1947_v52 = vld [vmem:[%s4803_s3 + $0x28] sm:$0xff] }
  0xf4   : > { %1113 = vmatpush1.bf16.msra.mxu0 %v3818_v7  ;;  %3652 = vmatpush1.bf16.msra.mxu1 %v3818_v7  ;;  %v3834_v20 = vld [vmem:[%s4782_s19 + $0x1e4] ss:$16 sps:$4 sm:$0xff]   ;;  %v3842_v25 = vld [vmem:[%s4782_s19 + $0x1a0] ss:$16 sps:$4 sm:$0xff]   ;;  %v3876_v53 = vld [vmem:[%s4782_s19 + $0xa8] ss:$16 sps:$4 sm:$0xff]  }
  0xf5   : > { %1114 = vmatprep.subr.bf16.mxu0 %v3819_v8  ;;  %3637 = vmatprep.subr.bf16.mxu1 %v3819_v8  ;;  %v3837_v22 = vld [vmem:[%s4782_s19 + $0x1c4] ss:$16 sps:$4 sm:$0xff]   ;;  %v3845_v27 = vld [vmem:[%s4782_s19 + $0x180] ss:$16 sps:$4 sm:$0xff]   ;;  %v3881_v55 = vld [vmem:[%s4782_s19 + $0x8c] ss:$16 sps:$4 sm:$0xff]  }
  0xf6   : > { %v3840_v24 = vld [vmem:[%s4782_s19 + $0x1a4] ss:$16 sps:$4 sm:$0xff]   ;;  %v3848_v29 = vld [vmem:[%s4782_s19 + $0x160] ss:$16 sps:$4 sm:$0xff]   ;;  %v3879_v57 = vld [vmem:[%s4782_s19 + $0x88] ss:$16 sps:$4 sm:$0xff]  }
  0xf7   : > { %v3843_v26 = vld [vmem:[%s4782_s19 + $0x184] ss:$16 sps:$4 sm:$0xff]   ;;  %v3851_v31 = vld [vmem:[%s4782_s19 + $0x140] ss:$16 sps:$4 sm:$0xff]   ;;  %v3890_v58 = vld [vmem:[%s4782_s19 + $0x6c] ss:$16 sps:$4 sm:$0xff]  }
  0xf8   : > { %1115 = vmatpush1.bf16.msra.mxu0 %v3821_v9  ;;  %3653 = vmatpush1.bf16.msra.mxu1 %v3821_v9  ;;  %v3846_v28 = vld [vmem:[%s4782_s19 + $0x164] ss:$16 sps:$4 sm:$0xff]   ;;  %v3854_v33 = vld [vmem:[%s4782_s19 + $0x120] ss:$16 sps:$4 sm:$0xff]   ;;  %v1949_v60 = vld [vmem:[%s4803_s3 + $0x38] sm:$0xff] }
  0xf9   : > { %1116 = vmatprep.subr.bf16.mxu0 %v3822_v10  ;;  %3638 = vmatprep.subr.bf16.mxu1 %v3822_v10  ;;  %v3849_v30 = vld [vmem:[%s4782_s19 + $0x144] ss:$16 sps:$4 sm:$0xff]   ;;  %v3857_v35 = vld [vmem:[%s4782_s19 + $0x100] ss:$16 sps:$4 sm:$0xff]   ;;  %v1951_v0 = vld [vmem:[%s4803_s3 + $0x48] sm:$0xff] }
  0xfa   : > { %v3852_v32 = vld [vmem:[%s4782_s19 + $0x124] ss:$16 sps:$4 sm:$0xff]   ;;  %v4924_v37 = vld [vmem:[%s4775_s2] ss:$8 sps:$4 sm:$0xff]   ;;  %v4948_v49 = vld [vmem:[%s4775_s2 + $0x10] ss:$8 sps:$4 sm:$0xff]  }
  0xfb   : > { %v3855_v34 = vld [vmem:[%s4782_s19 + $0x104] ss:$16 sps:$4 sm:$0xff]   ;;  %v4927_v38 = vld [vmem:[%s4775_s2 + $0x80] ss:$8 sps:$4 sm:$0xff]   ;;  %v4951_v50 = vld [vmem:[%s4775_s2 + $0x90] ss:$8 sps:$4 sm:$0xff]  }
  0xfc   : > { %1117 = vmatpush1.bf16.msra.mxu0 %v3824_v11  ;;  %3654 = vmatpush1.bf16.msra.mxu1 %v3824_v11  ;;  %v1942_v43 = vld [vmem:[%s4803_s3] sm:$0xff]  ;;  %v1944_v44 = vld [vmem:[%s4803_s3 + $0x10] sm:$0xff]  ;;  %v3888_v1 = vld [vmem:[%s4782_s19 + $0x68] ss:$16 sps:$4 sm:$0xff]  }
  0xfd   : > { %1118 = vmatprep.subr.bf16.mxu0 %v3825_v12  ;;  %3639 = vmatprep.subr.bf16.mxu1 %v3825_v12  ;;  %v1946_v51 = vld [vmem:[%s4803_s3 + $0x20] sm:$0xff]  ;;  %v1948_v59 = vld [vmem:[%s4803_s3 + $0x30] sm:$0xff]  ;;  %v3893_v3 = vld [vmem:[%s4782_s19 + $0x4c] ss:$16 sps:$4 sm:$0xff]  }
  0xfe   : > { %1976 = vperm.xlu0 %3808, %v1942_v43   ;;  %1986 = vperm.xlu1 %3809, %v1944_v44   ;;  %v4957_v54 = vld [vmem:[%s4775_s2 + $0x24] ss:$8 sps:$4 sm:$0xff]   ;;  %v4972_v61 = vld [vmem:[%s4775_s2 + $0x20] ss:$8 sps:$4 sm:$0xff]   ;;  %v4981_v2 = vld [vmem:[%s4775_s2 + $0x34] ss:$8 sps:$4 sm:$0xff]  }
  0xff   : > { %v4961_v56 = vld [vmem:[%s4775_s2 + $0xa4] ss:$8 sps:$4 sm:$0xff]   ;;  %v4975_v62 = vld [vmem:[%s4775_s2 + $0xa0] ss:$8 sps:$4 sm:$0xff]   ;;  %v4985_v4 = vld [vmem:[%s4775_s2 + $0xb4] ss:$8 sps:$4 sm:$0xff]  }
 0x100   : > { %1119 = vmatpush1.bf16.msra.mxu0 %v3827_v13  ;;  %3655 = vmatpush1.bf16.msra.mxu1 %v3827_v13  ;;  %v1950_v63 = vld [vmem:[%s4803_s3 + $0x40] sm:$0xff]  ;;  %v1952_v5 = vld [vmem:[%s4803_s3 + $0x50] sm:$0xff]  ;;  %v1953_v6 = vld [vmem:[%s4803_s3 + $0x58] sm:$0xff] }
 0x101   : > { %1120 = vmatprep.subr.bf16.mxu0 %v3828_v14  ;;  %3640 = vmatprep.subr.bf16.mxu1 %v3828_v14  ;;  %v3891_v7 = vld [vmem:[%s4782_s19 + $0x48] ss:$16 sps:$4 sm:$0xff]   ;;  %v3902_v8 = vld [vmem:[%s4782_s19 + $0x2c] ss:$16 sps:$4 sm:$0xff]   ;;  %v1954_v11 = vld [vmem:[%s4803_s3 + $0x60] sm:$0xff] }
 0x102   : > { %1981 = vperm.xlu0 %3808, %v1943_v45   ;;  %1991 = vperm.xlu1 %3809, %v1945_v46   ;;  %v4996_v9 = vld [vmem:[%s4775_s2 + $0x30] ss:$8 sps:$4 sm:$0xff]   ;;  %v1955_v12 = vld [vmem:[%s4803_s3 + $0x68] sm:$0xff] }
 0x103   : > { %v4999_v10 = vld [vmem:[%s4775_s2 + $0xb0] ss:$8 sps:$4 sm:$0xff]   ;;  %v5005_v14 = vld [vmem:[%s4775_s2 + $0x44] ss:$8 sps:$4 sm:$0xff]  }
 0x104   : > { %1121 = vmatpush1.bf16.msra.mxu0 %v3830_v16  ;;  %3656 = vmatpush1.bf16.msra.mxu1 %v3830_v16  ;;  %v3900_v13 = vld [vmem:[%s4782_s19 + $0x28] ss:$16 sps:$4 sm:$0xff]   ;;  %v3905_v16 = vld [vmem:[%s4782_s19 + $0xc] ss:$16 sps:$4 sm:$0xff]  }
 0x105   : > { %1122 = vmatprep.subr.bf16.mxu0 %v3831_v18  ;;  %3641 = vmatprep.subr.bf16.mxu1 %v3831_v18  ;;  %v5009_v18 = vld [vmem:[%s4775_s2 + $0xc4] ss:$8 sps:$4 sm:$0xff]   ;;  %v3924_v43 = vld [vmem:[%s4782_s19 + $0x1a8] ss:$16 sps:$4 sm:$0xff]  }
 0x106   : > { %1996 = vperm.xlu0 %3808, %v1946_v51   ;;  %2001 = vperm.xlu1 %3809, %v1947_v52   ;;  %v5053_v44 = vld [vmem:[%s4775_s2 + $0x64] ss:$8 sps:$4 sm:$0xff]   ;;  %v3927_v51 = vld [vmem:[%s4782_s19 + $0x188] ss:$16 sps:$4 sm:$0xff]  }
 0x107   : > { %v3929_v45 = vld [vmem:[%s4782_s19 + $0x18c] ss:$16 sps:$4 sm:$0xff]  }
 0x108   : > { %1123 = vmatpush1.bf16.msra.mxu0 %v3833_v19  ;;  %3657 = vmatpush1.bf16.msra.mxu1 %v3833_v19  ;;  %v1956_v19 = vld [vmem:[%s4803_s3 + $0x70] sm:$0xff]  ;;  %v5057_v46 = vld [vmem:[%s4775_s2 + $0xe4] ss:$8 sps:$4 sm:$0xff]  }
 0x109   : > { %1124 = vmatprep.subr.bf16.mxu0 %v3834_v20  ;;  %3642 = vmatprep.subr.bf16.mxu1 %v3834_v20  ;;  %v1957_v20 = vld [vmem:[%s4803_s3 + $0x78] sm:$0xff] }
 0x10a   : > { %2006 = vperm.xlu0 %3808, %v1948_v59   ;;  %2011 = vperm.xlu1 %3809, %v1949_v60   ;;  %v3938_v52 = vld [vmem:[%s4782_s19 + $0x16c] ss:$16 sps:$4 sm:$0xff]   ;;  %v3936_v59 = vld [vmem:[%s4782_s19 + $0x168] ss:$16 sps:$4 sm:$0xff]  }
 0x10b   : > { %v5077_v60 = vld [vmem:[%s4775_s2 + $0x74] ss:$8 sps:$4 sm:$0xff]  }
 0x10c   : > { %1125 = vmatpush2.bf16.msra.mxu0 %v3836_v21  ;;  %3658 = vmatpush2.bf16.msra.mxu1 %v3836_v21  ;;  %v3903_v21 = vld [vmem:[%s4782_s19 + $0x8] ss:$16 sps:$4 sm:$0xff]  }
 0x10d   : > { %1126 = vmatprep.subr.bf16.mxu0 %v3837_v22  ;;  %3643 = vmatprep.subr.bf16.mxu1 %v3837_v22  ;;  %v3914_v22 = vld [vmem:[%s4782_s19 + $0x1ec] ss:$16 sps:$4 sm:$0xff]  }
 0x10e   : > { %2016 = vperm.xlu0 %3808, %v1950_v63   ;;  %2021 = vperm.xlu1 %3809, %v1951_v0   ;;  %v3941_v63 = vld [vmem:[%s4782_s19 + $0x14c] ss:$16 sps:$4 sm:$0xff]  }
 0x10f   : > { %v5081_v0 = vld [vmem:[%s4775_s2 + $0xf4] ss:$8 sps:$4 sm:$0xff]  }
 0x110   : > { %1127 = vmatpush2.bf16.msra.mxu0 %v3839_v23  ;;  %3659 = vmatpush2.bf16.msra.mxu1 %v3839_v23  ;;  %v5020_v23 = vld [vmem:[%s4775_s2 + $0x40] ss:$8 sps:$4 sm:$0xff]  }
 0x111   : > { %1128 = vmatprep.subr.bf16.mxu0 %v3840_v24  ;;  %3644 = vmatprep.subr.bf16.mxu1 %v3840_v24  ;;  %v5023_v24 = vld [vmem:[%s4775_s2 + $0xc0] ss:$8 sps:$4 sm:$0xff]  }
 0x112   : > { %2026 = vperm.xlu0 %3808, %v1952_v5   ;;  %2031 = vperm.xlu1 %3809, %v1953_v6   ;;  %v3939_v5 = vld [vmem:[%s4782_s19 + $0x148] ss:$16 sps:$4 sm:$0xff]   ;;  %v3950_v6 = vld [vmem:[%s4782_s19 + $0x12c] ss:$16 sps:$4 sm:$0xff]  }
 0x114   : > { %1129 = vmatpush2.bf16.msra.mxu0 %v3842_v25  ;;  %3660 = vmatpush2.bf16.msra.mxu1 %v3842_v25  ;;  %v1958_v25 = vld [vmem:[%s4803_s3 + $0x80] sm:$0xff] }
 0x115   : > { %1130 = vmatprep.subr.bf16.mxu0 %v3843_v26  ;;  %3645 = vmatprep.subr.bf16.mxu1 %v3843_v26  ;;  %v1959_v26 = vld [vmem:[%s4803_s3 + $0x88] sm:$0xff] }
 0x116   : > { %2036 = vperm.xlu0 %3808, %v1954_v11   ;;  %2041 = vperm.xlu1 %3809, %v1955_v12   ;;  %v1970_v11 = vld [vmem:[%s4803_s3 + $0xe0] sm:$0xff]  ;;  %v1971_v12 = vld [vmem:[%s4803_s3 + $0xe8] sm:$0xff] }
 0x118   : > { %1131 = vmatpush2.bf16.msra.mxu0 %v3845_v27  ;;  %3661 = vmatpush2.bf16.msra.mxu1 %v3845_v27  ;;  %v3912_v27 = vld [vmem:[%s4782_s19 + $0x1e8] ss:$16 sps:$4 sm:$0xff]  }
 0x119   : > { %1132 = vmatprep.subr.bf16.mxu0 %v3846_v28  ;;  %3646 = vmatprep.subr.bf16.mxu1 %v3846_v28  ;;  %v5029_v28 = vld [vmem:[%s4775_s2 + $0x54] ss:$8 sps:$4 sm:$0xff]  }
 0x11a   : > { %2046 = vperm.xlu0 %3808, %v1956_v19   ;;  %2051 = vperm.xlu1 %3809, %v1957_v20   ;;  %v1972_v19 = vld [vmem:[%s4803_s3 + $0xf0] sm:$0xff]  ;;  %v1973_v20 = vld [vmem:[%s4803_s3 + $0xf8] sm:$0xff] }
 0x11c   : > { %1133 = vmatpush2.bf16.msra.mxu0 %v3848_v29  ;;  %3662 = vmatpush2.bf16.msra.mxu1 %v3848_v29  ;;  %v3917_v29 = vld [vmem:[%s4782_s19 + $0x1cc] ss:$16 sps:$4 sm:$0xff]  }
 0x11d   : > { %1134 = vmatprep.subr.bf16.mxu0 %v3849_v30  ;;  %3647 = vmatprep.subr.bf16.mxu1 %v3849_v30  ;;  %v5033_v30 = vld [vmem:[%s4775_s2 + $0xd4] ss:$8 sps:$4 sm:$0xff]  }
 0x11e   : > { %2056 = vperm.xlu0 %3808, %v1958_v25   ;;  %2061 = vperm.xlu1 %3809, %v1959_v26   ;;  %v3954_v25 = vld [vmem:[%s4808_s26 + $0x70] ss:$8 sps:$4 sm:$0xff]   ;;  %v3974_v26 = vld [vmem:[%s4808_s26 + $0x14] ss:$8 sps:$4 sm:$0xff]  }
 0x120   : > { %1135 = vmatpush2.bf16.msra.mxu0 %v3851_v31  ;;  %3663 = vmatpush2.bf16.msra.mxu1 %v3851_v31  ;;  %v1960_v31 = vld [vmem:[%s4803_s3 + $0x90] sm:$0xff] }
 0x121   : > { %1136 = vmatprep.subr.bf16.mxu0 %v3852_v32  ;;  %3648 = vmatprep.subr.bf16.mxu1 %v3852_v32  ;;  %v1961_v32 = vld [vmem:[%s4803_s3 + $0x98] sm:$0xff] }
 0x122   : > { %2066 = vperm.xlu0 %3808, %v1960_v31   ;;  %2071 = vperm.xlu1 %3809, %v1961_v32   ;;  %v3993_v31 = vld [vmem:[%s4808_s26 + $0xa0] ss:$8 sps:$4 sm:$0xff]   ;;  %v3998_v32 = vld [vmem:[%s4808_s26 + $0x94] ss:$8 sps:$4 sm:$0xff]  }
 0x124   : > { %1137 = vmatpush2.bf16.msra.mxu0 %v3854_v33  ;;  %3664 = vmatpush2.bf16.msra.mxu1 %v3854_v33  ;;  %v3915_v33 = vld [vmem:[%s4782_s19 + $0x1c8] ss:$16 sps:$4 sm:$0xff]  }
 0x125   : > { %1138 = vmatprep.subr.bf16.mxu0 %v3855_v34  ;;  %3649 = vmatprep.subr.bf16.mxu1 %v3855_v34  ;;  %v3926_v34 = vld [vmem:[%s4782_s19 + $0x1ac] ss:$16 sps:$4 sm:$0xff]  }
 0x128   : > { %1139 = vmatpush2.bf16.msra.mxu0 %v3857_v35  ;;  %3665 = vmatpush2.bf16.msra.mxu1 %v3857_v35  ;;  %v5044_v35 = vld [vmem:[%s4775_s2 + $0x50] ss:$8 sps:$4 sm:$0xff]  }
 0x129   : > { %1301 = vmatprep.subr.bf16.mxu1 %v3866_v36  ;;  %v5047_v36 = vld [vmem:[%s4775_s2 + $0xd0] ss:$8 sps:$4 sm:$0xff]  }
 0x12b   : > { %1141 = vmatmul.mubr.bf16.vlgmr.msra.gmra.mxu0 %v4924_v37  ;;  %1221 = vmatmul.mubr.bf16.vlgmr.msra.gmra.mxu1 %v4927_v38 }
 0x12c   : > { %1302 = vmatpush1.bf16.msra.mxu1 %v3864_v39  ;;  %1150 = vmatprep.mubr.bf16.mxu0 %v4932_v41  ;;  %v1962_v39 = vld [vmem:[%s4803_s3 + $0xa0] sm:$0xff] }
 0x12d   : > { %1303 = vmatprep.subr.bf16.mxu1 %v3869_v40  ;;  %1230 = vmatprep.mubr.bf16.mxu1 %v4935_v42  ;;  %v1963_v40 = vld [vmem:[%s4803_s3 + $0xa8] sm:$0xff] }
 0x12e   : > { %2076 = vperm.xlu0 %3808, %v1962_v39   ;;  %2081 = vperm.xlu1 %3809, %v1963_v40  }
 0x130   : > { %1304 = vmatpush1.bf16.msra.mxu1 %v3867_v47  ;;  %v1964_v47 = vld [vmem:[%s4803_s3 + $0xb0] sm:$0xff] }
 0x131   : > { %1305 = vmatprep.subr.bf16.mxu1 %v3878_v48  ;;  %v1965_v48 = vld [vmem:[%s4803_s3 + $0xb8] sm:$0xff] }
 0x132   : > { %2086 = vperm.xlu0 %3808, %v1964_v47   ;;  %2091 = vperm.xlu1 %3809, %v1965_v48  }
 0x133   : > { %1151 = vmatmul.mubr.bf16.gmra.mxu0 %v4948_v49  ;;  %1231 = vmatmul.mubr.bf16.gmra.mxu1 %v4951_v50 }
 0x134   : > { %1306 = vmatpush1.bf16.msra.mxu1 %v3876_v53  ;;  %1160 = vmatprep.mubr.bf16.mxu0 %v4957_v54  ;;  %v5068_v53 = vld [vmem:[%s4775_s2 + $0x60] ss:$8 sps:$4 sm:$0xff]  }
 0x135   : > { %1307 = vmatprep.subr.bf16.mxu1 %v3881_v55  ;;  %1240 = vmatprep.mubr.bf16.mxu1 %v4961_v56  ;;  %v5071_v55 = vld [vmem:[%s4775_s2 + $0xe0] ss:$8 sps:$4 sm:$0xff]  }
 0x138   : > { %1308 = vmatpush1.bf16.msra.mxu1 %v3879_v57  ;;  %v1966_v57 = vld [vmem:[%s4803_s3 + $0xc0] sm:$0xff] }
 0x139   : > { %1309 = vmatprep.subr.bf16.mxu1 %v3890_v58  ;;  %v1967_v58 = vld [vmem:[%s4803_s3 + $0xc8] sm:$0xff]  ;;  %2096 = vperm.xlu0 %3808, %v1966_v57  }
 0x13a   : > { %2101 = vperm.xlu1 %3809, %v1967_v58  }
 0x13b   : > { %1161 = vmatmul.mubr.bf16.gmra.mxu0 %v4972_v61  ;;  %1241 = vmatmul.mubr.bf16.gmra.mxu1 %v4975_v62 }
 0x13c   : > { %1310 = vmatpush1.bf16.msra.mxu1 %v3888_v1  ;;  %1170 = vmatprep.mubr.bf16.mxu0 %v4981_v2  ;;  %v1968_v1 = vld [vmem:[%s4803_s3 + $0xd0] sm:$0xff] }
 0x13d   : > { %1311 = vmatprep.subr.bf16.mxu1 %v3893_v3  ;;  %1250 = vmatprep.mubr.bf16.mxu1 %v4985_v4  ;;  %v1969_v3 = vld [vmem:[%s4803_s3 + $0xd8] sm:$0xff] }
 0x13e   : > { %2106 = vperm.xlu0 %3808, %v1968_v1   ;;  %2111 = vperm.xlu1 %3809, %v1969_v3  }
 0x140   : > { %1312 = vmatpush1.bf16.msra.mxu1 %v3891_v7  ;;  %v3946_v7 = vld [vmem:[%s4775_s2 + $0x70] ss:$8 sps:$4 sm:$0xff]  }
 0x141   : > { %1313 = vmatprep.subr.bf16.mxu1 %v3902_v8  ;;  %v5093_v8 = vld [vmem:[%s4775_s2 + $0xf0] ss:$8 sps:$4 sm:$0xff]  }
 0x142   : > { %2116 = vperm.xlu0 %3808, %v1970_v11   ;;  %2121 = vperm.xlu1 %3809, %v1971_v12  }
 0x143   : > { %1171 = vmatmul.mubr.bf16.gmra.mxu0 %v4996_v9  ;;  %1251 = vmatmul.mubr.bf16.gmra.mxu1 %v4999_v10 }
 0x144   : > { %1314 = vmatpush1.bf16.msra.mxu1 %v3900_v13  ;;  %1180 = vmatprep.mubr.bf16.mxu0 %v5005_v14  ;;  %v3948_v13 = vld [vmem:[%s4782_s19 + $0x128] ss:$16 sps:$4 sm:$0xff]  }
 0x145   : > { %1315 = vmatprep.subr.bf16.mxu1 %v3905_v16  ;;  %1260 = vmatprep.mubr.bf16.mxu1 %v5009_v18  ;;  %v3953_v16 = vld [vmem:[%s4782_s19 + $0x10c] ss:$16 sps:$4 sm:$0xff]  }
 0x146   : > { %2126 = vperm.xlu0 %3808, %v1972_v19   ;;  %2131 = vperm.xlu1 %3809, %v1973_v20  }
 0x148   : > { %1316 = vmatpush1.bf16.msra.mxu1 %v3903_v21  ;;  %v3951_v21 = vld [vmem:[%s4782_s19 + $0x108] ss:$16 sps:$4 sm:$0xff]  }
 0x149   : > { %1317 = vmatprep.subr.bf16.mxu1 %v3914_v22  ;;  %v3956_v22 = vld [vmem:[%s4808_s26 + $0x74] ss:$8 sps:$4 sm:$0xff]  }
 0x14a   : > { %2550 = vmatprep.subr.bf16.mxu0 %v3956_v22 }
 0x14b   : > { %1181 = vmatmul.mubr.bf16.gmra.mxu0 %v5020_v23  ;;  %1261 = vmatmul.mubr.bf16.gmra.mxu1 %v5023_v24 }
 0x14c   : > { %1318 = vmatpush2.bf16.msra.mxu1 %v3912_v27  ;;  %1190 = vmatprep.mubr.bf16.mxu0 %v5029_v28  ;;  %v3972_v27 = vld [vmem:[%s4808_s26 + $0x10] ss:$8 sps:$4 sm:$0xff]  }
 0x14d   : > { %1319 = vmatprep.subr.bf16.mxu1 %v3917_v29  ;;  %1270 = vmatprep.mubr.bf16.mxu1 %v5033_v30  ;;  %v3986_v29 = vld [vmem:[%s4808_s26 + $0xd4] ss:$8 sps:$4 sm:$0xff]  }
 0x14e   : > { %2551 = vmatpush1.bf16.msra.mxu0 %v3954_v25 }
 0x150   : > { %1320 = vmatpush2.bf16.msra.mxu1 %v3915_v33  ;;  %v3996_v33 = vld [vmem:[%s4808_s26 + $0x90] ss:$8 sps:$4 sm:$0xff]  }
 0x151   : > { %1321 = vmatprep.subr.bf16.mxu1 %v3926_v34  ;;  %v4001_v34 = vld [vmem:[%s4808_s26 + $0x84] ss:$8 sps:$4 sm:$0xff]  }
 0x153   : > { %1191 = vmatmul.mubr.bf16.gmra.mxu0 %v5044_v35  ;;  %1271 = vmatmul.mubr.bf16.gmra.mxu1 %v5047_v36 }
 0x154   : > { %1322 = vmatpush2.bf16.msra.mxu1 %v3924_v43  ;;  %1200 = vmatprep.mubr.bf16.mxu0 %v5053_v44 }
 0x155   : > { %1323 = vmatprep.subr.bf16.mxu1 %v3929_v45  ;;  %1280 = vmatprep.mubr.bf16.mxu1 %v5057_v46 }
 0x158   : > { %1324 = vmatpush2.bf16.msra.mxu1 %v3927_v51 }
 0x159   : > { %1325 = vmatprep.subr.bf16.mxu1 %v3938_v52 }
 0x15b   : > { %1201 = vmatmul.mubr.bf16.gmra.mxu0 %v5068_v53  ;;  %1281 = vmatmul.mubr.bf16.gmra.mxu1 %v5071_v55 }
 0x15c   : > { %1326 = vmatpush2.bf16.msra.mxu1 %v3936_v59  ;;  %1210 = vmatprep.mubr.bf16.mxu0 %v5077_v60 }
 0x15d   : > { %1327 = vmatprep.subr.bf16.mxu1 %v3941_v63  ;;  %1290 = vmatprep.mubr.bf16.mxu1 %v5081_v0 }
 0x160   : > { %1328 = vmatpush2.bf16.msra.mxu1 %v3939_v5 }
 0x161   : > { %1329 = vmatprep.subr.bf16.mxu1 %v3950_v6 }
 0x163   : > { %1211 = vmatmul.mubr.bf16.gmra.mxu0 %v3946_v7  ;;  %1291 = vmatmul.mubr.bf16.gmra.mxu1 %v5093_v8 }
 0x164   : > { %1330 = vmatpush2.bf16.msra.mxu1 %v3948_v13  ;;  %1333 = vmatprep.mubr.bf16.mxu1 %v4896_v15  ;;  %v3959_v15 = vld [vmem:[%s4808_s26 + $0x64] ss:$8 sps:$4 sm:$0xff]  }
 0x165   : > { %1331 = vmatprep.subr.bf16.mxu1 %v3953_v16  ;;  %2552 = vmatprep.subr.bf16.mxu0 %v3959_v15 }
 0x168   : > { %1332 = vmatpush2.bf16.msra.mxu1 %v3951_v21 }
 0x16b   : > { %1334 = vmatmul.mubr.bf16.vlgmr.msra.gmra.mxu1 %v4924_v37  ;;  %v3957_v37 = vld [vmem:[%s4808_s26 + $0x60] ss:$8 sps:$4 sm:$0xff]  }
 0x16c   : > { %1343 = vmatprep.mubr.bf16.mxu1 %v4932_v41  ;;  %2553 = vmatpush1.bf16.msra.mxu0 %v3957_v37  ;;  %v3962_v41 = vld [vmem:[%s4808_s26 + $0x54] ss:$8 sps:$4 sm:$0xff]  }
 0x16d   : > { %2554 = vmatprep.subr.bf16.mxu0 %v3962_v41 }
 0x173   : > { %1344 = vmatmul.mubr.bf16.gmra.mxu1 %v4948_v49  ;;  %v3960_v49 = vld [vmem:[%s4808_s26 + $0x50] ss:$8 sps:$4 sm:$0xff]  }
 0x174   : > { %1353 = vmatprep.mubr.bf16.mxu1 %v4957_v54  ;;  %2555 = vmatpush1.bf16.msra.mxu0 %v3960_v49  ;;  %v3965_v54 = vld [vmem:[%s4808_s26 + $0x44] ss:$8 sps:$4 sm:$0xff]  }
 0x175   : > { %2556 = vmatprep.subr.bf16.mxu0 %v3965_v54 }
 0x17b   : > { %1354 = vmatmul.mubr.bf16.gmra.mxu1 %v4972_v61  ;;  %v3963_v61 = vld [vmem:[%s4808_s26 + $0x40] ss:$8 sps:$4 sm:$0xff]  }
 0x17c   : > { %1363 = vmatprep.mubr.bf16.mxu1 %v4981_v2  ;;  %2557 = vmatpush1.bf16.msra.mxu0 %v3963_v61  ;;  %v3968_v2 = vld [vmem:[%s4808_s26 + $0x34] ss:$8 sps:$4 sm:$0xff]  }
 0x17d   : > { %2558 = vmatprep.subr.bf16.mxu0 %v3968_v2 }
 0x183   : > { %1364 = vmatmul.mubr.bf16.gmra.mxu1 %v4996_v9  ;;  %v3966_v9 = vld [vmem:[%s4808_s26 + $0x30] ss:$8 sps:$4 sm:$0xff]  }
 0x184   : > { %1373 = vmatprep.mubr.bf16.mxu1 %v5005_v14  ;;  %2559 = vmatpush1.bf16.msra.mxu0 %v3966_v9  ;;  %v3971_v14 = vld [vmem:[%s4808_s26 + $0x24] ss:$8 sps:$4 sm:$0xff]  }
 0x185   : > { %2560 = vmatprep.subr.bf16.mxu0 %v3971_v14 }
 0x18b   : > { %1374 = vmatmul.mubr.bf16.gmra.mxu1 %v5020_v23  ;;  %v3969_v23 = vld [vmem:[%s4808_s26 + $0x20] ss:$8 sps:$4 sm:$0xff]  }
 0x18c   : > { %1383 = vmatprep.mubr.bf16.mxu1 %v5029_v28  ;;  %2561 = vmatpush1.bf16.msra.mxu0 %v3969_v23  ;;  %v3977_v28 = vld [vmem:[%s4808_s26 + $0x4] ss:$8 sps:$4 sm:$0xff]  }
 0x18d   : > { %2562 = vmatprep.subr.bf16.mxu0 %v3974_v26 }
 0x190   : > { %2563 = vmatpush1.bf16.msra.mxu0 %v3972_v27 }
 0x191   : > { %2564 = vmatprep.subr.bf16.mxu0 %v3977_v28 }
 0x193   : > { %1384 = vmatmul.mubr.bf16.gmra.mxu1 %v5044_v35  ;;  %v3999_v35 = vld [vmem:[%s4808_s26 + $0x80] ss:$8 sps:$4 sm:$0xff]  }
 0x194   : > { %1393 = vmatprep.mubr.bf16.mxu1 %v5053_v44 }
 0x19b   : > { %1394 = vmatmul.mubr.bf16.gmra.mxu1 %v5068_v53 }
 0x19c   : > { %1403 = vmatprep.mubr.bf16.mxu1 %v5077_v60 }
 0x1a3   : > { %1404 = vmatmul.mubr.bf16.gmra.mxu1 %v3946_v7 }
 0x1a4   : > { %1413 = vmatprep.mubr.bf16.mxu1 %v4900_v17  ;;  %v3975_v17 = vld [vmem:[%s4808_s26] ss:$8 sps:$4 sm:$0xff]  }
 0x1a5   : > { %2565 = vmatpush1.bf16.msra.mxu0 %v3975_v17 }
 0x1ab   : > { %1414 = vmatmul.mubr.bf16.gmra.mxu1 %v4927_v38  ;;  %v3980_v38 = vld [vmem:[%s4808_s26 + $0xf4] ss:$8 sps:$4 sm:$0xff]  }
 0x1ac   : > { %1423 = vmatprep.mubr.bf16.mxu1 %v4935_v42  ;;  %v3978_v42 = vld [vmem:[%s4808_s26 + $0xf0] ss:$8 sps:$4 sm:$0xff]   ;;  %2566 = vmatprep.subr.bf16.mxu0 %v3980_v38 }
 0x1ad   : > { %2567 = vmatpush2.bf16.msra.mxu0 %v3978_v42 }
 0x1b3   : > { %1424 = vmatmul.mubr.bf16.gmra.mxu1 %v4951_v50  ;;  %v3983_v50 = vld [vmem:[%s4808_s26 + $0xe4] ss:$8 sps:$4 sm:$0xff]  }
 0x1b4   : > { %1433 = vmatprep.mubr.bf16.mxu1 %v4961_v56  ;;  %v3981_v56 = vld [vmem:[%s4808_s26 + $0xe0] ss:$8 sps:$4 sm:$0xff]   ;;  %2568 = vmatprep.subr.bf16.mxu0 %v3983_v50 }
 0x1b5   : > { %2569 = vmatpush2.bf16.msra.mxu0 %v3981_v56 }
 0x1b6   : > { %2570 = vmatprep.subr.bf16.mxu0 %v3986_v29 }
 0x1bb   : > { %1434 = vmatmul.mubr.bf16.gmra.mxu1 %v4975_v62  ;;  %v3984_v62 = vld [vmem:[%s4808_s26 + $0xd0] ss:$8 sps:$4 sm:$0xff]  }
 0x1bc   : > { %1443 = vmatprep.mubr.bf16.mxu1 %v4985_v4  ;;  %2571 = vmatpush2.bf16.msra.mxu0 %v3984_v62  ;;  %v3989_v4 = vld [vmem:[%s4808_s26 + $0xc4] ss:$8 sps:$4 sm:$0xff]  }
 0x1bd   : > { %2572 = vmatprep.subr.bf16.mxu0 %v3989_v4 }
 0x1c3   : > { %1444 = vmatmul.mubr.bf16.gmra.mxu1 %v4999_v10  ;;  %v3987_v10 = vld [vmem:[%s4808_s26 + $0xc0] ss:$8 sps:$4 sm:$0xff]  }
 0x1c4   : > { %1453 = vmatprep.mubr.bf16.mxu1 %v5009_v18  ;;  %2573 = vmatpush2.bf16.msra.mxu0 %v3987_v10  ;;  %v3992_v18 = vld [vmem:[%s4808_s26 + $0xb4] ss:$8 sps:$4 sm:$0xff]  }
 0x1c5   : > { %2574 = vmatprep.subr.bf16.mxu0 %v3992_v18 }
 0x1cb   : > { %1454 = vmatmul.mubr.bf16.gmra.mxu1 %v5023_v24  ;;  %v3990_v24 = vld [vmem:[%s4808_s26 + $0xb0] ss:$8 sps:$4 sm:$0xff]  }
 0x1cc   : > { %1463 = vmatprep.mubr.bf16.mxu1 %v5033_v30  ;;  %2575 = vmatpush2.bf16.msra.mxu0 %v3990_v24  ;;  %v3995_v30 = vld [vmem:[%s4808_s26 + $0xa4] ss:$8 sps:$4 sm:$0xff]  }
 0x1cd   : > { %2576 = vmatprep.subr.bf16.mxu0 %v3995_v30 }
 0x1d0   : > { %2577 = vmatpush2.bf16.msra.mxu0 %v3993_v31 }
 0x1d1   : > { %2578 = vmatprep.subr.bf16.mxu0 %v3998_v32 }
 0x1d3   : > { %1464 = vmatmul.mubr.bf16.gmra.mxu1 %v5047_v36 }
 0x1d4   : > { %1473 = vmatprep.mubr.bf16.mxu1 %v5057_v46  ;;  %2579 = vmatpush2.bf16.msra.mxu0 %v3996_v33 }
 0x1d5   : > { %2580 = vmatprep.subr.bf16.mxu0 %v4001_v34 }
 0x1d8   : > { %2581 = vmatpush2.bf16.msra.mxu0 %v3999_v35 }
 0x1db   : > { %1474 = vmatmul.mubr.bf16.gmra.mxu1 %v5071_v55 }
 0x1dc   : > { %1483 = vmatprep.mubr.bf16.mxu1 %v5081_v0 }
 0x1e3   : > { %1484 = vmatmul.mubr.bf16.gmra.mxu1 %v5093_v8 }
 0x1eb   : > { %v5166_v36 = vpop.f32.mrf.mxu0  ;;  %v5168_v39 = vpop.f32.mrf.mxu1 }
 0x1ec   : > { %5806 = vst [vmem:[#allocation33_spill] sm:$0xff] %v5168_v39  ;;  %v3464_v0 = vmul.f32 -1.442695, %v5166_v36 }
 0x1ed   : > { %v5170_v40 = vpop.f32.mrf.mxu0  ;;  %v5172_v43 = vpop.f32.mrf.mxu1 }
 0x1ee   : > { %5807 = vst [vmem:[#allocation34_spill] sm:$0xff] %v5172_v43  ;;  %v3465_v1 = vmul.f32 -1.442695, %v5170_v40  ;;  %4002 = vpow2.f32 %v3464_v0 }
 0x1ef   : > { %v5174_v44 = vpop.f32.mrf.mxu0  ;;  %v5176_v45 = vpop.f32.mrf.mxu1 }
 0x1f0   : > { %5808 = vst [vmem:[#allocation35_spill] sm:$0xff] %v5176_v45  ;;  %4004 = vpow2.f32 %v3465_v1  ;;  %v3466_v11 = vmul.f32 -1.442695, %v5174_v44 }
 0x1f1   : > { %v5178_v46 = vpop.f32.mrf.mxu0  ;;  %v5180_v47 = vpop.f32.mrf.mxu1 }
 0x1f2   : > { %5809 = vst [vmem:[#allocation36_spill] sm:$0xff] %v5180_v47  ;;  %v3467_v13 = vmul.f32 -1.442695, %v5178_v46  ;;  %4006 = vpow2.f32 %v3466_v11 }
 0x1f3   : > { %v5182_v48 = vpop.f32.mrf.mxu0  ;;  %v5184_v51 = vpop.f32.mrf.mxu1 }
 0x1f4   : > { %5810 = vst [vmem:[#allocation37_spill] sm:$0xff] %v5184_v51  ;;  %4008 = vpow2.f32 %v3467_v13  ;;  %v3468_v61 = vmul.f32 -1.442695, %v5182_v48  ;;  %v3496_v13 = vmul.f32 -1.442695, %v5168_v39 }
 0x1f5   : > { %v5186_v52 = vpop.f32.mrf.mxu0  ;;  %v5188_v53 = vpop.f32.mrf.mxu1 }
 0x1f6   : > { %5811 = vst [vmem:[#allocation38_spill] sm:$0xff] %v5188_v53  ;;  %v3469_v25 = vmul.f32 -1.442695, %v5186_v52 }
 0x1f7   : > { %v5190_v55 = vpop.f32.mrf.mxu0  ;;  %v5192_v57 = vpop.f32.mrf.mxu1 }
 0x1f8   : > { %v3470_v15 = vmul.f32 -1.442695, %v5190_v55  ;;  %4010 = vpow2.f32 %v3469_v25 }
 0x1f9   : > { %v5194_v58 = vpop.f32.mrf.mxu0  ;;  %v5196_v59 = vpop.f32.mrf.mxu1 }
 0x1fa   : > { %v3471_v41 = vmul.f32 -1.442695, %v5194_v58  ;;  %4012 = vpow2.f32 %v3470_v15 }
 0x1fb   : > { %v5198_v60 = vpop.f32.mrf.mxu0  ;;  %v5200_v63 = vpop.f32.mrf.mxu1 }
 0x1fc   : > { %v4003_v54 = vpop.eup %4002  ;;  %4014 = vpow2.f32 %v3471_v41  ;;  %v3472_v4 = vmul.f32 -1.442695, %v5198_v60 }
 0x1fd   : > { %v5204_v3 = vpop.f32.mrf.mxu0  ;;  %v5206_v5 = vpop.f32.mrf.mxu1  ;;  %v1686_v23 = vadd.f32 1.0, %v4003_v54  ;;  %4016 = vpow2.f32 %v3468_v61 }
 0x1fe   : > { %v4005_v9 = vpop.eup %4004  ;;  %v3473_v17 = vmul.f32 -1.442695, %v5204_v3 }
 0x1ff   : > { %v5208_v6 = vpop.f32.mrf.mxu1  ;;  %v5210_v7 = vpop.f32.mrf.mxu0  ;;  %v1687_v27 = vadd.f32 1.0, %v4005_v9  ;;  %4018 = vrcp.f32 %v1686_v23 }
 0x200   : > { %v4007_v38 = vpop.eup %4006  ;;  %v3474_v42 = vmul.f32 -1.442695, %v5210_v7 }
 0x201   : > { %v5212_v8 = vpop.f32.mrf.mxu1  ;;  %v5218_v16 = vpop.f32.mrf.mxu0  ;;  %4020 = vrcp.f32 %v1687_v27  ;;  %v1688_v18 = vadd.f32 1.0, %v4007_v38 }
 0x202   : > { %v3475_v56 = vmul.f32 -1.442695, %v5218_v16  ;;  %v4009_v62 = vpop.eup %4008  ;;  %4022 = vpow2.f32 %v3473_v17 }
 0x203   : > { %v5215_v12 = vpop.f32.mrf.mxu1  ;;  %v5224_v21 = vpop.f32.mrf.mxu0  ;;  %4024 = vpow2.f32 %v3474_v42  ;;  %v1689_v31 = vadd.f32 1.0, %v4009_v62 }
 0x204   : > { %4026 = vpow2.f32 %v3475_v56  ;;  %v3476_v41 = vmul.f32 -1.442695, %v5224_v21 }
 0x205   : > { %v5220_v19 = vpop.f32.mrf.mxu1  ;;  %v5233_v49 = vpop.f32.mrf.mxu0  ;;  %4028 = vpow2.f32 %v3472_v4 }
 0x206   : > { %5812 = vst [vmem:[#allocation39_spill] sm:$0xff] %v5220_v19  ;;  %v3477_v24 = vmul.f32 -1.442695, %v5233_v49  ;;  %4030 = vrcp.f32 %v1688_v18  ;;  %v4011_v35 = vpop.eup %4010  ;;  %v3497_v18 = vmul.f32 -1.442695, %v5172_v43 }
 0x207   : > { %v5222_v20 = vpop.f32.mrf.mxu1  ;;  %v5240_v26 = vpop.f32.mrf.mxu0  ;;  %v1691_v9 = vadd.f32 1.0, %v4011_v35 }
 0x208   : > { %v3478_v33 = vmul.f32 -1.442695, %v5240_v26  ;;  %4032 = vpow2.f32 %v3477_v24  ;;  %v4013_v11 = vpop.eup %4012 }
 0x209   : > { %v5226_v22 = vpop.f32.mrf.mxu1  ;;  %v5249_v29 = vpop.f32.mrf.mxu0  ;;  %4034 = vrcp.f32 %v1689_v31  ;;  %v1692_v23 = vadd.f32 1.0, %v4013_v11  ;;  %v3498_v31 = vmul.f32 -1.442695, %v5176_v45 }
 0x20a   : > { %5813 = vst [vmem:[#allocation40_spill] sm:$0xff] %v5226_v22  ;;  %v3479_v0 = vmul.f32 -1.442695, %v5249_v29  ;;  %v4015_v15 = vpop.eup %4014  ;;  %4036 = vpow2.f32 %v3478_v33 }
 0x20b   : > { %v5230_v37 = vpop.f32.mrf.mxu1  ;;  %v5257_v32 = vpop.f32.mrf.mxu0  ;;  %v1693_v17 = vadd.f32 1.0, %v4015_v15  ;;  %v3500_v15 = vmul.f32 -1.442695, %v5184_v51 }
 0x20c   : > { %5814 = vst [vmem:[#allocation41_spill] sm:$0xff] %v5230_v37  ;;  %v4017_v61 = vpop.eup %4016  ;;  %4038 = vpow2.f32 %v3479_v0  ;;  %v3499_v0 = vmul.f32 -1.442695, %v5180_v47  ;;  %v1987_v51 = vpop.permute.xlu1 %1986 }
 0x20d   : > { %v5236_v2 = vpop.f32.mrf.mxu1  ;;  %v5266_v25 = vpop.f32.mrf.mxu0  ;;  %4040 = vpow2.f32 %v3496_v13  ;;  %v1690_v56 = vadd.f32 1.0, %v4017_v61 }
 0x20e   : > { %5815 = vst [vmem:[#allocation42_spill] sm:$0xff] %v5236_v2  ;;  %v4019_v42 = vpop.eup %4018  ;;  %4042 = vpow2.f32 %v3476_v41 }
 0x20f   : > { %v5238_v14 = vpop.f32.mrf.mxu1  ;;  %v5273_v38 = vpop.f32.mrf.mxu0  ;;  %4044 = vrcp.f32 %v1691_v9 }
 0x210   : > { %5816 = vst [vmem:[#allocation43_spill] sm:$0xff] %v5238_v14  ;;  %v4021_v4 = vpop.eup %4020  ;;  %4046 = vrcp.f32 %v1692_v23 }
 0x211   : > { %v5242_v28 = vpop.f32.mrf.mxu1  ;;  %v4023_v24 = vpop.eup %4022  ;;  %4048 = vrcp.f32 %v1693_v17 }
 0x212   : > { %5817 = vst [vmem:[#allocation44_spill] sm:$0xff] %v5242_v28  ;;  %v4025_v35 = vpop.eup %4024  ;;  %v5282_v11 = vpop.f32.mrf.mxu0  ;;  %4050 = vrcp.f32 %v1690_v56  ;;  %v1695_v9 = vadd.f32 1.0, %v4023_v24 }
 0x213   : > { %v5246_v50 = vpop.f32.mrf.mxu1  ;;  %v4027_v13 = vpop.eup %4026  ;;  %4052 = vpow2.f32 %v3497_v18  ;;  %v1696_v23 = vadd.f32 1.0, %v4025_v35  ;;  %v3480_v18 = vmul.f32 -1.442695, %v5257_v32 }
 0x214   : > { %5818 = vst [vmem:[#allocation45_spill] sm:$0xff] %v5246_v50  ;;  %v4029_v61 = vpop.eup %4028  ;;  %4054 = vpow2.f32 %v3498_v31  ;;  %v1977_v50 = vpop.permute.xlu0 %1976  ;;  %v1697_v17 = vadd.f32 1.0, %v4027_v13 }
 0x215   : > { %v5252_v10 = vpop.f32.mrf.mxu1  ;;  %4056 = vpow2.f32 %v3499_v0  ;;  %v1694_v56 = vadd.f32 1.0, %v4029_v61  ;;  %v1879_v0 = vmul.f32 %v4021_v4, %v5170_v40 }
 0x216   : > { %5819 = vst [vmem:[#allocation46_spill] sm:$0xff] %v5252_v10  ;;  %4058 = vpow2.f32 %v3500_v15  ;;  %v3481_v15 = vmul.f32 -1.442695, %v5266_v25 }
 0x217   : > { %v5255_v30 = vpop.f32.mrf.mxu1  ;;  %4060 = vrcp.f32 %v1695_v9  ;;  %v1878_v9 = vmul.f32 %v4019_v42, %v5166_v36  ;;  %v3483_v36 = vmul.f32 -1.442695, %v5282_v11 }
 0x218   : > { %5820 = vst [vmem:[#allocation47_spill] sm:$0xff] %v5255_v30 }
 0x219   : > { %v5260_v34 = vpop.f32.mrf.mxu1 }
 0x21a   : > { %5821 = vst [vmem:[#allocation48_spill] sm:$0xff] %v5260_v34 }
 0x21b   : > { %v5263_v1 = vpop.f32.mrf.mxu1 }
 0x21c   : > { %5822 = vst [vmem:[#allocation49_spill] sm:$0xff] %v5263_v1  ;;  %v4031_v1 = vpop.eup %4030  ;;  %4062 = vrcp.f32 %v1696_v23  ;;  %v3482_v23 = vmul.f32 -1.442695, %v5273_v38 }
 0x21d   : > { %v5269_v54 = vpop.f32.mrf.mxu1  ;;  %v1880_v24 = vmul.f32 %v4031_v1, %v5174_v44 }
 0x21e   : > { %5823 = vst [vmem:[#allocation50_spill] sm:$0xff] %v5269_v54  ;;  %v5289_v54 = vpop.f32.mrf.mxu0 }
 0x21f   : > { %v5271_v27 = vpop.f32.mrf.mxu1 }
 0x220   : > { %5824 = vst [vmem:[#allocation51_spill] sm:$0xff] %v5271_v27  ;;  %v5298_v61 = vpop.f32.mrf.mxu0 }
 0x221   : > { %v5275_v62 = vpop.f32.mrf.mxu1 }
 0x222   : > { %5825 = vst [vmem:[#allocation52_spill] sm:$0xff] %v5275_v62  ;;  %v5306_v42 = vpop.f32.mrf.mxu0 }
 0x223   : > { %v5279_v33 = vpop.f32.mrf.mxu1 }
 0x224   : > { %5826 = vst [vmem:[#allocation53_spill] sm:$0xff] %v5279_v33  ;;  %v4033_v33 = vpop.eup %4032  ;;  %4064 = vrcp.f32 %v1697_v17 }
 0x225   : > { %v5285_v41 = vpop.f32.mrf.mxu1  ;;  %v4035_v30 = vpop.eup %4034  ;;  %v1699_v31 = vadd.f32 1.0, %v4033_v33  ;;  %4066 = vrcp.f32 %v1694_v56 }
 0x226   : > { %5827 = vst [vmem:[#allocation54_spill] sm:$0xff] %v5285_v41  ;;  %v4037_v41 = vpop.eup %4036  ;;  %v1881_v13 = vmul.f32 %v4035_v30, %v5178_v46  ;;  %v1982_v33 = vpop.permute.xlu0 %1981  ;;  %4068 = vpow2.f32 %v3480_v18  ;;  %v3501_v46 = vmul.f32 -1.442695, %v5188_v53  ;;  %v2134_v18 = vmul.f32 %v1977_v50, %v1878_v9 }
 0x227   : > { %v5287_v27 = vpop.f32.mrf.mxu1  ;;  %v1700_v34 = vadd.f32 1.0, %v4037_v41  ;;  %v2136_v4 = vmul.f32 %v1982_v33, %v1880_v24  ;;  %v2135_v41 = vmul.f32 %v1977_v50, %v1879_v0  ;;  %v3485_v9 = vmul.f32 -1.442695, %v5298_v61 }
 0x228   : > { %5828 = vst [vmem:[#allocation55_spill] sm:$0xff] %v5287_v27  ;;  %v4039_v27 = vpop.eup %4038  ;;  %4070 = vrcp.f32 %v1699_v31  ;;  %v2137_v56 = vmul.f32 %v1982_v33, %v1881_v13 }
 0x229   : > { %v5291_v62 = vpop.f32.mrf.mxu1  ;;  %v1701_v30 = vadd.f32 1.0, %v4039_v27  ;;  %v3484_v27 = vmul.f32 -1.442695, %v5289_v54 }
 0x22a   : > { %5829 = vst [vmem:[#allocation56_spill] sm:$0xff] %v5291_v62  ;;  %v5300_v62 = vpop.eup %4040  ;;  %4072 = vpow2.f32 %v3481_v15 }
 0x22b   : > { %v1335_v35 = vpop.f32.mrf.mxu1  ;;  %v4043_v1 = vpop.eup %4042  ;;  %4074 = vrcp.f32 %v1700_v34 }
 0x22c   : > { %v4045_v40 = vpop.eup %4044  ;;  %v1698_v37 = vadd.f32 1.0, %v4043_v1  ;;  %4076 = vpow2.f32 %v3482_v23  ;;  %v2198_v0 = vmul.f32 %v2134_v18, %v1335_v35  ;;  %v5315_v1 = vpop.f32.mrf.mxu0  ;;  %v3486_v35 = vmul.f32 -1.442695, %v5306_v42 }
 0x22d   : > { %v1337_v44 = vpop.f32.mrf.mxu1  ;;  %v4047_v10 = vpop.eup %4046  ;;  %v1883_v15 = vmul.f32 %v4045_v40, %v5186_v52  ;;  %4078 = vrcp.f32 %v1701_v30  ;;  %v3487_v30 = vmul.f32 -1.442695, %v5315_v1 }
 0x22e   : > { %v4049_v14 = vpop.eup %4048  ;;  %v2199_v31 = vmul.f32 %v2135_v41, %v1337_v44  ;;  %v1884_v39 = vmul.f32 %v4047_v10, %v5190_v55  ;;  %4080 = vpow2.f32 %v3483_v36  ;;  %v1992_v10 = vpop.permute.xlu1 %1991 }
 0x22f   : > { %v1339_v17 = vpop.f32.mrf.mxu1  ;;  %v4051_v45 = vpop.eup %4050  ;;  %v1885_v34 = vmul.f32 %v4049_v14, %v5194_v58  ;;  %4082 = vrcp.f32 %v1698_v37 }
 0x230   : > { %v2200_v47 = vmul.f32 %v2136_v4, %v1339_v17  ;;  %v5309_v43 = vpop.eup %4052  ;;  %v1882_v23 = vmul.f32 %v4051_v45, %v5182_v48  ;;  %4084 = vpow2.f32 %v3484_v27  ;;  %v2140_v4 = vmul.f32 %v1992_v10, %v1884_v39  ;;  %v5324_v45 = vpop.f32.mrf.mxu0 }
 0x231   : > { %v1341_v24 = vpop.f32.mrf.mxu1  ;;  %v4055_v50 = vpop.eup %4054  ;;  %4086 = vpow2.f32 %v3501_v46  ;;  %v2141_v48 = vmul.f32 %v1992_v10, %v1885_v34  ;;  %v3502_v17 = vmul.f32 -1.442695, %v5192_v57  ;;  %v3503_v46 = vmul.f32 -1.442695, %v5196_v59 }
 0x232   : > { %v2201_v53 = vmul.f32 %v2137_v56, %v1341_v24  ;;  %v5317_v44 = vpop.eup %4056  ;;  %v2262_v52 = vpack.c.bf16 %v2200_v47, %v2198_v0  ;;  %4088 = vpow2.f32 %v3485_v9  ;;  %v2139_v47 = vmul.f32 %v1987_v51, %v1883_v15 }
 0x233   : > { %v1345_v13 = vpop.f32.mrf.mxu1  ;;  %v5320_v55 = vpop.eup %4058  ;;  %v2138_v36 = vmul.f32 %v1987_v51, %v1882_v23  ;;  %4090 = vpow2.f32 %v3486_v35 }
 0x234   : > { %v2263_v33 = vpack.c.bf16 %v2201_v53, %v2199_v31  ;;  %v4061_v58 = vpop.eup %4060  ;;  %v1718_v31 = vadd.f32 1.0, %v5300_v62  ;;  %4092 = vpow2.f32 %v3487_v30  ;;  %v5332_v23 = vpop.f32.mrf.mxu0 }
 0x235   : > { %v1347_v40 = vpop.f32.mrf.mxu1  ;;  %v4063_v53 = vpop.eup %4062  ;;  %v2202_v9 = vmul.f32 %v2138_v36, %v1345_v13  ;;  %4094 = vpow2.f32 %v3502_v17 }
 0x236   : > { %2582 = vmatprep.mubr.bf16.mxu0 %v2263_v33  ;;  %v4065_v37 = vpop.eup %4064  ;;  %v2203_v39 = vmul.f32 %v2139_v47, %v1347_v40  ;;  %v1888_v0 = vmul.f32 %v4063_v53, %v5210_v7  ;;  %v1887_v33 = vmul.f32 %v4061_v58, %v5204_v3  ;;  %v2002_v7 = vpop.permute.xlu1 %2001  ;;  %4096 = vpow2.f32 %v3503_v46 }
 0x237   : > { %v1349_v14 = vpop.f32.mrf.mxu1  ;;  %2583 = vmatmul.mubr.bf16.vlgmr.msra.gmra.mxu0 %v2262_v52  ;;  %v4067_v18 = vpop.eup %4066  ;;  %v1889_v51 = vmul.f32 %v4065_v37, %v5218_v16  ;;  %4098 = vrcp.f32 %v1718_v31  ;;  %v1719_v3 = vadd.f32 1.0, %v5309_v43  ;;  %v1720_v16 = vadd.f32 1.0, %v4055_v50 }
 0x238   : > { %v2204_v41 = vmul.f32 %v2140_v4, %v1349_v14  ;;  %v4069_v27 = vpop.eup %4068  ;;  %v1886_v40 = vmul.f32 %v4067_v18, %v5198_v60  ;;  %v1997_v58 = vpop.permute.xlu0 %1996  ;;  %v2144_v47 = vmul.f32 %v2002_v7, %v1888_v0  ;;  %v1722_v0 = vadd.f32 1.0, %v5320_v55 }
 0x239   : > { %v1351_v56 = vpop.f32.mrf.mxu1  ;;  %v4071_v34 = vpop.eup %4070  ;;  %v1702_v35 = vadd.f32 1.0, %v4069_v27  ;;  %v2143_v17 = vmul.f32 %v1997_v58, %v1887_v33  ;;  %v2145_v36 = vmul.f32 %v2002_v7, %v1889_v51 }
 0x23a   : > { %v2205_v24 = vmul.f32 %v2141_v48, %v1351_v56  ;;  %v4073_v10 = vpop.eup %4072  ;;  %v2264_v14 = vpack.c.bf16 %v2204_v41, %v2202_v9  ;;  %v5336_v37 = vpop.f32.mrf.mxu0  ;;  %v1721_v56 = vadd.f32 1.0, %v5317_v44  ;;  %v2142_v18 = vmul.f32 %v1997_v58, %v1886_v40 }
 0x23b   : > { %v1355_v15 = vpop.f32.mrf.mxu1  ;;  %v4075_v4 = vpop.eup %4074  ;;  %v1703_v13 = vadd.f32 1.0, %v4073_v10  ;;  %v1891_v44 = vmul.f32 %v4071_v34, %v5233_v49 }
 0x23c   : > { %v2265_v52 = vpack.c.bf16 %v2205_v24, %v2203_v39  ;;  %v4077_v53 = vpop.eup %4076  ;;  %v1892_v9 = vmul.f32 %v4075_v4, %v5240_v26  ;;  %v2206_v33 = vmul.f32 %v2142_v18, %v1355_v15  ;;  %v5343_v40 = vpop.f32.mrf.mxu0 }
 0x23d   : > { %v1357_v62 = vpop.f32.mrf.mxu1  ;;  %v4079_v48 = vpop.eup %4078  ;;  %4100 = vrcp.f32 %v1703_v13  ;;  %v1704_v60 = vadd.f32 1.0, %v4077_v53 }
 0x23e   : > { %2592 = vmatprep.mubr.bf16.mxu0 %v2265_v52  ;;  %v4081_v41 = vpop.eup %4080  ;;  %4102 = vrcp.f32 %v1702_v35  ;;  %v2207_v24 = vmul.f32 %v2143_v17, %v1357_v62  ;;  %v1893_v10 = vmul.f32 %v4079_v48, %v5249_v29  ;;  %v2012_v26 = vpop.permute.xlu1 %2011  ;;  %v3504_v29 = vmul.f32 -1.442695, %v5200_v63 }
 0x23f   : > { %v1359_v30 = vpop.f32.mrf.mxu1  ;;  %2593 = vmatmul.mubr.bf16.gmra.mxu0 %v2264_v14  ;;  %v4083_v43 = vpop.eup %4082  ;;  %4104 = vrcp.f32 %v1704_v60  ;;  %v1705_v50 = vadd.f32 1.0, %v4081_v41  ;;  %v3488_v48 = vmul.f32 -1.442695, %v5324_v45 }
 0x240   : > { %v2208_v46 = vmul.f32 %v2144_v47, %v1359_v30  ;;  %v4085_v31 = vpop.eup %4084  ;;  %4106 = vrcp.f32 %v1719_v3  ;;  %v1890_v62 = vmul.f32 %v4083_v43, %v5224_v21  ;;  %v2007_v34 = vpop.permute.xlu0 %2006  ;;  %v2148_v3 = vmul.f32 %v2012_v26, %v1892_v9 }
 0x241   : > { %v1361_v39 = vpop.f32.mrf.mxu1  ;;  %v4087_v52 = vpop.eup %4086  ;;  %4108 = vrcp.f32 %v1705_v50  ;;  %v1706_v7 = vadd.f32 1.0, %v4085_v31  ;;  %v2147_v21 = vmul.f32 %v2007_v34, %v1891_v44  ;;  %v2149_v30 = vmul.f32 %v2012_v26, %v1893_v10 }
 0x242   : > { %v2209_v27 = vmul.f32 %v2145_v36, %v1361_v39  ;;  %v4089_v14 = vpop.eup %4088  ;;  %4110 = vrcp.f32 %v1720_v16  ;;  %v2266_v13 = vpack.c.bf16 %v2208_v46, %v2206_v33  ;;  %v1723_v49 = vadd.f32 1.0, %v4087_v52  ;;  %v5347_v58 = vpop.f32.mrf.mxu0 }
 0x243   : > { %v1365_v51 = vpop.f32.mrf.mxu1  ;;  %4112 = vrcp.f32 %v1721_v56  ;;  %v1707_v15 = vadd.f32 1.0, %v4089_v14  ;;  %v4091_v4 = vpop.eup %4090  ;;  %v2146_v60 = vmul.f32 %v2007_v34, %v1890_v62  ;;  %v3505_v43 = vmul.f32 -1.442695, %v5206_v5 }
 0x244   : > { %v2267_v35 = vpack.c.bf16 %v2209_v27, %v2207_v24  ;;  %4114 = vrcp.f32 %v1722_v0  ;;  %v1708_v16 = vadd.f32 1.0, %v4091_v4  ;;  %v4093_v47 = vpop.eup %4092  ;;  %v3489_v31 = vmul.f32 -1.442695, %v5332_v23  ;;  %v5356_v0 = vpop.f32.mrf.mxu0 }
 0x245   : > { %v1367_v55 = vpop.f32.mrf.mxu1  ;;  %4116 = vrcp.f32 %v1707_v15  ;;  %v4095_v41 = vpop.eup %4094  ;;  %v1709_v56 = vadd.f32 1.0, %v4093_v47  ;;  %v2210_v50 = vmul.f32 %v2146_v60, %v1365_v51  ;;  %v3506_v52 = vmul.f32 -1.442695, %v5208_v6 }
 0x246   : > { %2602 = vmatprep.mubr.bf16.mxu0 %v2267_v35  ;;  %4118 = vrcp.f32 %v1706_v7  ;;  %v2211_v18 = vmul.f32 %v2147_v21, %v1367_v55  ;;  %v4097_v39 = vpop.eup %4096  ;;  %v3490_v51 = vmul.f32 -1.442695, %v5336_v37  ;;  %v1724_v62 = vadd.f32 1.0, %v4095_v41  ;;  %v5365_v4 = vpop.f32.mrf.mxu0 }
 0x247   : > { %v1369_v53 = vpop.f32.mrf.mxu1  ;;  %2603 = vmatmul.mubr.bf16.gmra.mxu0 %v2266_v13  ;;  %4120 = vrcp.f32 %v1708_v16  ;;  %v5353_v27 = vpop.eup %4098  ;;  %v3491_v15 = vmul.f32 -1.442695, %v5343_v40  ;;  %v1725_v34 = vadd.f32 1.0, %v4097_v39  ;;  %v3507_v47 = vmul.f32 -1.442695, %v5212_v8 }
 0x248   : > { %v2212_v17 = vmul.f32 %v2148_v3, %v1369_v53  ;;  %4122 = vpow2.f32 %v3504_v29  ;;  %v2017_v29 = vpop.permute.xlu0 %2016  ;;  %v2022_v21 = vpop.permute.xlu1 %2021 }
 0x249   : > { %v1371_v36 = vpop.f32.mrf.mxu1  ;;  %4124 = vrcp.f32 %v1709_v56 }
 0x24a   : > { %v2213_v46 = vmul.f32 %v2149_v30, %v1371_v36  ;;  %v4101_v33 = vpop.eup %4100  ;;  %4126 = vrcp.f32 %v1723_v49  ;;  %v2268_v44 = vpack.c.bf16 %v2212_v17, %v2210_v50  ;;  %v5380_v36 = vpop.f32.mrf.mxu0 }
 0x24b   : > { %v5351_v24 = vpop.f32.mrf.mxu1  ;;  %v4103_v35 = vpop.eup %4102  ;;  %4128 = vpow2.f32 %v3488_v48  ;;  %v1895_v55 = vmul.f32 %v4101_v33, %v5266_v25  ;;  %v3492_v25 = vmul.f32 -1.442695, %v5347_v58 }
 0x24c   : > { %v2269_v9 = vpack.c.bf16 %v2213_v46, %v2211_v18  ;;  %v4105_v14 = vpop.eup %4104  ;;  %4130 = vpow2.f32 %v3505_v43  ;;  %v1894_v53 = vmul.f32 %v4103_v35, %v5257_v32  ;;  %v3493_v32 = vmul.f32 -1.442695, %v5356_v0 }
 0x24d   : > { %v1377_v10 = vpop.f32.mrf.mxu1  ;;  %v5360_v13 = vpop.eup %4106  ;;  %v1896_v26 = vmul.f32 %v4105_v14, %v5273_v38  ;;  %4132 = vpow2.f32 %v3489_v31  ;;  %v2151_v41 = vmul.f32 %v2017_v29, %v1895_v55  ;;  %v3508_v18 = vmul.f32 -1.442695, %v5215_v12 }
 0x24e   : > { %2612 = vmatprep.mubr.bf16.mxu0 %v2269_v9  ;;  %v4109_v49 = vpop.eup %4108  ;;  %4134 = vpow2.f32 %v3506_v52  ;;  %v2150_v46 = vmul.f32 %v2017_v29, %v1894_v53  ;;  %v3494_v31 = vmul.f32 -1.442695, %v5365_v4  ;;  %v3509_v35 = vmul.f32 -1.442695, %v5220_v19 }
 0x24f   : > { %v1379_v7 = vpop.f32.mrf.mxu1  ;;  %2613 = vmatmul.mubr.bf16.gmra.mxu0 %v2268_v44  ;;  %v5368_v16 = vpop.eup %4110  ;;  %v1897_v30 = vmul.f32 %v4109_v49, %v5282_v11  ;;  %4136 = vpow2.f32 %v3490_v51  ;;  %v2152_v48 = vmul.f32 %v2022_v21, %v1896_v26  ;;  %v2215_v9 = vmul.f32 %v2151_v41, %v1377_v10 }
 0x250   : > { %v5372_v38 = vpop.eup %4112  ;;  %4138 = vrcp.f32 %v1724_v62  ;;  %v2027_v44 = vpop.permute.xlu0 %2026  ;;  %v3495_v51 = vmul.f32 -1.442695, %v5380_v36  ;;  %v2214_v14 = vmul.f32 %v2150_v46, %v5351_v24  ;;  %v3511_v24 = vmul.f32 -1.442695, %v5226_v22 }
 0x251   : > { %v1381_v3 = vpop.f32.mrf.mxu1  ;;  %v5377_v17 = vpop.eup %4114  ;;  %4140 = vpow2.f32 %v3491_v15  ;;  %v2153_v11 = vmul.f32 %v2022_v21, %v1897_v30  ;;  %v2216_v39 = vmul.f32 %v2152_v48, %v1379_v7 }
 0x252   : > { %v4117_v56 = vpop.eup %4116  ;;  %4142 = vrcp.f32 %v1725_v34  ;;  %v2032_v10 = vpop.permute.xlu1 %2031  ;;  %v3510_v34 = vmul.f32 -1.442695, %v5222_v20 }
 0x253   : > { %v5375_v60 = vpop.f32.mrf.mxu1  ;;  %v4119_v50 = vpop.eup %4118  ;;  %4144 = vpow2.f32 %v3492_v25  ;;  %v2217_v33 = vmul.f32 %v2153_v11, %v1381_v3  ;;  %v1899_v7 = vmul.f32 %v4117_v56, %v5298_v61  ;;  %v2270_v53 = vpack.c.bf16 %v2216_v39, %v2214_v14 }
 0x254   : > { %v4121_v52 = vpop.eup %4120  ;;  %4146 = vpow2.f32 %v3507_v47  ;;  %v1898_v29 = vmul.f32 %v4119_v50, %v5289_v54  ;;  %v5397_v11 = vpop.permute.xlu0 %2036 }
 0x255   : > { %v1387_v43 = vpop.f32.mrf.mxu1  ;;  %v4123_v55 = vpop.eup %4122  ;;  %v1900_v26 = vmul.f32 %v4121_v52, %v5306_v42  ;;  %4148 = vpow2.f32 %v3493_v32  ;;  %v2271_v15 = vpack.c.bf16 %v2217_v33, %v2215_v9  ;;  %v2155_v54 = vmul.f32 %v2027_v44, %v1899_v7 }
 0x256   : > { %v4125_v49 = vpop.eup %4124  ;;  %4150 = vpow2.f32 %v3508_v18  ;;  %v1726_v42 = vadd.f32 1.0, %v4123_v55  ;;  %v2154_v18 = vmul.f32 %v2027_v44, %v1898_v29 }
 0x257   : > { %v1389_v62 = vpop.f32.mrf.mxu1  ;;  %v5391_v21 = vpop.eup %4126  ;;  %v1901_v30 = vmul.f32 %v4125_v49, %v5315_v1  ;;  %4152 = vpow2.f32 %v3494_v31  ;;  %2622 = vmatprep.mubr.bf16.mxu0 %v2271_v15  ;;  %v2156_v25 = vmul.f32 %v2032_v10, %v1900_v26  ;;  %v2219_v31 = vmul.f32 %v2155_v54, %v1387_v43 }
 0x258   : > { %v4129_v61 = vpop.eup %4128  ;;  %4154 = vpow2.f32 %v3509_v35  ;;  %2623 = vmatmul.mubr.bf16.gmra.mxu0 %v2270_v53  ;;  %v5401_v35 = vpop.permute.xlu1 %2041  ;;  %v3515_v53 = vmul.f32 -1.442695, %v5242_v28 }
 0x259   : > { %v1391_v3 = vpop.f32.mrf.mxu1  ;;  %v4131_v48 = vpop.eup %4130  ;;  %4156 = vpow2.f32 %v3495_v51  ;;  %v2157_v32 = vmul.f32 %v2032_v10, %v1901_v30  ;;  %v1710_v56 = vadd.f32 1.0, %v4129_v61  ;;  %v2220_v1 = vmul.f32 %v2156_v25, %v1389_v62 }
 0x25a   : > { %v4133_v41 = vpop.eup %4132  ;;  %4158 = vpow2.f32 %v3510_v34  ;;  %v1727_v52 = vadd.f32 1.0, %v4131_v48  ;;  %v2218_v51 = vmul.f32 %v2154_v18, %v5375_v60  ;;  %v3513_v10 = vmul.f32 -1.442695, %v5236_v2  ;;  %v5411_v29 = vpop.permute.xlu0 %2046 }
 0x25b   : > { %v5395_v47 = vpop.f32.mrf.mxu1  ;;  %v4135_v39 = vpop.eup %4134  ;;  %4160 = vpow2.f32 %v3511_v24  ;;  %v1711_v50 = vadd.f32 1.0, %v4133_v41  ;;  %v2221_v9 = vmul.f32 %v2157_v32, %v1391_v3 }
 0x25c   : > { %v4137_v33 = vpop.eup %4136  ;;  %4162 = vrcp.f32 %v1726_v42  ;;  %v1728_v26 = vadd.f32 1.0, %v4135_v39  ;;  %v2272_v15 = vpack.c.bf16 %v2220_v1, %v2218_v51  ;;  %v5416_v61 = vpop.permute.xlu1 %2051  ;;  %v5830_v1 = vld [vmem:[#allocation33_spill] sm:$0xff] }
 0x25d   : > { %v5399_v46 = vpop.f32.mrf.mxu1  ;;  %v5406_v55 = vpop.eup %4138  ;;  %4164 = vrcp.f32 %v1711_v50  ;;  %v1712_v44 = vadd.f32 1.0, %v4137_v33  ;;  %v2273_v62 = vpack.c.bf16 %v2221_v9, %v2219_v31  ;;  %v1910_v39 = vmul.f32 %v5353_v27, %v5830_v1  ;;  %v5831_v9 = vld [vmem:[#allocation34_spill] sm:$0xff] }
 0x25e   : > { %v4141_v7 = vpop.eup %4140  ;;  %4166 = vrcp.f32 %v1710_v56  ;;  %v1911_v33 = vmul.f32 %v5360_v13, %v5831_v9  ;;  %v5834_v13 = vld [vmem:[#allocation41_spill] sm:$0xff] }
 0x25f   : > { %v5404_v14 = vpop.f32.mrf.mxu1  ;;  %v4143_v49 = vpop.eup %4142  ;;  %4168 = vrcp.f32 %v1712_v44  ;;  %v1713_v34 = vadd.f32 1.0, %v4141_v7  ;;  %2632 = vmatprep.mubr.bf16.mxu0 %v2273_v62  ;;  %v5832_v62 = vld [vmem:[#allocation35_spill] sm:$0xff] }
 0x260   : > { %v4145_v60 = vpop.eup %4144  ;;  %4170 = vrcp.f32 %v1727_v52  ;;  %2633 = vmatmul.mubr.bf16.gmra.mxu0 %v2272_v15  ;;  %v2057_v52 = vpop.permute.xlu0 %2056  ;;  %v1912_v7 = vmul.f32 %v5368_v16, %v5832_v62  ;;  %v5836_v16 = vld [vmem:[#allocation37_spill] sm:$0xff] }
 0x261   : > { %v5408_v43 = vpop.f32.mrf.mxu1  ;;  %v4147_v24 = vpop.eup %4146  ;;  %4172 = vrcp.f32 %v1713_v34  ;;  %v1714_v42 = vadd.f32 1.0, %v4145_v60  ;;  %v1914_v9 = vmul.f32 %v5377_v17, %v5836_v16 }
 0x262   : > { %v4149_v30 = vpop.eup %4148  ;;  %4174 = vrcp.f32 %v1728_v26  ;;  %v1729_v41 = vadd.f32 1.0, %v4147_v24  ;;  %v5833_v26 = vld [vmem:[#allocation36_spill] sm:$0xff]  ;;  %v2062_v60 = vpop.permute.xlu1 %2061 }
 0x263   : > { %v5414_v3 = vpop.f32.mrf.mxu1  ;;  %v4151_v48 = vpop.eup %4150  ;;  %4176 = vpow2.f32 %v3513_v10  ;;  %v1715_v54 = vadd.f32 1.0, %v4149_v30  ;;  %v1913_v15 = vmul.f32 %v5372_v38, %v5833_v26  ;;  %v5433_v30 = vmul.f32 -1.442695, %v5834_v13  ;;  %v5837_v38 = vld [vmem:[#allocation38_spill] sm:$0xff] }
 0x264   : > { %v4153_v32 = vpop.eup %4152  ;;  %4178 = vpow2.f32 %v3515_v53  ;;  %v1730_v34 = vadd.f32 1.0, %v4151_v48  ;;  %v1916_v26 = vmul.f32 %v5406_v55, %v5192_v57  ;;  %v2168_v13 = vmul.f32 %v2062_v60, %v1912_v7 }
 0x265   : > { %v5418_v25 = vpop.f32.mrf.mxu1  ;;  %v4155_v18 = vpop.eup %4154  ;;  %4180 = vrcp.f32 %v1715_v54  ;;  %v1716_v50 = vadd.f32 1.0, %v4153_v32  ;;  %v5835_v54 = vld [vmem:[#allocation43_spill] sm:$0xff]  ;;  %v2169_v28 = vmul.f32 %v2062_v60, %v1913_v15 }
 0x266   : > { %v4157_v31 = vpop.eup %4156  ;;  %4182 = vrcp.f32 %v1714_v42  ;;  %v2166_v42 = vmul.f32 %v2057_v52, %v1910_v39  ;;  %v3514_v32 = vmul.f32 -1.442695, %v5835_v54  ;;  %v5838_v39 = vld [vmem:[#allocation46_spill] sm:$0xff]  ;;  %v1917_v54 = vmul.f32 %v4143_v49, %v5196_v59  ;;  %v2072_v22 = vpop.permute.xlu1 %2071 }
 0x267   : > { %v5420_v56 = vpop.f32.mrf.mxu1  ;;  %v4159_v44 = vpop.eup %4158  ;;  %4184 = vrcp.f32 %v1716_v50  ;;  %v1717_v10 = vadd.f32 1.0, %v4157_v31  ;;  %v1915_v50 = vmul.f32 %v5391_v21, %v5837_v38  ;;  %v5443_v2 = vmul.f32 -1.442695, %v5838_v39 }
 0x268   : > { %v4161_v27 = vpop.eup %4160  ;;  %4186 = vrcp.f32 %v1729_v41  ;;  %v1732_v31 = vadd.f32 1.0, %v4159_v44  ;;  %v2167_v41 = vmul.f32 %v2057_v52, %v1911_v33  ;;  %v1731_v17 = vadd.f32 1.0, %v4155_v18  ;;  %v2067_v33 = vpop.permute.xlu0 %2066 }
 0x269   : > { %v5426_v51 = vpop.f32.mrf.mxu1  ;;  %v4163_v24 = vpop.eup %4162  ;;  %4188 = vrcp.f32 %v1717_v10  ;;  %v1733_v16 = vadd.f32 1.0, %v4161_v27  ;;  %v2170_v15 = vmul.f32 %v2067_v33, %v1914_v9  ;;  %v2171_v60 = vmul.f32 %v2067_v33, %v1915_v50 }
 0x26a   : > { %v4165_v1 = vpop.eup %4164  ;;  %4190 = vrcp.f32 %v1730_v34  ;;  %v2172_v27 = vmul.f32 %v2072_v22, %v1916_v26  ;;  %v5839_v34 = vld [vmem:[#allocation48_spill] sm:$0xff]  ;;  %v2173_v9 = vmul.f32 %v2072_v22, %v1917_v54 }
 0x26b   : > { %v1415_v53 = vpop.f32.mrf.mxu1  ;;  %v4167_v62 = vpop.eup %4166  ;;  %v1903_v52 = vmul.f32 %v4165_v1, %v5332_v23  ;;  %4192 = vrcp.f32 %v1732_v31  ;;  %v3519_v39 = vmul.f32 -1.442695, %v5839_v34 }
 0x26c   : > { %v4169_v10 = vpop.eup %4168  ;;  %v5448_v57 = vmul.f32 %v2166_v42, %v1415_v53  ;;  %v1902_v59 = vmul.f32 %v4167_v62, %v5324_v45  ;;  %4194 = vrcp.f32 %v1731_v17  ;;  %v1918_v62 = vmul.f32 %v4163_v24, %v5200_v63 }
 0x26d   : > { %v1417_v48 = vpop.f32.mrf.mxu1  ;;  %v4171_v44 = vpop.eup %4170  ;;  %v1904_v38 = vmul.f32 %v4169_v10, %v5336_v37  ;;  %4196 = vrcp.f32 %v1733_v16  ;;  %v2159_v50 = vmul.f32 %v5397_v11, %v1903_v52 }
 0x26e   : > { %v4173_v7 = vpop.eup %4172  ;;  %v2158_v26 = vmul.f32 %v5397_v11, %v1902_v59  ;;  %v1919_v17 = vmul.f32 %v4171_v44, %v5206_v5  ;;  %4198 = vpow2.f32 %v3514_v32 }
 0x26f   : > { %v1419_v21 = vpop.f32.mrf.mxu1  ;;  %v4175_v18 = vpop.eup %4174  ;;  %v1905_v19 = vmul.f32 %v4173_v7, %v5343_v40  ;;  %v2160_v53 = vmul.f32 %v5401_v35, %v1904_v38  ;;  %v2223_v22 = vmul.f32 %v2159_v50, %v5399_v46  ;;  %4200 = vpow2.f32 %v3519_v39 }
 0x270   : > { %v5450_v55 = vmul.f32 %v2168_v13, %v1419_v21  ;;  %v4177_v37 = vpop.eup %4176  ;;  %v5458_v13 = vmul.f32 %v2167_v41, %v1417_v48  ;;  %v2222_v11 = vmul.f32 %v2158_v26, %v5395_v47  ;;  %4202 = vpow2.f32 %v5443_v2  ;;  %v2077_v2 = vpop.permute.xlu0 %2076 }
 0x271   : > { %v1421_v49 = vpop.f32.mrf.mxu1  ;;  %v4179_v45 = vpop.eup %4178  ;;  %v2161_v31 = vmul.f32 %v5401_v35, %v1905_v19  ;;  %v2224_v10 = vmul.f32 %v2160_v53, %v5404_v14  ;;  %v1920_v35 = vmul.f32 %v4175_v18, %v5208_v6  ;;  %v1735_v63 = vadd.f32 1.0, %v4177_v37 }
 0x272   : > { %v2278_v23 = vpack.c.bf16 %v5450_v55, %v5448_v57  ;;  %v5460_v42 = vmul.f32 %v2169_v28, %v1421_v49  ;;  %v4181_v40 = vpop.eup %4180  ;;  %v1737_v16 = vadd.f32 1.0, %v4179_v45  ;;  %v5840_v49 = vld [vmem:[#allocation52_spill] sm:$0xff]  ;;  %v2174_v45 = vmul.f32 %v2077_v2, %v1918_v62  ;;  %v5852_v55 = vld [vmem:[#allocation55_spill] sm:$0xff] }
 0x273   : > { %v1425_v1 = vpop.f32.mrf.mxu1  ;;  %v4183_v48 = vpop.eup %4182  ;;  %v2225_v54 = vmul.f32 %v2161_v31, %v5408_v43  ;;  %v1907_v21 = vmul.f32 %v4181_v40, %v5356_v0  ;;  %v2274_v44 = vpack.c.bf16 %v2224_v10, %v2222_v11  ;;  %4204 = vrcp.f32 %v1735_v63  ;;  %v5841_v31 = vld [vmem:[#allocation47_spill] sm:$0xff]  ;;  %v5842_v10 = vld [vmem:[#allocation50_spill] sm:$0xff] }
 0x274   : > { %v2279_v41 = vpack.c.bf16 %v5460_v42, %v5458_v13  ;;  %v4185_v19 = vpop.eup %4184  ;;  %v1906_v46 = vmul.f32 %v4183_v48, %v5347_v58  ;;  %v5477_v43 = vmul.f32 %v2170_v15, %v1425_v1  ;;  %4206 = vrcp.f32 %v1737_v16 }
 0x275   : > { %v1427_v28 = vpop.f32.mrf.mxu1  ;;  %v4187_v24 = vpop.eup %4186  ;;  %v1908_v33 = vmul.f32 %v4185_v19, %v5365_v4  ;;  %v2275_v5 = vpack.c.bf16 %v2225_v54, %v2223_v22  ;;  %4208 = vpow2.f32 %v5433_v30  ;;  %v3523_v18 = vmul.f32 -1.442695, %v5840_v49 }
 0x276   : > { %v4189_v32 = vpop.eup %4188  ;;  %v5483_v39 = vmul.f32 %v2171_v60, %v1427_v28  ;;  %v1921_v4 = vmul.f32 %v4187_v24, %v5212_v8  ;;  %v2082_v8 = vpop.permute.xlu1 %2081  ;;  %v3518_v40 = vmul.f32 -1.442695, %v5841_v31  ;;  %v2175_v26 = vmul.f32 %v2077_v2, %v1919_v17 }
 0x277   : > { %v1429_v14 = vpop.f32.mrf.mxu1  ;;  %v1909_v47 = vmul.f32 %v4189_v32, %v5380_v36  ;;  %2642 = vmatprep.mubr.bf16.mxu0 %v2275_v5  ;;  %v2164_v58 = vmul.f32 %v5416_v61, %v1908_v33  ;;  %v4191_v15 = vpop.eup %4190  ;;  %v2163_v36 = vmul.f32 %v5411_v29, %v1907_v21  ;;  %v3521_v30 = vmul.f32 -1.442695, %v5842_v10  ;;  %v5844_v33 = vld [vmem:[#allocation39_spill] sm:$0xff]  ;;  %v5845_v5 = vld [vmem:[#allocation40_spill] sm:$0xff] }
 0x278   : > { %v5479_v52 = vmul.f32 %v2172_v27, %v1429_v14  ;;  %2643 = vmatmul.mubr.bf16.gmra.mxu0 %v2274_v44  ;;  %v2162_v27 = vmul.f32 %v5411_v29, %v1906_v46  ;;  %v4193_v1 = vpop.eup %4192  ;;  %v2177_v29 = vmul.f32 %v2082_v8, %v1921_v4  ;;  %4210 = vpow2.f32 %v3523_v18  ;;  %v2087_v46 = vpop.permute.xlu0 %2086 }
 0x279   : > { %v1431_v6 = vpop.f32.mrf.mxu1  ;;  %v2165_v60 = vmul.f32 %v5416_v61, %v1909_v47  ;;  %v2228_v37 = vmul.f32 %v2164_v58, %v5420_v56  ;;  %v2227_v50 = vmul.f32 %v2163_v36, %v5418_v25  ;;  %v4195_v22 = vpop.eup %4194  ;;  %v1922_v25 = vmul.f32 %v4191_v15, %v5215_v12  ;;  %v5847_v36 = vld [vmem:[#allocation51_spill] sm:$0xff] }
 0x27a   : > { %v5485_v0 = vmul.f32 %v2173_v9, %v1431_v6  ;;  %v2280_v38 = vpack.c.bf16 %v5479_v52, %v5477_v43  ;;  %v2176_v9 = vmul.f32 %v2082_v8, %v1920_v35  ;;  %v2226_v28 = vmul.f32 %v2162_v27, %v5414_v3  ;;  %v4197_v62 = vpop.eup %4196  ;;  %v5843_v35 = vld [vmem:[#allocation45_spill] sm:$0xff]  ;;  %v2092_v6 = vpop.permute.xlu1 %2091  ;;  %v5848_v8 = vld [vmem:[#allocation54_spill] sm:$0xff] }
 0x27b   : > { %v1435_v7 = vpop.f32.mrf.mxu1  ;;  %v2229_v61 = vmul.f32 %v2165_v60, %v5426_v51  ;;  %v1924_v51 = vmul.f32 %v4193_v1, %v5222_v20  ;;  %v3516_v63 = vmul.f32 -1.442695, %v5843_v35  ;;  %v4199_v16 = vpop.eup %4198  ;;  %4212 = vpow2.f32 %v3518_v40 }
 0x27c   : > { %v2281_v59 = vpack.c.bf16 %v5485_v0, %v5483_v39  ;;  %v5504_v56 = vmul.f32 %v2174_v45, %v1435_v7  ;;  %v2276_v17 = vpack.c.bf16 %v2228_v37, %v2226_v28  ;;  %v4201_v12 = vpop.eup %4200  ;;  %v1923_v20 = vmul.f32 %v4195_v22, %v5844_v33  ;;  %v5846_v7 = vld [vmem:[#allocation56_spill] sm:$0xff] }
 0x27d   : > { %v1437_v53 = vpop.f32.mrf.mxu1  ;;  %v2277_v54 = vpack.c.bf16 %v2229_v61, %v2227_v50  ;;  %v1925_v32 = vmul.f32 %v4197_v62, %v5845_v5  ;;  %4214 = vpow2.f32 %v3521_v30  ;;  %v2178_v4 = vmul.f32 %v2087_v46, %v1922_v25  ;;  %v4203_v2 = vpop.eup %4202  ;;  %v5851_v25 = vld [vmem:[#allocation44_spill] sm:$0xff] }
 0x27e   : > { %v5511_v3 = vmul.f32 %v2175_v26, %v1437_v53  ;;  %4216 = vpow2.f32 %v3516_v63  ;;  %v2180_v58 = vmul.f32 %v2092_v6, %v1924_v51  ;;  %v3527_v15 = vmul.f32 -1.442695, %v5846_v7 }
 0x27f   : > { %v1439_v48 = vpop.f32.mrf.mxu1  ;;  %2652 = vmatprep.mubr.bf16.mxu0 %v2277_v54  ;;  %v3522_v60 = vmul.f32 -1.442695, %v5847_v36  ;;  %v3525_v18 = vmul.f32 -1.442695, %v5848_v8  ;;  %v2179_v53 = vmul.f32 %v2087_v46, %v1923_v20  ;;  %v2181_v13 = vmul.f32 %v2092_v6, %v1925_v32  ;;  %v5850_v54 = vld [vmem:[#allocation42_spill] sm:$0xff] }
 0x280   : > { %v5506_v19 = vmul.f32 %v2176_v9, %v1439_v48  ;;  %2653 = vmatmul.mubr.bf16.gmra.mxu0 %v2276_v17  ;;  %v4205_v37 = vpop.eup %4204  ;;  %v1741_v45 = vadd.f32 1.0, %v4201_v12  ;;  %v5849_v9 = vld [vmem:[#allocation49_spill] sm:$0xff]  ;;  %4218 = vpow2.f32 %v3527_v15  ;;  %v1736_v48 = vadd.f32 1.0, %v4199_v16 }
 0x281   : > { %v1441_v11 = vpop.f32.mrf.mxu1  ;;  %2662 = vmatprep.mubr.bf16.mxu0 %v2279_v41  ;;  %v4207_v1 = vpop.eup %4206  ;;  %v3520_v50 = vmul.f32 -1.442695, %v5849_v9  ;;  %v1739_v22 = vadd.f32 1.0, %v4203_v2  ;;  %4220 = vpow2.f32 %v3522_v60  ;;  %v1927_v62 = vmul.f32 %v4205_v37, %v5850_v54  ;;  %v5853_v12 = vld [vmem:[#allocation53_spill] sm:$0xff] }
 0x282   : > { %v2282_v14 = vpack.c.bf16 %v5506_v19, %v5504_v56  ;;  %v5515_v24 = vmul.f32 %v2177_v29, %v1441_v11  ;;  %v4209_v40 = vpop.eup %4208  ;;  %v1929_v51 = vmul.f32 %v4207_v1, %v5851_v25  ;;  %4222 = vpow2.f32 %v3525_v18  ;;  %v5855_v56 = vld [vmem:[#allocation46_spill] sm:$0xff] }
 0x283   : > { %v1445_v21 = vpop.f32.mrf.mxu1  ;;  %v1734_v17 = vadd.f32 1.0, %v4209_v40  ;;  %4224 = vpow2.f32 %v3520_v50  ;;  %v3524_v33 = vmul.f32 -1.442695, %v5853_v12 }
 0x284   : > { %v2283_v44 = vpack.c.bf16 %v5515_v24, %v5511_v3  ;;  %v5527_v42 = vmul.f32 %v2178_v4, %v1445_v21  ;;  %4226 = vrcp.f32 %v1741_v45  ;;  %v5544_v3 = vpop.permute.xlu0 %2096  ;;  %v5547_v24 = vpop.permute.xlu1 %2101 }
 0x285   : > { %v1447_v47 = vpop.f32.mrf.mxu1  ;;  %v4211_v57 = vpop.eup %4210  ;;  %4228 = vrcp.f32 %v1736_v48  ;;  %v2183_v39 = vmul.f32 %v5544_v3, %v1927_v62  ;;  %v2185_v0 = vmul.f32 %v5547_v24, %v1929_v51 }
 0x286   : > { %v2243_v26 = vmul.f32 %v2179_v53, %v1447_v47  ;;  %4230 = vrcp.f32 %v1739_v22  ;;  %v1745_v32 = vadd.f32 1.0, %v4211_v57  ;;  %v5854_v22 = vld [vmem:[#allocation43_spill] sm:$0xff] }
 0x287   : > { %v1449_v27 = vpop.f32.mrf.mxu1  ;;  %4232 = vrcp.f32 %v1734_v17 }
 0x288   : > { %v5529_v41 = vmul.f32 %v2180_v58, %v1449_v27  ;;  %2663 = vmatmul.mubr.bf16.gmra.mxu0 %v2278_v23  ;;  %v3526_v23 = vmul.f32 -1.442695, %v5852_v55  ;;  %v4213_v21 = vpop.eup %4212 }
 0x289   : > { %v1451_v61 = vpop.f32.mrf.mxu1  ;;  %2672 = vmatprep.mubr.bf16.mxu0 %v2281_v59  ;;  %v1740_v47 = vadd.f32 1.0, %v4213_v21  ;;  %v2107_v21 = vpop.permute.xlu0 %2106 }
 0x28a   : > { %v2284_v30 = vpack.c.bf16 %v5529_v41, %v5527_v42  ;;  %v2245_v28 = vmul.f32 %v2181_v13, %v1451_v61  ;;  %v4215_v59 = vpop.eup %4214  ;;  %4234 = vpow2.f32 %v3526_v23 }
 0x28b   : > { %v5537_v29 = vpop.f32.mrf.mxu1  ;;  %v4217_v5 = vpop.eup %4216  ;;  %v1743_v58 = vadd.f32 1.0, %v4215_v59  ;;  %4236 = vpow2.f32 %v3524_v33 }
 0x28c   : > { %v2285_v63 = vpack.c.bf16 %v2245_v28, %v2243_v26  ;;  %v1738_v2 = vadd.f32 1.0, %v4217_v5  ;;  %4238 = vrcp.f32 %v1745_v32 }
 0x28d   : > { %v1457_v11 = vpop.f32.mrf.mxu1  ;;  %v4219_v18 = vpop.eup %4218  ;;  %4240 = vrcp.f32 %v1740_v47 }
 0x28e   : > { %v2247_v46 = vmul.f32 %v2183_v39, %v1457_v11  ;;  %v4221_v37 = vpop.eup %4220  ;;  %4242 = vrcp.f32 %v1743_v58  ;;  %v1749_v52 = vadd.f32 1.0, %v4219_v18 }
 0x28f   : > { %v5549_v16 = vpop.f32.mrf.mxu1  ;;  %v4223_v53 = vpop.eup %4222  ;;  %4244 = vrcp.f32 %v1738_v2  ;;  %v1744_v1 = vadd.f32 1.0, %v4221_v37 }
 0x290   : > { %2673 = vmatmul.mubr.bf16.gmra.mxu0 %v2280_v38  ;;  %v4225_v43 = vpop.eup %4224  ;;  %v1747_v50 = vadd.f32 1.0, %v4223_v53  ;;  %4246 = vrcp.f32 %v1749_v52 }
 0x291   : > { %v1461_v20 = vpop.f32.mrf.mxu1  ;;  %2682 = vmatprep.mubr.bf16.mxu0 %v2283_v44  ;;  %v4227_v38 = vpop.eup %4226  ;;  %v1742_v40 = vadd.f32 1.0, %v4225_v43  ;;  %4248 = vrcp.f32 %v1744_v1 }
 0x292   : > { %v2249_v6 = vmul.f32 %v2185_v0, %v1461_v20  ;;  %v4229_v45 = vpop.eup %4228  ;;  %v1933_v48 = vmul.f32 %v4227_v38, %v5839_v34  ;;  %4250 = vrcp.f32 %v1747_v50 }
 0x293   : > { %v5557_v4 = vpop.f32.mrf.mxu1  ;;  %v4231_v61 = vpop.eup %4230  ;;  %v1928_v54 = vmul.f32 %v4229_v45, %v5854_v22  ;;  %4252 = vrcp.f32 %v1742_v40 }
 0x294   : > { %v2287_v15 = vpack.c.bf16 %v2249_v6, %v2247_v46  ;;  %v4233_v28 = vpop.eup %4232  ;;  %v1931_v19 = vmul.f32 %v4231_v61, %v5855_v56 }
 0x295   : > { %v1467_v60 = vpop.f32.mrf.mxu1  ;;  %v2184_v39 = vmul.f32 %v5547_v24, %v1928_v54 }
 0x296   : > { %v2187_v59 = vmul.f32 %v2107_v21, %v1931_v19 }
 0x297   : > { %v5559_v27 = vpop.f32.mrf.mxu1  ;;  %v4235_v25 = vpop.eup %4234  ;;  %v2248_v46 = vmul.f32 %v2184_v39, %v5549_v16 }
 0x298   : > { %2683 = vmatmul.mubr.bf16.gmra.mxu0 %v2282_v14  ;;  %v5856_v14 = vld [vmem:[#allocation41_spill] sm:$0xff]  ;;  %v4237_v11 = vpop.eup %4236  ;;  %v1748_v34 = vadd.f32 1.0, %v4235_v25  ;;  %v2251_v2 = vmul.f32 %v2187_v59, %v1467_v60  ;;  %v2294_v59 = vld [vmem:[#allocation2 + $0xb0] sm:$0xff] }
 0x299   : > { %v1471_v13 = vpop.f32.mrf.mxu1  ;;  %2692 = vmatprep.mubr.bf16.mxu0 %v2285_v63  ;;  %v1926_v51 = vmul.f32 %v4233_v28, %v5856_v14  ;;  %v2112_v63 = vpop.permute.xlu1 %2111  ;;  %v1746_v32 = vadd.f32 1.0, %v4237_v11 }
 0x29a   : > { %v2189_v57 = vmul.f32 %v2112_v63, %v1933_v48  ;;  %v4239_v23 = vpop.eup %4238  ;;  %4254 = vrcp.f32 %v1748_v34 }
 0x29b   : > { %v5564_v44 = vpop.f32.mrf.mxu1  ;;  %v4241_v0 = vpop.eup %4240  ;;  %v2182_v5 = vmul.f32 %v5544_v3, %v1926_v51  ;;  %v1937_v58 = vmul.f32 %v4239_v23, %v5840_v49  ;;  %4256 = vrcp.f32 %v1746_v32 }
 0x29c   : > { %v2253_v33 = vmul.f32 %v2189_v57, %v1471_v13  ;;  %v4243_v20 = vpop.eup %4242  ;;  %v1932_v24 = vmul.f32 %v4241_v0, %v5841_v31  ;;  %v2117_v13 = vpop.permute.xlu0 %2116 }
 0x29d   : > { %v1477_v26 = vpop.f32.mrf.mxu1  ;;  %v4245_v47 = vpop.eup %4244  ;;  %v2246_v42 = vmul.f32 %v2182_v5, %v5537_v29  ;;  %v1935_v41 = vmul.f32 %v4243_v20, %v5842_v10 }
 0x29e   : > { %v2122_v3 = vpop.permute.xlu1 %2121  ;;  %v4247_v53 = vpop.eup %4246  ;;  %v2188_v43 = vmul.f32 %v2112_v63, %v1932_v24 }
 0x29f   : > { %v5568_v62 = vpop.f32.mrf.mxu1  ;;  %v2286_v18 = vpack.c.bf16 %v2248_v46, %v2246_v42  ;;  %v2193_v16 = vmul.f32 %v2122_v3, %v1937_v58  ;;  %v4249_v49 = vpop.eup %4248  ;;  %v2191_v60 = vmul.f32 %v2117_v13, %v1935_v41  ;;  %v2297_v46 = vld [vmem:[#allocation2 + $0x18] sm:$0xff]  ;;  %v2298_v58 = vld [vmem:[#allocation2 + $0x50] sm:$0xff] }
 0x2a0   : > { %2693 = vmatmul.mubr.bf16.gmra.mxu0 %v2284_v30  ;;  %v2289_v30 = vpack.c.bf16 %v2253_v33, %v2251_v2  ;;  %v4251_v52 = vpop.eup %4250  ;;  %v2252_v10 = vmul.f32 %v2188_v43, %v5559_v27  ;;  %v1936_v50 = vmul.f32 %v4249_v49, %v5847_v36  ;;  %v2127_v19 = vpop.permute.xlu0 %2126  ;;  %v2295_v33 = vld [vmem:[#allocation2 + $0x1b0] sm:$0xff] }
 0x2a1   : > { %v1481_v17 = vpop.f32.mrf.mxu1  ;;  %2702 = vmatprep.mubr.bf16.mxu0 %v2287_v15  ;;  %v1930_v15 = vmul.f32 %v4245_v47, %v5843_v35  ;;  %v4253_v1 = vpop.eup %4252  ;;  %v1941_v35 = vmul.f32 %v4247_v53, %v5846_v7  ;;  %v2255_v45 = vmul.f32 %v2191_v60, %v1477_v26  ;;  %v1939_v40 = vmul.f32 %v4251_v52, %v5848_v8  ;;  %v2302_v53 = vld [vmem:[#allocation2 + $0x180] sm:$0xff]  ;;  %v2303_v49 = vld [vmem:[#allocation2 + $0x110] sm:$0xff]  ;;  %v2304_v52 = vld [vmem:[#allocation2 + $0x118] sm:$0xff] }
 0x2a2   : > { %v2257_v31 = vmul.f32 %v2193_v16, %v1481_v17  ;;  %v1934_v48 = vmul.f32 %v4253_v1, %v5849_v9  ;;  %v2132_v22 = vpop.permute.xlu1 %2131  ;;  %v2192_v27 = vmul.f32 %v2122_v3, %v1936_v50 }
 0x2a3   : > { %v1485_v6 = vpop.f32.mrf.mxu1  ;;  %v2186_v29 = vmul.f32 %v2107_v21, %v1930_v15  ;;  %v2197_v56 = vmul.f32 %v2132_v22, %v1941_v35  ;;  %v2195_v51 = vmul.f32 %v2127_v19, %v1939_v40  ;;  %v2307_v40 = vld [vmem:[#allocation2 + $0x150] sm:$0xff] }
 0x2a4   : > { %v2291_v28 = vpack.c.bf16 %v2257_v31, %v2255_v45  ;;  %v2190_v26 = vmul.f32 %v2117_v13, %v1934_v48  ;;  %v2256_v36 = vmul.f32 %v2192_v27, %v5568_v62  ;;  %v2306_v45 = vld [vmem:[#allocation2 + $0x120] sm:$0xff] }
 0x2a5   : > { %v1487_v37 = vpop.f32.mrf.mxu1  ;;  %v2250_v61 = vmul.f32 %v2186_v29, %v5557_v4 }
 0x2a6   : > { %v2259_v63 = vmul.f32 %v2195_v51, %v1487_v37  ;;  %v2254_v9 = vmul.f32 %v2190_v26, %v5564_v44  ;;  %v2310_v51 = vld [vmem:[#allocation2 + $0xe0] sm:$0xff]  ;;  %v2311_v26 = vld [vmem:[#allocation2 + $0x188] sm:$0xff] }
 0x2a7   : > { %v1489_v38 = vpop.f32.mrf.mxu1  ;;  %v2288_v54 = vpack.c.bf16 %v2252_v10, %v2250_v61  ;;  %v4255_v14 = vpop.eup %4254 }
 0x2a8   : > { %2703 = vmatmul.mubr.bf16.gmra.mxu0 %v2286_v18  ;;  %v4257_v4 = vpop.eup %4256  ;;  %v1940_v8 = vmul.f32 %v4255_v14, %v5852_v55  ;;  %v2290_v57 = vpack.c.bf16 %v2256_v36, %v2254_v9  ;;  %v2296_v55 = vld [vmem:[#allocation2 + $0xd8] sm:$0xff]  ;;  %v2301_v18 = vld [vmem:[#allocation2 + $0x48] sm:$0xff] }
 0x2a9   : > { %2712 = vmatprep.mubr.bf16.mxu0 %v2289_v30  ;;  %v1491_v25 = vpop.f32.mrf.mxu1  ;;  %v1938_v11 = vmul.f32 %v4257_v4, %v5853_v12  ;;  %v2300_v30 = vld [vmem:[#allocation2 + $0x130] sm:$0xff] }
 0x2aa   : > { %v2261_v7 = vmul.f32 %v2197_v56, %v1491_v25  ;;  %v2196_v23 = vmul.f32 %v2132_v22, %v1940_v8  ;;  %v2308_v22 = vld [vmem:[#allocation2 + $0x108] sm:$0xff]  ;;  %v2309_v56 = vld [vmem:[#allocation2 + $0x60] sm:$0xff] }
 0x2ab   : > { %v2194_v21 = vmul.f32 %v2127_v19, %v1938_v11 }
 0x2ac   : > { %v2293_v17 = vpack.c.bf16 %v2261_v7, %v2259_v63  ;;  %v2260_v34 = vmul.f32 %v2196_v23, %v1489_v38  ;;  %v2305_v38 = vld [vmem:[#allocation2 + $0x98] sm:$0xff]  ;;  %v2314_v23 = vld [vmem:[#allocation2 + $0x80] sm:$0xff] }
 0x2ad   : > { %v2258_v39 = vmul.f32 %v2194_v21, %v1485_v6  ;;  %v2299_v6 = vld [vmem:[#allocation2 + $0x168] sm:$0xff]  ;;  %v2312_v63 = vld [vmem:[#allocation2 + $0x138] sm:$0xff] }
 0x2af   : > { %v2292_v0 = vpack.c.bf16 %v2260_v34, %v2258_v39  ;;  %v2315_v39 = vld [vmem:[#allocation2 + $0x1a8] sm:$0xff] }
 0x2b0   : > { %2713 = vmatmul.mubr.bf16.gmra.mxu0 %v2288_v54 }
 0x2b1   : > { %2722 = vmatprep.mubr.bf16.mxu0 %v2291_v28 }
 0x2b8   : > { %2723 = vmatmul.mubr.bf16.gmra.mxu0 %v2290_v57 }
 0x2b9   : > { %2732 = vmatprep.mubr.bf16.mxu0 %v2293_v17  ;;  %v2313_v17 = vld [vmem:[#allocation2 + $0x140] sm:$0xff] }
 0x2c0   : > { %2733 = vmatmul.mubr.bf16.gmra.mxu0 %v2292_v0 }
 0x2f7   : > { %v2584_v62 = vpop.f32.mrf.mxu0 }
 0x2f8   : > { %v2743_v20 = vadd.f32 %v2584_v62, %v2294_v59  ;;  %v2316_v62 = vld [vmem:[#allocation2 + $0x1b8] sm:$0xff] }
 0x2f9   : > { %v2586_v5 = vpop.f32.mrf.mxu0 }
 0x2fa   : > { %2807 = vst [vmem:[#allocation2 + $0xb0] sm:$0xff] %v2743_v20  ;;  %v2744_v44 = vadd.f32 %v2586_v5, %v2295_v33  ;;  %v2317_v5 = vld [vmem:[#allocation2 + $0x28] sm:$0xff] }
 0x2fb   : > { %v2588_v32 = vpop.f32.mrf.mxu0 }
 0x2fc   : > { %2808 = vst [vmem:[#allocation2 + $0x1b0] sm:$0xff] %v2744_v44  ;;  %v2745_v12 = vadd.f32 %v2588_v32, %v2296_v55 }
 0x2fd   : > { %v2590_v47 = vpop.f32.mrf.mxu0 }
 0x2fe   : > { %2809 = vst [vmem:[#allocation2 + $0xd8] sm:$0xff] %v2745_v12  ;;  %v2746_v2 = vadd.f32 %v2590_v47, %v2297_v46  ;;  %v2318_v46 = vld [vmem:[#allocation2 + $0x1e8] sm:$0xff]  ;;  %v2319_v47 = vld [vmem:[#allocation2 + $0xf8] sm:$0xff] }
 0x2ff   : > { %v2594_v24 = vpop.f32.mrf.mxu0 }
 0x300   : > { %2810 = vst [vmem:[#allocation2 + $0x18] sm:$0xff] %v2746_v2  ;;  %v2747_v42 = vadd.f32 %v2594_v24, %v2298_v58  ;;  %v2320_v24 = vld [vmem:[#allocation2 + $0x160] sm:$0xff] }
 0x301   : > { %v2596_v41 = vpop.f32.mrf.mxu0 }
 0x302   : > { %2811 = vst [vmem:[#allocation2 + $0x50] sm:$0xff] %v2747_v42  ;;  %v2748_v15 = vadd.f32 %v2596_v41, %v2299_v6  ;;  %v2321_v41 = vld [vmem:[#allocation2 + $0x30] sm:$0xff] }
 0x303   : > { %v2598_v3 = vpop.f32.mrf.mxu0 }
 0x304   : > { %2812 = vst [vmem:[#allocation2 + $0x168] sm:$0xff] %v2748_v15  ;;  %v2749_v37 = vadd.f32 %v2598_v3, %v2300_v30  ;;  %v2322_v3 = vld [vmem:[#allocation2 + $0x1e0] sm:$0xff] }
 0x305   : > { %v2600_v16 = vpop.f32.mrf.mxu0 }
 0x306   : > { %2813 = vst [vmem:[#allocation2 + $0x130] sm:$0xff] %v2749_v37  ;;  %v2750_v13 = vadd.f32 %v2600_v16, %v2301_v18  ;;  %v2323_v16 = vld [vmem:[#allocation2] sm:$0xff] }
 0x307   : > { %v2604_v43 = vpop.f32.mrf.mxu0 }
 0x308   : > { %2814 = vst [vmem:[#allocation2 + $0x48] sm:$0xff] %v2750_v13  ;;  %v2751_v60 = vadd.f32 %v2604_v43, %v2302_v53  ;;  %v2324_v43 = vld [vmem:[#allocation2 + $0xf0] sm:$0xff] }
 0x309   : > { %v2606_v31 = vpop.f32.mrf.mxu0 }
 0x30a   : > { %2815 = vst [vmem:[#allocation2 + $0x180] sm:$0xff] %v2751_v60  ;;  %v2752_v29 = vadd.f32 %v2606_v31, %v2303_v49  ;;  %v2325_v31 = vld [vmem:[#allocation2 + $0x8] sm:$0xff] }
 0x30b   : > { %v2608_v10 = vpop.f32.mrf.mxu0 }
 0x30c   : > { %2816 = vst [vmem:[#allocation2 + $0x110] sm:$0xff] %v2752_v29  ;;  %v2753_v1 = vadd.f32 %v2608_v10, %v2304_v52  ;;  %v2326_v10 = vld [vmem:[#allocation2 + $0x148] sm:$0xff] }
 0x30d   : > { %v2610_v35 = vpop.f32.mrf.mxu0 }
 0x30e   : > { %2817 = vst [vmem:[#allocation2 + $0x118] sm:$0xff] %v2753_v1  ;;  %v2754_v50 = vadd.f32 %v2610_v35, %v2305_v38  ;;  %v2327_v35 = vld [vmem:[#allocation2 + $0x1d0] sm:$0xff] }
 0x30f   : > { %v2614_v61 = vpop.f32.mrf.mxu0 }
 0x310   : > { %2818 = vst [vmem:[#allocation2 + $0x98] sm:$0xff] %v2754_v50  ;;  %v2755_v28 = vadd.f32 %v2614_v61, %v2306_v45  ;;  %v2328_v61 = vld [vmem:[#allocation2 + $0x100] sm:$0xff] }
 0x311   : > { %v2616_v48 = vpop.f32.mrf.mxu0 }
 0x312   : > { %2819 = vst [vmem:[#allocation2 + $0x120] sm:$0xff] %v2755_v28  ;;  %v2756_v54 = vadd.f32 %v2616_v48, %v2307_v40  ;;  %v2329_v48 = vld [vmem:[#allocation2 + $0xc8] sm:$0xff] }
 0x313   : > { %v2618_v25 = vpop.f32.mrf.mxu0 }
 0x314   : > { %2820 = vst [vmem:[#allocation2 + $0x150] sm:$0xff] %v2756_v54  ;;  %v2757_v19 = vadd.f32 %v2618_v25, %v2308_v22  ;;  %v2330_v25 = vld [vmem:[#allocation2 + $0x40] sm:$0xff] }
 0x315   : > { %v2620_v27 = vpop.f32.mrf.mxu0 }
 0x316   : > { %2821 = vst [vmem:[#allocation2 + $0x108] sm:$0xff] %v2757_v19  ;;  %v2758_v14 = vadd.f32 %v2620_v27, %v2309_v56  ;;  %v2331_v27 = vld [vmem:[#allocation2 + $0x1f8] sm:$0xff] }
 0x318   : > { %2822 = vst [vmem:[#allocation2 + $0x60] sm:$0xff] %v2758_v14  ;;  %v2624_v7 = vpop.f32.mrf.mxu0 }
 0x319   : > { %v2759_v36 = vadd.f32 %v2624_v7, %v2310_v51  ;;  %v2332_v7 = vld [vmem:[#allocation2 + $0x20] sm:$0xff] }
 0x31a   : > { %v2626_v4 = vpop.f32.mrf.mxu0 }
 0x31b   : > { %2823 = vst [vmem:[#allocation2 + $0xe0] sm:$0xff] %v2759_v36  ;;  %v2760_v8 = vadd.f32 %v2626_v4, %v2311_v26  ;;  %v2333_v4 = vld [vmem:[#allocation2 + $0x128] sm:$0xff] }
 0x31c   : > { %v2628_v9 = vpop.f32.mrf.mxu0 }
 0x31d   : > { %2824 = vst [vmem:[#allocation2 + $0x188] sm:$0xff] %v2760_v8  ;;  %v2761_v11 = vadd.f32 %v2628_v9, %v2312_v63  ;;  %v2334_v9 = vld [vmem:[#allocation2 + $0x1a0] sm:$0xff] }
 0x31e   : > { %v2630_v57 = vpop.f32.mrf.mxu0 }
 0x31f   : > { %2825 = vst [vmem:[#allocation2 + $0x138] sm:$0xff] %v2761_v11  ;;  %v2762_v21 = vadd.f32 %v2630_v57, %v2313_v17  ;;  %v2335_v57 = vld [vmem:[#allocation2 + $0x1f0] sm:$0xff] }
 0x320   : > { %v2634_v34 = vpop.f32.mrf.mxu0 }
 0x321   : > { %2826 = vst [vmem:[#allocation2 + $0x140] sm:$0xff] %v2762_v21  ;;  %v2763_v0 = vadd.f32 %v2634_v34, %v2314_v23  ;;  %v2336_v34 = vld [vmem:[#allocation2 + $0xe8] sm:$0xff] }
 0x322   : > { %v2636_v59 = vpop.f32.mrf.mxu0 }
 0x323   : > { %2827 = vst [vmem:[#allocation2 + $0x80] sm:$0xff] %v2763_v0  ;;  %v2764_v33 = vadd.f32 %v2636_v59, %v2315_v39  ;;  %v2337_v59 = vld [vmem:[#allocation2 + $0x78] sm:$0xff] }
 0x324   : > { %v2638_v20 = vpop.f32.mrf.mxu0 }
 0x325   : > { %2828 = vst [vmem:[#allocation2 + $0x1a8] sm:$0xff] %v2764_v33  ;;  %v2765_v55 = vadd.f32 %v2638_v20, %v2316_v62  ;;  %v2338_v20 = vld [vmem:[#allocation2 + $0x70] sm:$0xff] }
 0x326   : > { %v2640_v44 = vpop.f32.mrf.mxu0 }
 0x327   : > { %2829 = vst [vmem:[#allocation2 + $0x1b8] sm:$0xff] %v2765_v55  ;;  %v2766_v32 = vadd.f32 %v2640_v44, %v2317_v5  ;;  %v2339_v44 = vld [vmem:[#allocation2 + $0x90] sm:$0xff] }
 0x329   : > { %2830 = vst [vmem:[#allocation2 + $0x28] sm:$0xff] %v2766_v32 }
 0x338   : > { %v2644_v12 = vpop.f32.mrf.mxu0 }
 0x339   : > { %v2767_v58 = vadd.f32 %v2644_v12, %v2318_v46  ;;  %v2340_v12 = vld [vmem:[#allocation2 + $0x1d8] sm:$0xff] }
 0x33a   : > { %v2646_v2 = vpop.f32.mrf.mxu0 }
 0x33b   : > { %2831 = vst [vmem:[#allocation2 + $0x1e8] sm:$0xff] %v2767_v58  ;;  %v2768_v6 = vadd.f32 %v2646_v2, %v2319_v47  ;;  %v2341_v2 = vld [vmem:[#allocation2 + $0xd0] sm:$0xff] }
 0x33c   : > { %v2648_v42 = vpop.f32.mrf.mxu0 }
 0x33d   : > { %2832 = vst [vmem:[#allocation2 + $0xf8] sm:$0xff] %v2768_v6  ;;  %v2769_v30 = vadd.f32 %v2648_v42, %v2320_v24  ;;  %v2342_v42 = vld [vmem:[#allocation2 + $0xb8] sm:$0xff] }
 0x33e   : > { %v2650_v15 = vpop.f32.mrf.mxu0 }
 0x33f   : > { %2833 = vst [vmem:[#allocation2 + $0x160] sm:$0xff] %v2769_v30  ;;  %v2770_v18 = vadd.f32 %v2650_v15, %v2321_v41  ;;  %v2343_v15 = vld [vmem:[#allocation2 + $0x88] sm:$0xff] }
 0x340   : > { %v2654_v37 = vpop.f32.mrf.mxu0 }
 0x341   : > { %2834 = vst [vmem:[#allocation2 + $0x30] sm:$0xff] %v2770_v18  ;;  %v2771_v53 = vadd.f32 %v2654_v37, %v2322_v3  ;;  %v2344_v37 = vld [vmem:[#allocation2 + $0xa8] sm:$0xff] }
 0x342   : > { %v2656_v13 = vpop.f32.mrf.mxu0 }
 0x343   : > { %2835 = vst [vmem:[#allocation2 + $0x1e0] sm:$0xff] %v2771_v53  ;;  %v2772_v49 = vadd.f32 %v2656_v13, %v2323_v16  ;;  %v2345_v13 = vld [vmem:[#allocation2 + $0x1c8] sm:$0xff] }
 0x344   : > { %v2658_v60 = vpop.f32.mrf.mxu0 }
 0x345   : > { %2836 = vst [vmem:[#allocation2] sm:$0xff] %v2772_v49  ;;  %v2773_v52 = vadd.f32 %v2658_v60, %v2324_v43  ;;  %v2346_v60 = vld [vmem:[#allocation2 + $0x170] sm:$0xff] }
 0x346   : > { %v2660_v29 = vpop.f32.mrf.mxu0 }
 0x347   : > { %2837 = vst [vmem:[#allocation2 + $0xf0] sm:$0xff] %v2773_v52  ;;  %v2774_v38 = vadd.f32 %v2660_v29, %v2325_v31  ;;  %v2347_v29 = vld [vmem:[#allocation2 + $0x178] sm:$0xff] }
 0x348   : > { %v2664_v1 = vpop.f32.mrf.mxu0 }
 0x349   : > { %2838 = vst [vmem:[#allocation2 + $0x8] sm:$0xff] %v2774_v38  ;;  %v2775_v45 = vadd.f32 %v2664_v1, %v2326_v10  ;;  %v2348_v1 = vld [vmem:[#allocation2 + $0x68] sm:$0xff] }
 0x34a   : > { %v2666_v50 = vpop.f32.mrf.mxu0 }
 0x34b   : > { %2839 = vst [vmem:[#allocation2 + $0x148] sm:$0xff] %v2775_v45  ;;  %v2776_v40 = vadd.f32 %v2666_v50, %v2327_v35  ;;  %v2349_v50 = vld [vmem:[#allocation2 + $0x190] sm:$0xff] }
 0x34c   : > { %v2668_v28 = vpop.f32.mrf.mxu0 }
 0x34d   : > { %2840 = vst [vmem:[#allocation2 + $0x1d0] sm:$0xff] %v2776_v40  ;;  %v2777_v22 = vadd.f32 %v2668_v28, %v2328_v61  ;;  %v2350_v28 = vld [vmem:[#allocation2 + $0x198] sm:$0xff] }
 0x34e   : > { %v2670_v54 = vpop.f32.mrf.mxu0 }
 0x34f   : > { %2841 = vst [vmem:[#allocation2 + $0x100] sm:$0xff] %v2777_v22  ;;  %v2778_v56 = vadd.f32 %v2670_v54, %v2329_v48  ;;  %v2351_v54 = vld [vmem:[#allocation2 + $0x38] sm:$0xff] }
 0x350   : > { %v2674_v19 = vpop.f32.mrf.mxu0 }
 0x351   : > { %2842 = vst [vmem:[#allocation2 + $0xc8] sm:$0xff] %v2778_v56  ;;  %v2779_v14 = vadd.f32 %v2674_v19, %v2330_v25  ;;  %v2352_v19 = vld [vmem:[#allocation2 + $0xc0] sm:$0xff] }
 0x352   : > { %v2676_v51 = vpop.f32.mrf.mxu0 }
 0x353   : > { %2843 = vst [vmem:[#allocation2 + $0x40] sm:$0xff] %v2779_v14  ;;  %v2780_v26 = vadd.f32 %v2676_v51, %v2331_v27  ;;  %v2353_v51 = vld [vmem:[#allocation2 + $0x1c0] sm:$0xff] }
 0x354   : > { %v2678_v36 = vpop.f32.mrf.mxu0 }
 0x355   : > { %2844 = vst [vmem:[#allocation2 + $0x1f8] sm:$0xff] %v2780_v26  ;;  %v2781_v63 = vadd.f32 %v2678_v36, %v2332_v7  ;;  %v2354_v36 = vld [vmem:[#allocation2 + $0x158] sm:$0xff] }
 0x356   : > { %v2680_v8 = vpop.f32.mrf.mxu0 }
 0x357   : > { %2845 = vst [vmem:[#allocation2 + $0x20] sm:$0xff] %v2781_v63  ;;  %v2782_v17 = vadd.f32 %v2680_v8, %v2333_v4  ;;  %v2355_v8 = vld [vmem:[#allocation2 + $0x10] sm:$0xff] }
 0x358   : > { %v2684_v11 = vpop.f32.mrf.mxu0 }
 0x359   : > { %2846 = vst [vmem:[#allocation2 + $0x128] sm:$0xff] %v2782_v17  ;;  %v2783_v23 = vadd.f32 %v2684_v11, %v2334_v9  ;;  %v2356_v11 = vld [vmem:[#allocation2 + $0x58] sm:$0xff] }
 0x35a   : > { %v2686_v21 = vpop.f32.mrf.mxu0 }
 0x35b   : > { %2847 = vst [vmem:[#allocation2 + $0x1a0] sm:$0xff] %v2783_v23  ;;  %v2784_v39 = vadd.f32 %v2686_v21, %v2335_v57  ;;  %v2357_v21 = vld [vmem:[#allocation2 + $0xa0] sm:$0xff] }
 0x35c   : > { %v2688_v0 = vpop.f32.mrf.mxu0 }
 0x35d   : > { %2848 = vst [vmem:[#allocation2 + $0x1f0] sm:$0xff] %v2784_v39  ;;  %v2785_v62 = vadd.f32 %v2688_v0, %v2336_v34 }
 0x35e   : > { %v2690_v33 = vpop.f32.mrf.mxu0 }
 0x35f   : > { %2849 = vst [vmem:[#allocation2 + $0xe8] sm:$0xff] %v2785_v62  ;;  %v2786_v5 = vadd.f32 %v2690_v33, %v2337_v59 }
 0x360   : > { %v2694_v55 = vpop.f32.mrf.mxu0 }
 0x361   : > { %2850 = vst [vmem:[#allocation2 + $0x78] sm:$0xff] %v2786_v5  ;;  %v2787_v32 = vadd.f32 %v2694_v55, %v2338_v20 }
 0x362   : > { %v2696_v46 = vpop.f32.mrf.mxu0 }
 0x363   : > { %2851 = vst [vmem:[#allocation2 + $0x70] sm:$0xff] %v2787_v32  ;;  %v2788_v47 = vadd.f32 %v2696_v46, %v2339_v44 }
 0x364   : > { %v2698_v58 = vpop.f32.mrf.mxu0 }
 0x365   : > { %2852 = vst [vmem:[#allocation2 + $0x90] sm:$0xff] %v2788_v47  ;;  %v2789_v24 = vadd.f32 %v2698_v58, %v2340_v12 }
 0x366   : > { %v2700_v6 = vpop.f32.mrf.mxu0 }
 0x367   : > { %2853 = vst [vmem:[#allocation2 + $0x1d8] sm:$0xff] %v2789_v24  ;;  %v2790_v41 = vadd.f32 %v2700_v6, %v2341_v2 }
 0x368   : > { %v2704_v30 = vpop.f32.mrf.mxu0 }
 0x369   : > { %2854 = vst [vmem:[#allocation2 + $0xd0] sm:$0xff] %v2790_v41  ;;  %v2791_v3 = vadd.f32 %v2704_v30, %v2342_v42 }
 0x36a   : > { %v2706_v18 = vpop.f32.mrf.mxu0 }
 0x36b   : > { %2855 = vst [vmem:[#allocation2 + $0xb8] sm:$0xff] %v2791_v3  ;;  %v2792_v16 = vadd.f32 %v2706_v18, %v2343_v15 }
 0x36c   : > { %v2708_v53 = vpop.f32.mrf.mxu0 }
 0x36d   : > { %2856 = vst [vmem:[#allocation2 + $0x88] sm:$0xff] %v2792_v16  ;;  %v2793_v43 = vadd.f32 %v2708_v53, %v2344_v37 }
 0x36e   : > { %v2710_v49 = vpop.f32.mrf.mxu0 }
 0x36f   : > { %2857 = vst [vmem:[#allocation2 + $0xa8] sm:$0xff] %v2793_v43  ;;  %v2794_v31 = vadd.f32 %v2710_v49, %v2345_v13 }
 0x370   : > { %v2714_v52 = vpop.f32.mrf.mxu0 }
 0x371   : > { %2858 = vst [vmem:[#allocation2 + $0x1c8] sm:$0xff] %v2794_v31  ;;  %v2795_v10 = vadd.f32 %v2714_v52, %v2346_v60 }
 0x372   : > { %v2716_v38 = vpop.f32.mrf.mxu0 }
 0x373   : > { %2859 = vst [vmem:[#allocation2 + $0x170] sm:$0xff] %v2795_v10  ;;  %v2796_v35 = vadd.f32 %v2716_v38, %v2347_v29 }
 0x374   : > { %v2718_v45 = vpop.f32.mrf.mxu0 }
 0x375   : > { %2860 = vst [vmem:[#allocation2 + $0x178] sm:$0xff] %v2796_v35  ;;  %v2797_v61 = vadd.f32 %v2718_v45, %v2348_v1 }
 0x376   : > { %v2720_v40 = vpop.f32.mrf.mxu0 }
 0x377   : > { %2861 = vst [vmem:[#allocation2 + $0x68] sm:$0xff] %v2797_v61  ;;  %v2798_v48 = vadd.f32 %v2720_v40, %v2349_v50 }
 0x378   : > { %v2724_v22 = vpop.f32.mrf.mxu0 }
 0x379   : > { %2862 = vst [vmem:[#allocation2 + $0x190] sm:$0xff] %v2798_v48  ;;  %v2799_v25 = vadd.f32 %v2724_v22, %v2350_v28 }
 0x37a   : > { %v2726_v56 = vpop.f32.mrf.mxu0 }
 0x37b   : > { %2863 = vst [vmem:[#allocation2 + $0x198] sm:$0xff] %v2799_v25  ;;  %v2800_v27 = vadd.f32 %v2726_v56, %v2351_v54 }
 0x37c   : > { %v2728_v14 = vpop.f32.mrf.mxu0 }
 0x37d   : > { %2864 = vst [vmem:[#allocation2 + $0x38] sm:$0xff] %v2800_v27  ;;  %v2801_v7 = vadd.f32 %v2728_v14, %v2352_v19 }
 0x37e   : > { %v2730_v26 = vpop.f32.mrf.mxu0 }
 0x37f   : > { %2865 = vst [vmem:[#allocation2 + $0xc0] sm:$0xff] %v2801_v7  ;;  %v2802_v4 = vadd.f32 %v2730_v26, %v2353_v51 }
 0x380   : > { %v2734_v63 = vpop.f32.mrf.mxu0 }
 0x381   : > { %2866 = vst [vmem:[#allocation2 + $0x1c0] sm:$0xff] %v2802_v4  ;;  %v2803_v9 = vadd.f32 %v2734_v63, %v2354_v36 }
 0x382   : > { %v2736_v17 = vpop.f32.mrf.mxu0 }
 0x383   : > { %2867 = vst [vmem:[#allocation2 + $0x158] sm:$0xff] %v2803_v9  ;;  %v2804_v57 = vadd.f32 %v2736_v17, %v2355_v8 }
 0x384   : > { %v2738_v23 = vpop.f32.mrf.mxu0 }
 0x385   : > { %2868 = vst [vmem:[#allocation2 + $0x10] sm:$0xff] %v2804_v57  ;;  %v2805_v34 = vadd.f32 %v2738_v23, %v2356_v11 }
 0x386   : > { %v2740_v39 = vpop.f32.mrf.mxu0 }
 0x387   : > { %2869 = vst [vmem:[#allocation2 + $0x58] sm:$0xff] %v2805_v34  ;;  %v2806_v0 = vadd.f32 %v2740_v39, %v2357_v21 }
 0x389   : > { %2870 = vst [vmem:[#allocation2 + $0xa0] sm:$0xff] %v2806_v0 }
 0x38a PF: > { %s5857_s3 = sld [smem:[#allocation22_spill]] }
 0x38b   : > { %s5858_s18 = sld [smem:[#allocation21_spill]] }
 0x390   : > { %p2871_p6 = scmp.eq.s32.totalorder %s5857_s3, 7 }
 0x391   : > { %p2872_p0 = scmp.eq.s32.totalorder %s5858_s18, 1 }
 0x393   : > { %p2873_p4 = pnand %p2872_p0, %p2871_p6 }
 0x395   : > { %2876 = sbr.rel (%p2873_p4) target bundleno = 949 (0x3b5), region = 56 }
 0x39a   : > { %v2877_v59 = vld [vmem:[#allocation2 + $0xb0] sm:$0xff]  ;;  %v2879_v33 = vld [vmem:[#allocation2 + $0xd8] sm:$0xff]  ;;  %v2882_v44 = vld [vmem:[#allocation2 + $0x168] sm:$0xff] }
 0x39b   : > { %v2878_v62 = vld [vmem:[#allocation2 + $0x1b0] sm:$0xff]  ;;  %v2880_v5 = vld [vmem:[#allocation2 + $0x18] sm:$0xff]  ;;  %v2884_v47 = vld [vmem:[#allocation2 + $0x48] sm:$0xff] }
 0x39c   : > { %v3600_v20 = vpack.c.bf16 %v2878_v62, %v2877_v59  ;;  %v2881_v55 = vld [vmem:[#allocation2 + $0x50] sm:$0xff]  ;;  %v3601_v32 = vpack.c.bf16 %v2880_v5, %v2879_v33  ;;  %v2885_v58 = vld [vmem:[#allocation2 + $0x180] sm:$0xff]  ;;  %v2887_v6 = vld [vmem:[#allocation2 + $0x118] sm:$0xff] }
 0x39d   : > { %v3602_v46 = vpack.c.bf16 %v2882_v44, %v2881_v55  ;;  %v2883_v12 = vld [vmem:[#allocation2 + $0x130] sm:$0xff]  ;;  %v2888_v42 = vld [vmem:[#allocation2 + $0x98] sm:$0xff]  ;;  %v2889_v15 = vld [vmem:[#allocation2 + $0x120] sm:$0xff] }
 0x39e   : > { %3133 = vst [vmem:[%s4812_s27] sm:$0xff] %v3600_v20  ;;  %v3603_v2 = vpack.c.bf16 %v2884_v47, %v2883_v12  ;;  %v2886_v24 = vld [vmem:[#allocation2 + $0x110] sm:$0xff]  ;;  %3134 = vst [vmem:[%s4812_s27 + $0x8] sm:$0xff] %v3601_v32  ;;  %v3605_v30 = vpack.c.bf16 %v2888_v42, %v2887_v6  ;;  %v2891_v18 = vld [vmem:[#allocation2 + $0x108] sm:$0xff] }
 0x39f   : > { %3135 = vst [vmem:[%s4812_s27 + $0x10] sm:$0xff] %v3602_v46  ;;  %v3604_v41 = vpack.c.bf16 %v2886_v24, %v2885_v58  ;;  %v2890_v3 = vld [vmem:[#allocation2 + $0x150] sm:$0xff]  ;;  %v2892_v16 = vld [vmem:[#allocation2 + $0x60] sm:$0xff]  ;;  %v2894_v13 = vld [vmem:[#allocation2 + $0x188] sm:$0xff] }
 0x3a0   : > { %3136 = vst [vmem:[%s4812_s27 + $0x18] sm:$0xff] %v3603_v2  ;;  %v3606_v37 = vpack.c.bf16 %v2890_v3, %v2889_v15  ;;  %v2893_v53 = vld [vmem:[#allocation2 + $0xe0] sm:$0xff]  ;;  %3138 = vst [vmem:[%s4812_s27 + $0x28] sm:$0xff] %v3605_v30  ;;  %v3607_v43 = vpack.c.bf16 %v2892_v16, %v2891_v18  ;;  %v2895_v60 = vld [vmem:[#allocation2 + $0x138] sm:$0xff] }
 0x3a1   : > { %3137 = vst [vmem:[%s4812_s27 + $0x20] sm:$0xff] %v3604_v41  ;;  %v3608_v49 = vpack.c.bf16 %v2894_v13, %v2893_v53  ;;  %v2896_v31 = vld [vmem:[#allocation2 + $0x140] sm:$0xff]  ;;  %v2898_v10 = vld [vmem:[#allocation2 + $0x1a8] sm:$0xff]  ;;  %v2899_v38 = vld [vmem:[#allocation2 + $0x1b8] sm:$0xff] }
 0x3a2   : > { %v2897_v52 = vld [vmem:[#allocation2 + $0x80] sm:$0xff]  ;;  %3139 = vst [vmem:[%s4812_s27 + $0x30] sm:$0xff] %v3606_v37  ;;  %v3609_v29 = vpack.c.bf16 %v2896_v31, %v2895_v60  ;;  %v2900_v1 = vld [vmem:[#allocation2 + $0x28] sm:$0xff]  ;;  %3140 = vst [vmem:[%s4812_s27 + $0x38] sm:$0xff] %v3607_v43 }
 0x3a3   : > { %3141 = vst [vmem:[%s4812_s27 + $0x40] sm:$0xff] %v3608_v49  ;;  %v3610_v35 = vpack.c.bf16 %v2898_v10, %v2897_v52  ;;  %v3611_v45 = vpack.c.bf16 %v2900_v1, %v2899_v38  ;;  %v2901_v50 = vld [vmem:[#allocation2 + $0x1e8] sm:$0xff]  ;;  %v2902_v61 = vld [vmem:[#allocation2 + $0xf8] sm:$0xff]  ;;  %v2903_v40 = vld [vmem:[#allocation2 + $0x160] sm:$0xff] }
 0x3a4   : > { %3142 = vst [vmem:[%s4812_s27 + $0x48] sm:$0xff] %v3609_v29  ;;  %v3612_v28 = vpack.c.bf16 %v2902_v61, %v2901_v50  ;;  %v2904_v48 = vld [vmem:[#allocation2 + $0x30] sm:$0xff]  ;;  %v2905_v22 = vld [vmem:[#allocation2 + $0x1e0] sm:$0xff]  ;;  %v2908_v27 = vld [vmem:[#allocation2 + $0x8] sm:$0xff] }
 0x3a5   : > { %v2906_v54 = vld [vmem:[#allocation2] sm:$0xff]  ;;  %3143 = vst [vmem:[%s4812_s27 + $0x50] sm:$0xff] %v3610_v35  ;;  %3144 = vst [vmem:[%s4812_s27 + $0x58] sm:$0xff] %v3611_v45  ;;  %v3613_v25 = vpack.c.bf16 %v2904_v48, %v2903_v40  ;;  %v2907_v19 = vld [vmem:[#allocation2 + $0xf0] sm:$0xff] }
 0x3a6   : > { %v3614_v56 = vpack.c.bf16 %v2906_v54, %v2905_v22  ;;  %v2909_v14 = vld [vmem:[#allocation2 + $0x148] sm:$0xff]  ;;  %3145 = vst [vmem:[%s4812_s27 + $0x60] sm:$0xff] %v3612_v28  ;;  %v3615_v51 = vpack.c.bf16 %v2908_v27, %v2907_v19  ;;  %v2910_v7 = vld [vmem:[#allocation2 + $0x1d0] sm:$0xff]  ;;  %v2911_v26 = vld [vmem:[#allocation2 + $0x100] sm:$0xff] }
 0x3a7   : > { %v2912_v36 = vld [vmem:[#allocation2 + $0xc8] sm:$0xff]  ;;  %3146 = vst [vmem:[%s4812_s27 + $0x68] sm:$0xff] %v3613_v25  ;;  %v3616_v4 = vpack.c.bf16 %v2910_v7, %v2909_v14  ;;  %v2913_v8 = vld [vmem:[#allocation2 + $0x40] sm:$0xff]  ;;  %v2914_v9 = vld [vmem:[#allocation2 + $0x1f8] sm:$0xff] }
 0x3a8   : > { %3147 = vst [vmem:[%s4812_s27 + $0x70] sm:$0xff] %v3614_v56  ;;  %v3617_v63 = vpack.c.bf16 %v2912_v36, %v2911_v26  ;;  %v2915_v17 = vld [vmem:[#allocation2 + $0x20] sm:$0xff]  ;;  %3148 = vst [vmem:[%s4812_s27 + $0x78] sm:$0xff] %v3615_v51  ;;  %v3618_v11 = vpack.c.bf16 %v2914_v9, %v2913_v8  ;;  %v2916_v57 = vld [vmem:[#allocation2 + $0x128] sm:$0xff] }
 0x3a9   : > { %v2917_v23 = vld [vmem:[#allocation2 + $0x1a0] sm:$0xff]  ;;  %v2918_v21 = vld [vmem:[#allocation2 + $0x1f0] sm:$0xff]  ;;  %3149 = vst [vmem:[%s4812_s27 + $0x80] sm:$0xff] %v3616_v4  ;;  %v3619_v34 = vpack.c.bf16 %v2916_v57, %v2915_v17  ;;  %v2919_v0 = vld [vmem:[#allocation2 + $0xe8] sm:$0xff] }
 0x3aa   : > { %3150 = vst [vmem:[%s4812_s27 + $0x88] sm:$0xff] %v3617_v63  ;;  %v3620_v39 = vpack.c.bf16 %v2918_v21, %v2917_v23  ;;  %v2920_v59 = vld [vmem:[#allocation2 + $0x78] sm:$0xff]  ;;  %v2921_v62 = vld [vmem:[#allocation2 + $0x70] sm:$0xff]  ;;  %3151 = vst [vmem:[%s4812_s27 + $0x90] sm:$0xff] %v3618_v11 }
 0x3ab   : > { %v3621_v33 = vpack.c.bf16 %v2920_v59, %v2919_v0  ;;  %v2922_v20 = vld [vmem:[#allocation2 + $0x90] sm:$0xff]  ;;  %v2923_v5 = vld [vmem:[#allocation2 + $0x1d8] sm:$0xff]  ;;  %3152 = vst [vmem:[%s4812_s27 + $0x98] sm:$0xff] %v3619_v34  ;;  %v2926_v12 = vld [vmem:[#allocation2 + $0x88] sm:$0xff] }
 0x3ac   : > { %v2924_v55 = vld [vmem:[#allocation2 + $0xd0] sm:$0xff]  ;;  %3153 = vst [vmem:[%s4812_s27 + $0xa0] sm:$0xff] %v3620_v39  ;;  %v3622_v44 = vpack.c.bf16 %v2922_v20, %v2921_v62  ;;  %v2925_v46 = vld [vmem:[#allocation2 + $0xb8] sm:$0xff]  ;;  %v2927_v47 = vld [vmem:[#allocation2 + $0xa8] sm:$0xff] }
 0x3ad   : > { %v3623_v32 = vpack.c.bf16 %v2924_v55, %v2923_v5  ;;  %3154 = vst [vmem:[%s4812_s27 + $0xa8] sm:$0xff] %v3621_v33  ;;  %v3624_v58 = vpack.c.bf16 %v2926_v12, %v2925_v46  ;;  %v2928_v2 = vld [vmem:[#allocation2 + $0x1c8] sm:$0xff]  ;;  %v2929_v24 = vld [vmem:[#allocation2 + $0x170] sm:$0xff]  ;;  %v2930_v6 = vld [vmem:[#allocation2 + $0x178] sm:$0xff] }
 0x3ae   : > { %3155 = vst [vmem:[%s4812_s27 + $0xb0] sm:$0xff] %v3622_v44  ;;  %v3625_v42 = vpack.c.bf16 %v2928_v2, %v2927_v47  ;;  %v3626_v41 = vpack.c.bf16 %v2930_v6, %v2929_v24  ;;  %v2931_v30 = vld [vmem:[#allocation2 + $0x68] sm:$0xff]  ;;  %v2932_v15 = vld [vmem:[#allocation2 + $0x190] sm:$0xff]  ;;  %v2933_v3 = vld [vmem:[#allocation2 + $0x198] sm:$0xff] }
 0x3af   : > { %3156 = vst [vmem:[%s4812_s27 + $0xb8] sm:$0xff] %v3623_v32  ;;  %3157 = vst [vmem:[%s4812_s27 + $0xc0] sm:$0xff] %v3624_v58  ;;  %v3627_v18 = vpack.c.bf16 %v2932_v15, %v2931_v30  ;;  %v2934_v37 = vld [vmem:[#allocation2 + $0x38] sm:$0xff]  ;;  %v2935_v16 = vld [vmem:[#allocation2 + $0xc0] sm:$0xff] }
 0x3b0   : > { %v2936_v53 = vld [vmem:[#allocation2 + $0x1c0] sm:$0xff]  ;;  %3158 = vst [vmem:[%s4812_s27 + $0xc8] sm:$0xff] %v3625_v42  ;;  %3159 = vst [vmem:[%s4812_s27 + $0xd0] sm:$0xff] %v3626_v41  ;;  %v3628_v13 = vpack.c.bf16 %v2934_v37, %v2933_v3  ;;  %v2937_v49 = vld [vmem:[#allocation2 + $0x158] sm:$0xff] }
 0x3b1   : > { %v3629_v43 = vpack.c.bf16 %v2936_v53, %v2935_v16  ;;  %v2938_v60 = vld [vmem:[#allocation2 + $0x10] sm:$0xff]  ;;  %v2939_v31 = vld [vmem:[#allocation2 + $0x58] sm:$0xff]  ;;  %3160 = vst [vmem:[%s4812_s27 + $0xd8] sm:$0xff] %v3627_v18  ;;  %v2940_v29 = vld [vmem:[#allocation2 + $0xa0] sm:$0xff] }
 0x3b2   : > { %v3630_v52 = vpack.c.bf16 %v2938_v60, %v2937_v49  ;;  %3161 = vst [vmem:[%s4812_s27 + $0xe0] sm:$0xff] %v3628_v13  ;;  %v3631_v10 = vpack.c.bf16 %v2940_v29, %v2939_v31 }
 0x3b3   : > { %3162 = vst [vmem:[%s4812_s27 + $0xe8] sm:$0xff] %v3629_v43 }
 0x3b4   : > { %3163 = vst [vmem:[%s4812_s27 + $0xf0] sm:$0xff] %v3630_v52  ;;  %3164 = vst [vmem:[%s4812_s27 + $0xf8] sm:$0xff] %v3631_v10 }
 0x3b5 PF: > { %s5859_s29 = sld [smem:[#allocation23_spill]]  ;;  %s3180_s6 = sshll.u32 %s4812_s27, 4  ;;  %s5634_s6 = int_to_ptr.vmem [resolvable:$true] %s3180_s6 }
 0x3b6   : > { %s5860_s2 = sld [smem:[#allocation27_spill]]  ;;  %s3166_s21 = scalar_lea.sflag [#allocation8], %s4769_s28 }
 0x3b7   : > { %s5861_s20 = sld [smem:[#allocation61_spill]]  ;;  %s4338_s13 = scalar_lea.vmem %s5634_s6, 4096 }
 0x3b8   : > { %p4339_p3 = scmp.ne.s32.totalorder %s5634_s6, %s4338_s13  ;;  %s4493_s24 = smov [#allocation11]  }
 0x3b9   : > { %s4342_s12 = sshll.u32 %s4493_s24, 4  ;;  %s4343_s12 = int_to_ptr.vmem [resolvable:$false] %s4342_s12 }
 0x3ba   : > { %s4344_s22 = scalar_lea.vmem %s4343_s12, 8192  ;;  %p4345_p12 = scmp.lt.s32.totalorder %s5634_s6, %s4343_s12 }
 0x3bb   : > { %s3633_s19 = sshll.u32 %s5859_s29, 12  ;;  %p4346_p2 = scmp.lt.s32.totalorder %s4344_s22, %s4338_s13 }
 0x3bc   : > { %p5862_p5 = scmp.ne.s32.totalorder %s5860_s2, 0 }
 0x3bd   : > { %s5631_s25 = scalar_lea.hbm %s5861_s20, %s3633_s19  ;;  %p4347_p1 = por %p4346_p2, %p4345_p12 }
 0x3be   : > { %p4340_p11 = pnand %p4339_p3, %p5862_p5 }
 0x3c0   : > { %p4341_p9 = pneg %p4340_p11 }
 0x3c2   : > { %p4348_p13 = pnand %p4347_p1, %p4341_p9 }
 0x3c4   : > { %4351 = shalt.err (!%p4348_p13)
}
 0x3c5   : > { %s4352_s5 = scalar_lea.hbm %s5631_s25, 4096  ;;  %s4356_s26 = scalar_lea.hbm %s5861_s20, 8192 }
 0x3c6   : > { %p4353_p7 = scmp.ne.s32.totalorder %s5631_s25, %s4352_s5  ;;  %p4357_p6 = scmp.lt.s32.totalorder %s5631_s25, %s5861_s20 }
 0x3c7   : > { %p4358_p0 = scmp.lt.s32.totalorder %s4356_s26, %s4352_s5 }
 0x3c8   : > { %p4354_p8 = pnand %p4353_p7, %p5862_p5 }
 0x3c9   : > { %p4359_p4 = por %p4358_p0, %p4357_p6 }
 0x3ca   : > { %p4355_p10 = pneg %p4354_p8 }
 0x3cc   : > { %p4360_p3 = pnand %p4359_p4, %p4355_p10 }
 0x3ce   : > { %4363 = shalt.err (!%p4360_p3)
}
 0x3cf   : > { %s4494_s15 = smov 128   ;;  %s4495_s16 = smov 8  }
 0x3d0   : > { %3674 = dma.vmem_to_hbm [thread:$0]  (%p5862_p5), %s5634_s6, 4096, %s5631_s25, %s3166_s21, %s4494_s15, %s4494_s15, %s4495_s16  }
 0x3d1 PF: > { %s5863_s3 = sld [smem:[#allocation20_spill]]  ;;  %p3692_p11 = scmp.ge.s32.totalorder %s4480_s17, 2 }
 0x3d2   : > { %s5864_s18 = sld [smem:[#allocation28_spill]] }
 0x3d7   : > { %s3195_s29 = sand.u32 1, %s5863_s3  }
 0x3d8   : > { %p5865_p9 = scmp.ne.s32.totalorder %s5864_s18, 0  ;;  %s3196_s19 = scalar_lea.sflag [#allocation8], %s3195_s29 }
 0x3da   : > { %p3688_p12 = pnand %p3692_p11, %p5865_p9 }
 0x3dc   : > { %p3689_p2 = pneg %p3688_p12 }
 0x3de   : > { %4427 = dma.done.wait (%p3689_p2), %s3196_s19, 4096  }
 0x3df   : > { %4429 = vsyncadd (%p3689_p2), %s3196_s19, 4294963200  ;;  %s35_s17 = sadd.s32 1, %s4480_s17   ;;  %s5867_s11 = sld [smem:[#allocation24_spill]] }
 0x3e0   : > { %p5664_p1 = scmp.ge.s32.totalorder %s35_s17, 34   ;;  %s5868_s12 = sld [smem:[#allocation25_spill]] }
 0x3e1   : > { %s5869_s13 = sld [smem:[#allocation26_spill]]  ;;  %s5873_s1 = smov %s4436_s30 }
 0x3e2   : > { %s5870_s14 = sld [smem:[#allocation29_spill]]  ;;  %s5874_s30 = smov %s4440_s7 }
 0x3e3   : > { %s5871_s15 = sld [smem:[#allocation30_spill]]  ;;  %s5875_s7 = smov %s4722_s23 }
 0x3e4   : > { %s5872_s16 = sld [smem:[#allocation32_spill]]  ;;  %s5876_s8 = smov %s4448_s9 }
 0x3e5   : > { %s5877_s9 = smov %s4452_s10  ;;  %s5878_s10 = smov %s4706_s4 }
 0x3e6   :  { %34 = sbr.rel (!%p5664_p1) target bundleno = 40 (0x28), region = 112 }
 0x3eb   :  { %3201 = vsyncpa [#allocation7], 1 }
 0x3ec   :  { %3203 = vsyncpa [#allocation7 + $0x1], 1 }
 0x3ed   :  { %3204 = vsyncpa [#allocation10], 1 }
 0x3ee   :  { %3206 = vsyncpa [#allocation10 + $0x1], 1 }
 0x3ef   :  { %3207 = vsyncpa [#allocation8], 1 }
 0x3f0   :  { %3209 = vsyncpa [#allocation8 + $0x1], 1 }

</bundles_post_ra>
